<compile_context>
chip_gen: v6e
topology: v6e:2x2x1
jax: 0.10.0
libtpu: 0.0.40
codegen_flags: <defaults>
</compile_context>

<pallas_src>
import functools
import math

import jax
import jax.numpy as jnp
from jax.experimental import pallas as pl
from jax.experimental.pallas import tpu as pltpu

EPS = 1e-5            # PyTorch BatchNorm1d default eps
BF16 = jnp.bfloat16
F32 = jnp.float32


# ----------------------------------------------------------------------------
# In-kernel math helpers (guaranteed-lowerable ops only)
# ----------------------------------------------------------------------------
def _erf(x):
    """Abramowitz & Stegun 7.1.26 polynomial erf, |err| <= 1.5e-7."""
    a1, a2, a3, a4, a5 = (0.254829592, -0.284496736, 1.421413741,
                          -1.453152027, 1.061405429)
    p = 0.3275911
    ax = jnp.abs(x)
    t = 1.0 / (1.0 + p * ax)
    poly = ((((a5 * t + a4) * t + a3) * t + a2) * t + a1) * t
    y = 1.0 - poly * jnp.exp(-(ax * ax))
    return jnp.where(x >= 0.0, y, -y)


def _gelu_erf(x):
    """erf-based GELU, matching torch.nn.GELU() (approximate='none')."""
    return 0.5 * x * (1.0 + _erf(x * (1.0 / math.sqrt(2.0))))


def _batchnorm(y, gamma, beta):
    """BatchNorm1d over all (batch*seq) rows per feature, train-mode (biased)
    statistics, numerically stable centered two-pass variance."""
    mean = jnp.mean(y, axis=0, keepdims=True)                   # (1, D)
    ctr = y - mean
    var = jnp.mean(ctr * ctr, axis=0, keepdims=True)            # (1, D)
    return ctr * (jax.lax.rsqrt(var + EPS) * gamma) + beta


# ----------------------------------------------------------------------------
# Fused encoder kernel: grid = (n_layers,), whole batch per step.
# ----------------------------------------------------------------------------
def make_encoder_kernel(B, L, C, D, H, dff, pooling):
    dk = D // H
    BL = B * L

    def kernel(x_ref, wp_ref, bp_ref, wpos_ref,
               wqkv_ref, bqkv_ref, wo_ref, bo_ref,
               g1_ref, be1_ref, w1_ref, b1_ref, w2_ref, b2_ref,
               g2_ref, be2_ref,
               o_ref, src_ref, scores_ref):
        layer = pl.program_id(0)

        # ---- layer 0: fused input projection + positional encoding ---------
        @pl.when(layer == 0)
        def _():
            x2 = x_ref[...].reshape(BL, C)                        # (BL, C)
            proj = jnp.dot(x2.astype(BF16), wp_ref[...],
                           preferred_element_type=F32)            # (BL, D)
            proj = proj.reshape(B, L, D) + bp_ref[...] + wpos_ref[...]
            src_ref[...] = proj.reshape(BL, D)                    # dropout p=0
            scores_ref[...] = jnp.zeros_like(scores_ref)          # prev = None

        src = src_ref[...]                                        # (BL, D) f32

        # ---- multi-head attention (fused QKV; per-head lane slices) --------
        qkv = jnp.dot(src.astype(BF16), wqkv_ref[0],
                      preferred_element_type=F32) + bqkv_ref[0]   # (BL, 3D)
        q = qkv[:, :D]
        k = qkv[:, D:2 * D]
        v = qkv[:, 2 * D:]

        ctx_heads = []
        for h in range(H):
            sl = slice(h * dk, (h + 1) * dk)
            qh = q[:, sl].reshape(B, L, dk).astype(BF16)
            kh = k[:, sl].reshape(B, L, dk).astype(BF16)
            vh = v[:, sl].reshape(B, L, dk).astype(BF16)
            # 1/sqrt(dk) scale is already folded into the packed W_Q / b_Q.
            sc = jnp.einsum('bqd,bkd->bqk', qh, kh,
                            preferred_element_type=F32)           # (B, L, L)
            sc = sc + scores_ref[h]      # residual attention (Realformer)
            scores_ref[h] = sc           # cumulative scores -> next layer (VMEM)
            m = jnp.max(sc, axis=-1, keepdims=True)
            e = jnp.exp(sc - m)
            attn = e / jnp.sum(e, axis=-1, keepdims=True)         # exact divide
            ctx = jnp.einsum('bqk,bkd->bqd', attn.astype(BF16), vh,
                             preferred_element_type=F32)          # (B, L, dk)
            ctx_heads.append(ctx.reshape(BL, dk))
        ctx_all = jnp.concatenate(ctx_heads, axis=-1)             # (BL, D)

        attn_out = jnp.dot(ctx_all.astype(BF16), wo_ref[0],
                           preferred_element_type=F32) + bo_ref[0]
        y = src + attn_out                                        # residual add
        y = _batchnorm(y, g1_ref[0], be1_ref[0])                  # BN (attn)

        # ---- position-wise FFN ----------------------------------------------
        hid = jnp.dot(y.astype(BF16), w1_ref[0],
                      preferred_element_type=F32) + b1_ref[0]     # (BL, dff)
        hid = _gelu_erf(hid)
        ffn = jnp.dot(hid.astype(BF16), w2_ref[0],
                      preferred_element_type=F32) + b2_ref[0]     # (BL, D)
        y2 = y + ffn                                              # residual add
        out = _batchnorm(y2, g2_ref[0], be2_ref[0])               # BN (ffn)

        src_ref[...] = out                                        # carry to next layer

        # ---- last layer: emit result (fused mean pooling) -------------------
        @pl.when(layer == pl.num_programs(0) - 1)
        def _():
            if pooling:
                # per-batch mean over the L sequence rows -> (B, D)
                rows = [jnp.mean(out[b * L:(b + 1) * L, :], axis=0, keepdims=True)
                        for b in range(B)]
                o_ref[...] = jnp.concatenate(rows, axis=0)
            else:
                o_ref[...] = out.reshape(B, L, D)

    return kernel


# ----------------------------------------------------------------------------
# Parameter init (synthetic, deterministic) + packing
# (fused QKV, stacked layers, scale folded into Q, bf16 matmul operands)
# ----------------------------------------------------------------------------
def init_params(key, C, L, D, H, dff, n_layers):
    k_wp, k_bp, k_pos, k_layers = jax.random.split(key, 4)
    params = {
        'W_P': jax.random.normal(k_wp, (C, D), F32) * 0.1,
        'b_P': jax.random.normal(k_bp, (1, D), F32) * 0.01,
        # positional_encoding(pe='zeros') -> uniform(-0.02, 0.02), shape (L, D)
        'W_pos': jax.random.uniform(k_pos, (L, D), F32, -0.02, 0.02),
        'layers': [],
    }
    lkeys = jax.random.split(k_layers, n_layers)
    for i in range(n_layers):
        ks = jax.random.split(lkeys[i], 12)
        params['layers'].append(dict(
            wq=jax.random.normal(ks[0], (D, D), F32) * 0.1,
            bq=jax.random.normal(ks[1], (1, D), F32) * 0.01,
            wk=jax.random.normal(ks[2], (D, D), F32) * 0.1,
            bk=jax.random.normal(ks[3], (1, D), F32) * 0.01,
            wv=jax.random.normal(ks[4], (D, D), F32) * 0.1,
            bv=jax.random.normal(ks[5], (1, D), F32) * 0.01,
            wo=jax.random.normal(ks[6], (D, D), F32) * 0.1,
            bo=jax.random.normal(ks[7], (1, D), F32) * 0.01,
            g1=jnp.ones((1, D), F32), be1=jnp.zeros((1, D), F32),
            w1=jax.random.normal(ks[8], (D, dff), F32) * 0.1,
            b1=jax.random.normal(ks[9], (1, dff), F32) * 0.01,
            w2=jax.random.normal(ks[10], (dff, D), F32) * 0.1,
            b2=jax.random.normal(ks[11], (1, D), F32) * 0.01,
            g2=jnp.ones((1, D), F32), be2=jnp.zeros((1, D), F32),
        ))
    return params


def pack_params(params, n_heads):
    D = params['W_pos'].shape[-1]
    dk = D // n_heads
    scale = float(dk) ** -0.5          # folded into W_Q / b_Q (lsa=False)
    layers = params['layers']

    def stack(name):
        return jnp.stack([lp[name] for lp in layers], axis=0)

    wqkv = jnp.stack(
        [jnp.concatenate([lp['wq'] * scale, lp['wk'], lp['wv']], axis=1)
         for lp in layers], axis=0)
    bqkv = jnp.stack(
        [jnp.concatenate([lp['bq'] * scale, lp['bk'], lp['bv']], axis=1)
         for lp in layers], axis=0)

    return {
        'W_P': params['W_P'].astype(BF16),
        'b_P': params['b_P'],
        'W_pos': params['W_pos'],
        'wqkv': wqkv.astype(BF16),        # (n_layers, D, 3D)
        'bqkv': bqkv,                     # (n_layers, 1, 3D)
        'wo': stack('wo').astype(BF16),   # (n_layers, D, D)
        'bo': stack('bo'),
        'g1': stack('g1'), 'be1': stack('be1'),
        'w1': stack('w1').astype(BF16),   # (n_layers, D, dff)
        'b1': stack('b1'),
        'w2': stack('w2').astype(BF16),   # (n_layers, dff, D)
        'b2': stack('b2'),
        'g2': stack('g2'), 'be2': stack('be2'),
    }


# ----------------------------------------------------------------------------
# Forward wrapper: one pallas_call for the whole encoder.
# ----------------------------------------------------------------------------
def tst_encoder_forward(x, params, n_heads, pooling=True):
    B, L, C = x.shape
    D = params['W_pos'].shape[-1]
    n_layers, _, dff = params['w1'].shape
    H = n_heads
    assert D % H == 0

    def const_spec(*shape):             # same block every layer step
        return pl.BlockSpec(shape, lambda l: (0,) * len(shape))

    def layer_spec(*shape):             # select layer l's stacked weights
        return pl.BlockSpec((1,) + shape, lambda l: (l,) + (0,) * len(shape))

    if pooling:
        out_shape = jax.ShapeDtypeStruct((B, D), F32)
        out_spec = pl.BlockSpec((B, D), lambda l: (0, 0))
    else:
        out_shape = jax.ShapeDtypeStruct((B, L, D), F32)
        out_spec = pl.BlockSpec((B, L, D), lambda l: (0, 0, 0))

    kernel = make_encoder_kernel(B, L, C, D, H, dff, pooling)

    out = pl.pallas_call(
        kernel,
        grid=(n_layers,),
        in_specs=[
            const_spec(B, L, C),        # x
            const_spec(C, D),           # W_P (bf16)
            const_spec(1, D),           # b_P
            const_spec(L, D),           # W_pos
            layer_spec(D, 3 * D),       # fused W_qkv (bf16, scale folded into Q)
            layer_spec(1, 3 * D),       # fused b_qkv
            layer_spec(D, D),           # W_o (bf16)
            layer_spec(1, D),           # b_o
            layer_spec(1, D),           # BN-attn gamma
            layer_spec(1, D),           # BN-attn beta
            layer_spec(D, dff),         # FFN W1 (bf16)
            layer_spec(1, dff),         # FFN b1
            layer_spec(dff, D),         # FFN W2 (bf16)
            layer_spec(1, D),           # FFN b2
            layer_spec(1, D),           # BN-ffn gamma
            layer_spec(1, D),           # BN-ffn beta
        ],
        out_specs=out_spec,
        out_shape=out_shape,
        scratch_shapes=[
            pltpu.VMEM((B * L, D), F32),       # src: resident across layers
            pltpu.VMEM((H, B, L, L), F32),     # cumulative attention scores
        ],
        compiler_params=pltpu.CompilerParams(
            dimension_semantics=("arbitrary",),   # layers carry scratch state
            vmem_limit_bytes=64 * 1024 * 1024,
        ),
    )(x, params['W_P'], params['b_P'], params['W_pos'],
      params['wqkv'], params['bqkv'], params['wo'], params['bo'],
      params['g1'], params['be1'], params['w1'], params['b1'],
      params['w2'], params['b2'], params['g2'], params['be2'])

    if pooling:
        return out                          # (B, D)
    return jnp.transpose(out, (0, 2, 1))    # (B, D, L), matches torch permute


# ----------------------------------------------------------------------------
# Pure-JAX reference (same bf16-rounded weights, f32 math) for a smoke check.
# ----------------------------------------------------------------------------
def _bn_ref(y, g, b):
    mean = y.mean(axis=(0, 1), keepdims=True)
    var = ((y - mean) ** 2).mean(axis=(0, 1), keepdims=True)
    return (y - mean) * jax.lax.rsqrt(var + EPS) * g + b


def reference_forward(x, packed, n_heads, pooling=True):
    hp = jax.lax.Precision.HIGHEST
    up = lambda a: a.astype(F32)
    B, L, _ = x.shape
    D = packed['W_pos'].shape[-1]
    n_layers = packed['wqkv'].shape[0]
    H = n_heads
    dk = D // H

    src = jnp.dot(x, up(packed['W_P']), precision=hp) + packed['b_P'] + packed['W_pos']
    prev = None
    for i in range(n_layers):
        qkv = jnp.dot(src, up(packed['wqkv'][i]), precision=hp) + packed['bqkv'][i]
        q, k, v = qkv[..., :D], qkv[..., D:2 * D], qkv[..., 2 * D:]
        qh = q.reshape(B, L, H, dk).transpose(0, 2, 1, 3)
        kh = k.reshape(B, L, H, dk).transpose(0, 2, 1, 3)
        vh = v.reshape(B, L, H, dk).transpose(0, 2, 1, 3)
        sc = jnp.einsum('bhqd,bhkd->bhqk', qh, kh, precision=hp)
        if prev is not None:
            sc = sc + prev
        prev = sc
        attn = jax.nn.softmax(sc, axis=-1)
        ctx = jnp.einsum('bhqk,bhkd->bhqd', attn, vh, precision=hp)
        ctx = ctx.transpose(0, 2, 1, 3).reshape(B, L, D)
        y = src + jnp.dot(ctx, up(packed['wo'][i]), precision=hp) + packed['bo'][i]
        y = _bn_ref(y, packed['g1'][i], packed['be1'][i])
        hid = jnp.dot(y, up(packed['w1'][i]), precision=hp) + packed['b1'][i]
        hid = jax.nn.gelu(hid, approximate=False)
        y2 = y + jnp.dot(hid, up(packed['w2'][i]), precision=hp) + packed['b2'][i]
        src = _bn_ref(y2, packed['g2'][i], packed['be2'][i])
    if pooling:
        return src.mean(axis=1)
    return src.transpose(0, 2, 1)


if __name__ == "__main__":
    key = jax.random.PRNGKey(0)
    B, L, C = 2, 16, 4                      # batch, seq_len, input_channels
    D, H, dff, n_layers = 128, 8, 256, 3    # lane-dense d_model / d_ff

    k_x, k_p = jax.random.split(key)
    x = jax.random.normal(k_x, (B, L, C), F32)
    raw = init_params(k_p, C, L, D, H, dff, n_layers)
    packed = pack_params(raw, H)

    fwd = jax.jit(functools.partial(tst_encoder_forward, n_heads=H, pooling=True))
    out = jax.block_until_ready(fwd(x, packed))

    assert out.shape == (B, D), out.shape
    assert bool(jnp.all(jnp.isfinite(out)))

    ref = reference_forward(x, packed, H, pooling=True)
    max_err = float(jnp.max(jnp.abs(out - ref)))
    # bf16 matmul operands -> loose tolerance; catches structural bugs only.
    assert max_err < 0.25, f"max abs err vs reference: {max_err}"

    print("KERNEL_OK")
</pallas_src>

<mosaic_0001>
module attributes {stable_mosaic.version = 11 : i64} {
  func.func @kernel(%arg0: i32, %arg1: memref<2x16x4xf32, #tpu.memory_space<vmem>>, %arg2: memref<4x128xbf16, #tpu.memory_space<vmem>>, %arg3: memref<1x128xf32, #tpu.memory_space<vmem>>, %arg4: memref<16x128xf32, #tpu.memory_space<vmem>>, %arg5: memref<1x128x384xbf16, #tpu.memory_space<vmem>>, %arg6: memref<1x1x384xf32, #tpu.memory_space<vmem>>, %arg7: memref<1x128x128xbf16, #tpu.memory_space<vmem>>, %arg8: memref<1x1x128xf32, #tpu.memory_space<vmem>>, %arg9: memref<1x1x128xf32, #tpu.memory_space<vmem>>, %arg10: memref<1x1x128xf32, #tpu.memory_space<vmem>>, %arg11: memref<1x128x256xbf16, #tpu.memory_space<vmem>>, %arg12: memref<1x1x256xf32, #tpu.memory_space<vmem>>, %arg13: memref<1x256x128xbf16, #tpu.memory_space<vmem>>, %arg14: memref<1x1x128xf32, #tpu.memory_space<vmem>>, %arg15: memref<1x1x128xf32, #tpu.memory_space<vmem>>, %arg16: memref<1x1x128xf32, #tpu.memory_space<vmem>>, %arg17: memref<2x128xf32, #tpu.memory_space<vmem>>, %arg18: memref<32x128xf32, #tpu.memory_space<vmem>>, %arg19: memref<8x2x16x16xf32, #tpu.memory_space<vmem>>) attributes {dimension_semantics = [#tpu.dimension_semantics<arbitrary>], iteration_bounds = array<i64: 3>, scalar_prefetch = 0 : i64, scratch_operands = 2 : i64, tpu.core_type = #tpu.core_type<tc>, window_params = [{pipeline_mode = #tpu.pipeline_mode<synchronous>, transform_indices = @transform_0, window_bounds = array<i64: 2, 16, 4>}, {pipeline_mode = #tpu.pipeline_mode<synchronous>, transform_indices = @transform_1, window_bounds = array<i64: 4, 128>}, {pipeline_mode = #tpu.pipeline_mode<synchronous>, transform_indices = @transform_2, window_bounds = array<i64: 1, 128>}, {pipeline_mode = #tpu.pipeline_mode<synchronous>, transform_indices = @transform_3, window_bounds = array<i64: 16, 128>}, {transform_indices = @transform_4, window_bounds = array<i64: 1, 128, 384>}, {transform_indices = @transform_5, window_bounds = array<i64: 1, 1, 384>}, {transform_indices = @transform_6, window_bounds = array<i64: 1, 128, 128>}, {transform_indices = @transform_7, window_bounds = array<i64: 1, 1, 128>}, {transform_indices = @transform_8, window_bounds = array<i64: 1, 1, 128>}, {transform_indices = @transform_9, window_bounds = array<i64: 1, 1, 128>}, {transform_indices = @transform_10, window_bounds = array<i64: 1, 128, 256>}, {transform_indices = @transform_11, window_bounds = array<i64: 1, 1, 256>}, {transform_indices = @transform_12, window_bounds = array<i64: 1, 256, 128>}, {transform_indices = @transform_13, window_bounds = array<i64: 1, 1, 128>}, {transform_indices = @transform_14, window_bounds = array<i64: 1, 1, 128>}, {transform_indices = @transform_15, window_bounds = array<i64: 1, 1, 128>}, {pipeline_mode = #tpu.pipeline_mode<synchronous>, transform_indices = @transform_16, window_bounds = array<i64: 2, 128>}]} {
    %c0_i32 = arith.constant 0 : i32
    %0 = arith.cmpi eq, %arg0, %c0_i32 : i32
    %1 = arith.extui %0 : i1 to i32
    %c0_i32_0 = arith.constant 0 : i32
    %2 = arith.cmpi ne, %1, %c0_i32_0 : i32
    scf.if %2 {
      %c0_158 = arith.constant 0 : index
      %c0_159 = arith.constant 0 : index
      %c0_160 = arith.constant 0 : index
      %356 = vector.load %arg1[%c0_158, %c0_159, %c0_160] : memref<2x16x4xf32, #tpu.memory_space<vmem>>, vector<2x16x4xf32>
      %357 = vector.shape_cast %356 : vector<2x16x4xf32> to vector<32x4xf32>
      %358 = arith.truncf %357 : vector<32x4xf32> to vector<32x4xbf16>
      %c0_161 = arith.constant 0 : index
      %c0_162 = arith.constant 0 : index
      %359 = vector.load %arg2[%c0_161, %c0_162] : memref<4x128xbf16, #tpu.memory_space<vmem>>, vector<4x128xbf16>
      %cst_163 = arith.constant dense<0.000000e+00> : vector<32x128xf32>
      %360 = tpu.matmul %358, %359, %cst_163 {dimension_numbers = #tpu.dot_dimension_numbers<[1], [0], [0], [1], [0, 0, 1, 1], [], []>} : vector<32x4xbf16>, vector<4x128xbf16>, vector<32x128xf32> -> vector<32x128xf32>
      %361 = vector.shape_cast %360 : vector<32x128xf32> to vector<2x16x128xf32>
      %c0_164 = arith.constant 0 : index
      %c0_165 = arith.constant 0 : index
      %362 = vector.load %arg3[%c0_164, %c0_165] : memref<1x128xf32, #tpu.memory_space<vmem>>, vector<1x128xf32>
      %363 = vector.shape_cast %362 : vector<1x128xf32> to vector<1x1x128xf32>
      %364 = vector.broadcast %363 : vector<1x1x128xf32> to vector<2x16x128xf32>
      %365 = arith.addf %361, %364 : vector<2x16x128xf32>
      %c0_166 = arith.constant 0 : index
      %c0_167 = arith.constant 0 : index
      %366 = vector.load %arg4[%c0_166, %c0_167] : memref<16x128xf32, #tpu.memory_space<vmem>>, vector<16x128xf32>
      %367 = vector.shape_cast %366 : vector<16x128xf32> to vector<1x16x128xf32>
      %368 = vector.broadcast %367 : vector<1x16x128xf32> to vector<2x16x128xf32>
      %369 = arith.addf %365, %368 : vector<2x16x128xf32>
      %370 = vector.shape_cast %369 : vector<2x16x128xf32> to vector<32x128xf32>
      %c0_168 = arith.constant 0 : index
      %c0_169 = arith.constant 0 : index
      %371 = vector.load %arg18[%c0_168, %c0_169] : memref<32x128xf32, #tpu.memory_space<vmem>>, vector<32x128xf32>
      tpu.vector_store %arg18[%c0_168, %c0_169], %370 {strides = array<i32>} : memref<32x128xf32, #tpu.memory_space<vmem>>, vector<32x128xf32>,
      %cst_170 = arith.constant 0.000000e+00 : f32
      %372 = vector.broadcast %cst_170 : f32 to vector<8x2x16x16xf32>
      %c0_171 = arith.constant 0 : index
      %c0_172 = arith.constant 0 : index
      %c0_173 = arith.constant 0 : index
      %c0_174 = arith.constant 0 : index
      %373 = vector.load %arg19[%c0_171, %c0_172, %c0_173, %c0_174] : memref<8x2x16x16xf32, #tpu.memory_space<vmem>>, vector<8x2x16x16xf32>
      tpu.vector_store %arg19[%c0_171, %c0_172, %c0_173, %c0_174], %372 {strides = array<i32>} : memref<8x2x16x16xf32, #tpu.memory_space<vmem>>, vector<8x2x16x16xf32>,
    } else {
    }
    %c0 = arith.constant 0 : index
    %c0_1 = arith.constant 0 : index
    %3 = vector.load %arg18[%c0, %c0_1] : memref<32x128xf32, #tpu.memory_space<vmem>>, vector<32x128xf32>
    %4 = arith.truncf %3 : vector<32x128xf32> to vector<32x128xbf16>
    %c0_2 = arith.constant 0 : index
    %c0_3 = arith.constant 0 : index
    %c0_4 = arith.constant 0 : index
    %5 = vector.load %arg5[%c0_2, %c0_3, %c0_4] : memref<1x128x384xbf16, #tpu.memory_space<vmem>>, vector<1x128x384xbf16>
    %6 = vector.shape_cast %5 : vector<1x128x384xbf16> to vector<128x384xbf16>
    %cst = arith.constant dense<0.000000e+00> : vector<32x384xf32>
    %7 = tpu.matmul %4, %6, %cst {dimension_numbers = #tpu.dot_dimension_numbers<[1], [0], [0], [1], [0, 0, 1, 1], [], []>} : vector<32x128xbf16>, vector<128x384xbf16>, vector<32x384xf32> -> vector<32x384xf32>
    %c0_5 = arith.constant 0 : index
    %c0_6 = arith.constant 0 : index
    %c0_7 = arith.constant 0 : index
    %8 = vector.load %arg6[%c0_5, %c0_6, %c0_7] : memref<1x1x384xf32, #tpu.memory_space<vmem>>, vector<1x1x384xf32>
    %9 = vector.shape_cast %8 : vector<1x1x384xf32> to vector<1x384xf32>
    %10 = vector.broadcast %9 : vector<1x384xf32> to vector<32x384xf32>
    %11 = arith.addf %7, %10 : vector<32x384xf32>
    %12 = vector.extract_strided_slice %11 {offsets = [0, 0], sizes = [32, 128], strides = [1, 1]} : vector<32x384xf32> to vector<32x128xf32>
    %13 = vector.extract_strided_slice %11 {offsets = [0, 128], sizes = [32, 128], strides = [1, 1]} : vector<32x384xf32> to vector<32x128xf32>
    %14 = vector.extract_strided_slice %11 {offsets = [0, 256], sizes = [32, 128], strides = [1, 1]} : vector<32x384xf32> to vector<32x128xf32>
    %15 = vector.extract_strided_slice %12 {offsets = [0, 0], sizes = [32, 16], strides = [1, 1]} : vector<32x128xf32> to vector<32x16xf32>
    %16 = vector.shape_cast %15 : vector<32x16xf32> to vector<2x16x16xf32>
    %17 = arith.truncf %16 : vector<2x16x16xf32> to vector<2x16x16xbf16>
    %18 = vector.extract_strided_slice %13 {offsets = [0, 0], sizes = [32, 16], strides = [1, 1]} : vector<32x128xf32> to vector<32x16xf32>
    %19 = vector.shape_cast %18 : vector<32x16xf32> to vector<2x16x16xf32>
    %20 = arith.truncf %19 : vector<2x16x16xf32> to vector<2x16x16xbf16>
    %21 = vector.extract_strided_slice %14 {offsets = [0, 0], sizes = [32, 16], strides = [1, 1]} : vector<32x128xf32> to vector<32x16xf32>
    %22 = vector.shape_cast %21 : vector<32x16xf32> to vector<2x16x16xf32>
    %23 = arith.truncf %22 : vector<2x16x16xf32> to vector<2x16x16xbf16>
    "tpu.trace_start"() <{level = 10 : i32, message = "bqd,bkd->bqk"}> : () -> ()
    %cst_8 = arith.constant dense<0.000000e+00> : vector<2x16x16xf32>
    %24 = tpu.matmul %17, %20, %cst_8 {dimension_numbers = #tpu.dot_dimension_numbers<[2], [2], [1], [1], [0, 0, 0, 1, 1, 1], [0], [0]>} : vector<2x16x16xbf16>, vector<2x16x16xbf16>, vector<2x16x16xf32> -> vector<2x16x16xf32>
    "tpu.trace_stop"() : () -> ()
    %c0_9 = arith.constant 0 : index
    %c0_10 = arith.constant 0 : index
    %c0_11 = arith.constant 0 : index
    %c0_12 = arith.constant 0 : index
    %25 = vector.load %arg19[%c0_9, %c0_10, %c0_11, %c0_12] : memref<8x2x16x16xf32, #tpu.memory_space<vmem>>, vector<1x2x16x16xf32>
    %26 = vector.shape_cast %25 : vector<1x2x16x16xf32> to vector<2x16x16xf32>
    %27 = arith.addf %24, %26 : vector<2x16x16xf32>
    %c0_13 = arith.constant 0 : index
    %c0_14 = arith.constant 0 : index
    %c0_15 = arith.constant 0 : index
    %c0_16 = arith.constant 0 : index
    %28 = vector.load %arg19[%c0_13, %c0_14, %c0_15, %c0_16] : memref<8x2x16x16xf32, #tpu.memory_space<vmem>>, vector<1x2x16x16xf32>
    %29 = vector.shape_cast %28 : vector<1x2x16x16xf32> to vector<2x16x16xf32>
    %30 = vector.shape_cast %27 : vector<2x16x16xf32> to vector<1x2x16x16xf32>
    tpu.vector_store %arg19[%c0_13, %c0_14, %c0_15, %c0_16], %30 {strides = array<i32>} : memref<8x2x16x16xf32, #tpu.memory_space<vmem>>, vector<1x2x16x16xf32>,
    %cst_17 = arith.constant dense<0xFF800000> : vector<2x16xf32>
    %31 = vector.multi_reduction <maximumf>, %27, %cst_17 [2] : vector<2x16x16xf32> to vector<2x16xf32>
    %32 = vector.shape_cast %31 : vector<2x16xf32> to vector<2x16x1xf32>
    %33 = vector.broadcast %32 : vector<2x16x1xf32> to vector<2x16x16xf32>
    %34 = arith.subf %27, %33 : vector<2x16x16xf32>
    %35 = math.exp %34 : vector<2x16x16xf32>
    %cst_18 = arith.constant dense<0.000000e+00> : vector<2x16xf32>
    %36 = vector.multi_reduction <add>, %35, %cst_18 [2] : vector<2x16x16xf32> to vector<2x16xf32>
    %37 = vector.shape_cast %36 : vector<2x16xf32> to vector<2x16x1xf32>
    %38 = vector.broadcast %37 : vector<2x16x1xf32> to vector<2x16x16xf32>
    %39 = arith.divf %35, %38 : vector<2x16x16xf32>
    %40 = arith.truncf %39 : vector<2x16x16xf32> to vector<2x16x16xbf16>
    "tpu.trace_start"() <{level = 10 : i32, message = "bqk,bkd->bqd"}> : () -> ()
    %cst_19 = arith.constant dense<0.000000e+00> : vector<2x16x16xf32>
    %41 = tpu.matmul %40, %23, %cst_19 {dimension_numbers = #tpu.dot_dimension_numbers<[2], [1], [1], [2], [0, 0, 0, 1, 1, 2], [0], [0]>} : vector<2x16x16xbf16>, vector<2x16x16xbf16>, vector<2x16x16xf32> -> vector<2x16x16xf32>
    "tpu.trace_stop"() : () -> ()
    %42 = vector.shape_cast %41 : vector<2x16x16xf32> to vector<32x16xf32>
    %43 = vector.extract_strided_slice %12 {offsets = [0, 16], sizes = [32, 16], strides = [1, 1]} : vector<32x128xf32> to vector<32x16xf32>
    %44 = vector.shape_cast %43 : vector<32x16xf32> to vector<2x16x16xf32>
    %45 = arith.truncf %44 : vector<2x16x16xf32> to vector<2x16x16xbf16>
    %46 = vector.extract_strided_slice %13 {offsets = [0, 16], sizes = [32, 16], strides = [1, 1]} : vector<32x128xf32> to vector<32x16xf32>
    %47 = vector.shape_cast %46 : vector<32x16xf32> to vector<2x16x16xf32>
    %48 = arith.truncf %47 : vector<2x16x16xf32> to vector<2x16x16xbf16>
    %49 = vector.extract_strided_slice %14 {offsets = [0, 16], sizes = [32, 16], strides = [1, 1]} : vector<32x128xf32> to vector<32x16xf32>
    %50 = vector.shape_cast %49 : vector<32x16xf32> to vector<2x16x16xf32>
    %51 = arith.truncf %50 : vector<2x16x16xf32> to vector<2x16x16xbf16>
    "tpu.trace_start"() <{level = 10 : i32, message = "bqd,bkd->bqk"}> : () -> ()
    %cst_20 = arith.constant dense<0.000000e+00> : vector<2x16x16xf32>
    %52 = tpu.matmul %45, %48, %cst_20 {dimension_numbers = #tpu.dot_dimension_numbers<[2], [2], [1], [1], [0, 0, 0, 1, 1, 1], [0], [0]>} : vector<2x16x16xbf16>, vector<2x16x16xbf16>, vector<2x16x16xf32> -> vector<2x16x16xf32>
    "tpu.trace_stop"() : () -> ()
    %c1 = arith.constant 1 : index
    %c0_21 = arith.constant 0 : index
    %c0_22 = arith.constant 0 : index
    %c0_23 = arith.constant 0 : index
    %53 = vector.load %arg19[%c1, %c0_21, %c0_22, %c0_23] : memref<8x2x16x16xf32, #tpu.memory_space<vmem>>, vector<1x2x16x16xf32>
    %54 = vector.shape_cast %53 : vector<1x2x16x16xf32> to vector<2x16x16xf32>
    %55 = arith.addf %52, %54 : vector<2x16x16xf32>
    %c1_24 = arith.constant 1 : index
    %c0_25 = arith.constant 0 : index
    %c0_26 = arith.constant 0 : index
    %c0_27 = arith.constant 0 : index
    %56 = vector.load %arg19[%c1_24, %c0_25, %c0_26, %c0_27] : memref<8x2x16x16xf32, #tpu.memory_space<vmem>>, vector<1x2x16x16xf32>
    %57 = vector.shape_cast %56 : vector<1x2x16x16xf32> to vector<2x16x16xf32>
    %58 = vector.shape_cast %55 : vector<2x16x16xf32> to vector<1x2x16x16xf32>
    tpu.vector_store %arg19[%c1_24, %c0_25, %c0_26, %c0_27], %58 {strides = array<i32>} : memref<8x2x16x16xf32, #tpu.memory_space<vmem>>, vector<1x2x16x16xf32>,
    %cst_28 = arith.constant dense<0xFF800000> : vector<2x16xf32>
    %59 = vector.multi_reduction <maximumf>, %55, %cst_28 [2] : vector<2x16x16xf32> to vector<2x16xf32>
    %60 = vector.shape_cast %59 : vector<2x16xf32> to vector<2x16x1xf32>
    %61 = vector.broadcast %60 : vector<2x16x1xf32> to vector<2x16x16xf32>
    %62 = arith.subf %55, %61 : vector<2x16x16xf32>
    %63 = math.exp %62 : vector<2x16x16xf32>
    %cst_29 = arith.constant dense<0.000000e+00> : vector<2x16xf32>
    %64 = vector.multi_reduction <add>, %63, %cst_29 [2] : vector<2x16x16xf32> to vector<2x16xf32>
    %65 = vector.shape_cast %64 : vector<2x16xf32> to vector<2x16x1xf32>
    %66 = vector.broadcast %65 : vector<2x16x1xf32> to vector<2x16x16xf32>
    %67 = arith.divf %63, %66 : vector<2x16x16xf32>
    %68 = arith.truncf %67 : vector<2x16x16xf32> to vector<2x16x16xbf16>
    "tpu.trace_start"() <{level = 10 : i32, message = "bqk,bkd->bqd"}> : () -> ()
    %cst_30 = arith.constant dense<0.000000e+00> : vector<2x16x16xf32>
    %69 = tpu.matmul %68, %51, %cst_30 {dimension_numbers = #tpu.dot_dimension_numbers<[2], [1], [1], [2], [0, 0, 0, 1, 1, 2], [0], [0]>} : vector<2x16x16xbf16>, vector<2x16x16xbf16>, vector<2x16x16xf32> -> vector<2x16x16xf32>
    "tpu.trace_stop"() : () -> ()
    %70 = vector.shape_cast %69 : vector<2x16x16xf32> to vector<32x16xf32>
    %71 = vector.extract_strided_slice %12 {offsets = [0, 32], sizes = [32, 16], strides = [1, 1]} : vector<32x128xf32> to vector<32x16xf32>
    %72 = vector.shape_cast %71 : vector<32x16xf32> to vector<2x16x16xf32>
    %73 = arith.truncf %72 : vector<2x16x16xf32> to vector<2x16x16xbf16>
    %74 = vector.extract_strided_slice %13 {offsets = [0, 32], sizes = [32, 16], strides = [1, 1]} : vector<32x128xf32> to vector<32x16xf32>
    %75 = vector.shape_cast %74 : vector<32x16xf32> to vector<2x16x16xf32>
    %76 = arith.truncf %75 : vector<2x16x16xf32> to vector<2x16x16xbf16>
    %77 = vector.extract_strided_slice %14 {offsets = [0, 32], sizes = [32, 16], strides = [1, 1]} : vector<32x128xf32> to vector<32x16xf32>
    %78 = vector.shape_cast %77 : vector<32x16xf32> to vector<2x16x16xf32>
    %79 = arith.truncf %78 : vector<2x16x16xf32> to vector<2x16x16xbf16>
    "tpu.trace_start"() <{level = 10 : i32, message = "bqd,bkd->bqk"}> : () -> ()
    %cst_31 = arith.constant dense<0.000000e+00> : vector<2x16x16xf32>
    %80 = tpu.matmul %73, %76, %cst_31 {dimension_numbers = #tpu.dot_dimension_numbers<[2], [2], [1], [1], [0, 0, 0, 1, 1, 1], [0], [0]>} : vector<2x16x16xbf16>, vector<2x16x16xbf16>, vector<2x16x16xf32> -> vector<2x16x16xf32>
    "tpu.trace_stop"() : () -> ()
    %c2 = arith.constant 2 : index
    %c0_32 = arith.constant 0 : index
    %c0_33 = arith.constant 0 : index
    %c0_34 = arith.constant 0 : index
    %81 = vector.load %arg19[%c2, %c0_32, %c0_33, %c0_34] : memref<8x2x16x16xf32, #tpu.memory_space<vmem>>, vector<1x2x16x16xf32>
    %82 = vector.shape_cast %81 : vector<1x2x16x16xf32> to vector<2x16x16xf32>
    %83 = arith.addf %80, %82 : vector<2x16x16xf32>
    %c2_35 = arith.constant 2 : index
    %c0_36 = arith.constant 0 : index
    %c0_37 = arith.constant 0 : index
    %c0_38 = arith.constant 0 : index
    %84 = vector.load %arg19[%c2_35, %c0_36, %c0_37, %c0_38] : memref<8x2x16x16xf32, #tpu.memory_space<vmem>>, vector<1x2x16x16xf32>
    %85 = vector.shape_cast %84 : vector<1x2x16x16xf32> to vector<2x16x16xf32>
    %86 = vector.shape_cast %83 : vector<2x16x16xf32> to vector<1x2x16x16xf32>
    tpu.vector_store %arg19[%c2_35, %c0_36, %c0_37, %c0_38], %86 {strides = array<i32>} : memref<8x2x16x16xf32, #tpu.memory_space<vmem>>, vector<1x2x16x16xf32>,
    %cst_39 = arith.constant dense<0xFF800000> : vector<2x16xf32>
    %87 = vector.multi_reduction <maximumf>, %83, %cst_39 [2] : vector<2x16x16xf32> to vector<2x16xf32>
    %88 = vector.shape_cast %87 : vector<2x16xf32> to vector<2x16x1xf32>
    %89 = vector.broadcast %88 : vector<2x16x1xf32> to vector<2x16x16xf32>
    %90 = arith.subf %83, %89 : vector<2x16x16xf32>
    %91 = math.exp %90 : vector<2x16x16xf32>
    %cst_40 = arith.constant dense<0.000000e+00> : vector<2x16xf32>
    %92 = vector.multi_reduction <add>, %91, %cst_40 [2] : vector<2x16x16xf32> to vector<2x16xf32>
    %93 = vector.shape_cast %92 : vector<2x16xf32> to vector<2x16x1xf32>
    %94 = vector.broadcast %93 : vector<2x16x1xf32> to vector<2x16x16xf32>
    %95 = arith.divf %91, %94 : vector<2x16x16xf32>
    %96 = arith.truncf %95 : vector<2x16x16xf32> to vector<2x16x16xbf16>
    "tpu.trace_start"() <{level = 10 : i32, message = "bqk,bkd->bqd"}> : () -> ()
    %cst_41 = arith.constant dense<0.000000e+00> : vector<2x16x16xf32>
    %97 = tpu.matmul %96, %79, %cst_41 {dimension_numbers = #tpu.dot_dimension_numbers<[2], [1], [1], [2], [0, 0, 0, 1, 1, 2], [0], [0]>} : vector<2x16x16xbf16>, vector<2x16x16xbf16>, vector<2x16x16xf32> -> vector<2x16x16xf32>
    "tpu.trace_stop"() : () -> ()
    %98 = vector.shape_cast %97 : vector<2x16x16xf32> to vector<32x16xf32>
    %99 = vector.extract_strided_slice %12 {offsets = [0, 48], sizes = [32, 16], strides = [1, 1]} : vector<32x128xf32> to vector<32x16xf32>
    %100 = vector.shape_cast %99 : vector<32x16xf32> to vector<2x16x16xf32>
    %101 = arith.truncf %100 : vector<2x16x16xf32> to vector<2x16x16xbf16>
    %102 = vector.extract_strided_slice %13 {offsets = [0, 48], sizes = [32, 16], strides = [1, 1]} : vector<32x128xf32> to vector<32x16xf32>
    %103 = vector.shape_cast %102 : vector<32x16xf32> to vector<2x16x16xf32>
    %104 = arith.truncf %103 : vector<2x16x16xf32> to vector<2x16x16xbf16>
    %105 = vector.extract_strided_slice %14 {offsets = [0, 48], sizes = [32, 16], strides = [1, 1]} : vector<32x128xf32> to vector<32x16xf32>
    %106 = vector.shape_cast %105 : vector<32x16xf32> to vector<2x16x16xf32>
    %107 = arith.truncf %106 : vector<2x16x16xf32> to vector<2x16x16xbf16>
    "tpu.trace_start"() <{level = 10 : i32, message = "bqd,bkd->bqk"}> : () -> ()
    %cst_42 = arith.constant dense<0.000000e+00> : vector<2x16x16xf32>
    %108 = tpu.matmul %101, %104, %cst_42 {dimension_numbers = #tpu.dot_dimension_numbers<[2], [2], [1], [1], [0, 0, 0, 1, 1, 1], [0], [0]>} : vector<2x16x16xbf16>, vector<2x16x16xbf16>, vector<2x16x16xf32> -> vector<2x16x16xf32>
    "tpu.trace_stop"() : () -> ()
    %c3 = arith.constant 3 : index
    %c0_43 = arith.constant 0 : index
    %c0_44 = arith.constant 0 : index
    %c0_45 = arith.constant 0 : index
    %109 = vector.load %arg19[%c3, %c0_43, %c0_44, %c0_45] : memref<8x2x16x16xf32, #tpu.memory_space<vmem>>, vector<1x2x16x16xf32>
    %110 = vector.shape_cast %109 : vector<1x2x16x16xf32> to vector<2x16x16xf32>
    %111 = arith.addf %108, %110 : vector<2x16x16xf32>
    %c3_46 = arith.constant 3 : index
    %c0_47 = arith.constant 0 : index
    %c0_48 = arith.constant 0 : index
    %c0_49 = arith.constant 0 : index
    %112 = vector.load %arg19[%c3_46, %c0_47, %c0_48, %c0_49] : memref<8x2x16x16xf32, #tpu.memory_space<vmem>>, vector<1x2x16x16xf32>
    %113 = vector.shape_cast %112 : vector<1x2x16x16xf32> to vector<2x16x16xf32>
    %114 = vector.shape_cast %111 : vector<2x16x16xf32> to vector<1x2x16x16xf32>
    tpu.vector_store %arg19[%c3_46, %c0_47, %c0_48, %c0_49], %114 {strides = array<i32>} : memref<8x2x16x16xf32, #tpu.memory_space<vmem>>, vector<1x2x16x16xf32>,
    %cst_50 = arith.constant dense<0xFF800000> : vector<2x16xf32>
    %115 = vector.multi_reduction <maximumf>, %111, %cst_50 [2] : vector<2x16x16xf32> to vector<2x16xf32>
    %116 = vector.shape_cast %115 : vector<2x16xf32> to vector<2x16x1xf32>
    %117 = vector.broadcast %116 : vector<2x16x1xf32> to vector<2x16x16xf32>
    %118 = arith.subf %111, %117 : vector<2x16x16xf32>
    %119 = math.exp %118 : vector<2x16x16xf32>
    %cst_51 = arith.constant dense<0.000000e+00> : vector<2x16xf32>
    %120 = vector.multi_reduction <add>, %119, %cst_51 [2] : vector<2x16x16xf32> to vector<2x16xf32>
    %121 = vector.shape_cast %120 : vector<2x16xf32> to vector<2x16x1xf32>
    %122 = vector.broadcast %121 : vector<2x16x1xf32> to vector<2x16x16xf32>
    %123 = arith.divf %119, %122 : vector<2x16x16xf32>
    %124 = arith.truncf %123 : vector<2x16x16xf32> to vector<2x16x16xbf16>
    "tpu.trace_start"() <{level = 10 : i32, message = "bqk,bkd->bqd"}> : () -> ()
    %cst_52 = arith.constant dense<0.000000e+00> : vector<2x16x16xf32>
    %125 = tpu.matmul %124, %107, %cst_52 {dimension_numbers = #tpu.dot_dimension_numbers<[2], [1], [1], [2], [0, 0, 0, 1, 1, 2], [0], [0]>} : vector<2x16x16xbf16>, vector<2x16x16xbf16>, vector<2x16x16xf32> -> vector<2x16x16xf32>
    "tpu.trace_stop"() : () -> ()
    %126 = vector.shape_cast %125 : vector<2x16x16xf32> to vector<32x16xf32>
    %127 = vector.extract_strided_slice %12 {offsets = [0, 64], sizes = [32, 16], strides = [1, 1]} : vector<32x128xf32> to vector<32x16xf32>
    %128 = vector.shape_cast %127 : vector<32x16xf32> to vector<2x16x16xf32>
    %129 = arith.truncf %128 : vector<2x16x16xf32> to vector<2x16x16xbf16>
    %130 = vector.extract_strided_slice %13 {offsets = [0, 64], sizes = [32, 16], strides = [1, 1]} : vector<32x128xf32> to vector<32x16xf32>
    %131 = vector.shape_cast %130 : vector<32x16xf32> to vector<2x16x16xf32>
    %132 = arith.truncf %131 : vector<2x16x16xf32> to vector<2x16x16xbf16>
    %133 = vector.extract_strided_slice %14 {offsets = [0, 64], sizes = [32, 16], strides = [1, 1]} : vector<32x128xf32> to vector<32x16xf32>
    %134 = vector.shape_cast %133 : vector<32x16xf32> to vector<2x16x16xf32>
    %135 = arith.truncf %134 : vector<2x16x16xf32> to vector<2x16x16xbf16>
    "tpu.trace_start"() <{level = 10 : i32, message = "bqd,bkd->bqk"}> : () -> ()
    %cst_53 = arith.constant dense<0.000000e+00> : vector<2x16x16xf32>
    %136 = tpu.matmul %129, %132, %cst_53 {dimension_numbers = #tpu.dot_dimension_numbers<[2], [2], [1], [1], [0, 0, 0, 1, 1, 1], [0], [0]>} : vector<2x16x16xbf16>, vector<2x16x16xbf16>, vector<2x16x16xf32> -> vector<2x16x16xf32>
    "tpu.trace_stop"() : () -> ()
    %c4 = arith.constant 4 : index
    %c0_54 = arith.constant 0 : index
    %c0_55 = arith.constant 0 : index
    %c0_56 = arith.constant 0 : index
    %137 = vector.load %arg19[%c4, %c0_54, %c0_55, %c0_56] : memref<8x2x16x16xf32, #tpu.memory_space<vmem>>, vector<1x2x16x16xf32>
    %138 = vector.shape_cast %137 : vector<1x2x16x16xf32> to vector<2x16x16xf32>
    %139 = arith.addf %136, %138 : vector<2x16x16xf32>
    %c4_57 = arith.constant 4 : index
    %c0_58 = arith.constant 0 : index
    %c0_59 = arith.constant 0 : index
    %c0_60 = arith.constant 0 : index
    %140 = vector.load %arg19[%c4_57, %c0_58, %c0_59, %c0_60] : memref<8x2x16x16xf32, #tpu.memory_space<vmem>>, vector<1x2x16x16xf32>
    %141 = vector.shape_cast %140 : vector<1x2x16x16xf32> to vector<2x16x16xf32>
    %142 = vector.shape_cast %139 : vector<2x16x16xf32> to vector<1x2x16x16xf32>
    tpu.vector_store %arg19[%c4_57, %c0_58, %c0_59, %c0_60], %142 {strides = array<i32>} : memref<8x2x16x16xf32, #tpu.memory_space<vmem>>, vector<1x2x16x16xf32>,
    %cst_61 = arith.constant dense<0xFF800000> : vector<2x16xf32>
    %143 = vector.multi_reduction <maximumf>, %139, %cst_61 [2] : vector<2x16x16xf32> to vector<2x16xf32>
    %144 = vector.shape_cast %143 : vector<2x16xf32> to vector<2x16x1xf32>
    %145 = vector.broadcast %144 : vector<2x16x1xf32> to vector<2x16x16xf32>
    %146 = arith.subf %139, %145 : vector<2x16x16xf32>
    %147 = math.exp %146 : vector<2x16x16xf32>
    %cst_62 = arith.constant dense<0.000000e+00> : vector<2x16xf32>
    %148 = vector.multi_reduction <add>, %147, %cst_62 [2] : vector<2x16x16xf32> to vector<2x16xf32>
    %149 = vector.shape_cast %148 : vector<2x16xf32> to vector<2x16x1xf32>
    %150 = vector.broadcast %149 : vector<2x16x1xf32> to vector<2x16x16xf32>
    %151 = arith.divf %147, %150 : vector<2x16x16xf32>
    %152 = arith.truncf %151 : vector<2x16x16xf32> to vector<2x16x16xbf16>
    "tpu.trace_start"() <{level = 10 : i32, message = "bqk,bkd->bqd"}> : () -> ()
    %cst_63 = arith.constant dense<0.000000e+00> : vector<2x16x16xf32>
    %153 = tpu.matmul %152, %135, %cst_63 {dimension_numbers = #tpu.dot_dimension_numbers<[2], [1], [1], [2], [0, 0, 0, 1, 1, 2], [0], [0]>} : vector<2x16x16xbf16>, vector<2x16x16xbf16>, vector<2x16x16xf32> -> vector<2x16x16xf32>
    "tpu.trace_stop"() : () -> ()
    %154 = vector.shape_cast %153 : vector<2x16x16xf32> to vector<32x16xf32>
    %155 = vector.extract_strided_slice %12 {offsets = [0, 80], sizes = [32, 16], strides = [1, 1]} : vector<32x128xf32> to vector<32x16xf32>
    %156 = vector.shape_cast %155 : vector<32x16xf32> to vector<2x16x16xf32>
    %157 = arith.truncf %156 : vector<2x16x16xf32> to vector<2x16x16xbf16>
    %158 = vector.extract_strided_slice %13 {offsets = [0, 80], sizes = [32, 16], strides = [1, 1]} : vector<32x128xf32> to vector<32x16xf32>
    %159 = vector.shape_cast %158 : vector<32x16xf32> to vector<2x16x16xf32>
    %160 = arith.truncf %159 : vector<2x16x16xf32> to vector<2x16x16xbf16>
    %161 = vector.extract_strided_slice %14 {offsets = [0, 80], sizes = [32, 16], strides = [1, 1]} : vector<32x128xf32> to vector<32x16xf32>
    %162 = vector.shape_cast %161 : vector<32x16xf32> to vector<2x16x16xf32>
    %163 = arith.truncf %162 : vector<2x16x16xf32> to vector<2x16x16xbf16>
    "tpu.trace_start"() <{level = 10 : i32, message = "bqd,bkd->bqk"}> : () -> ()
    %cst_64 = arith.constant dense<0.000000e+00> : vector<2x16x16xf32>
    %164 = tpu.matmul %157, %160, %cst_64 {dimension_numbers = #tpu.dot_dimension_numbers<[2], [2], [1], [1], [0, 0, 0, 1, 1, 1], [0], [0]>} : vector<2x16x16xbf16>, vector<2x16x16xbf16>, vector<2x16x16xf32> -> vector<2x16x16xf32>
    "tpu.trace_stop"() : () -> ()
    %c5 = arith.constant 5 : index
    %c0_65 = arith.constant 0 : index
    %c0_66 = arith.constant 0 : index
    %c0_67 = arith.constant 0 : index
    %165 = vector.load %arg19[%c5, %c0_65, %c0_66, %c0_67] : memref<8x2x16x16xf32, #tpu.memory_space<vmem>>, vector<1x2x16x16xf32>
    %166 = vector.shape_cast %165 : vector<1x2x16x16xf32> to vector<2x16x16xf32>
    %167 = arith.addf %164, %166 : vector<2x16x16xf32>
    %c5_68 = arith.constant 5 : index
    %c0_69 = arith.constant 0 : index
    %c0_70 = arith.constant 0 : index
    %c0_71 = arith.constant 0 : index
    %168 = vector.load %arg19[%c5_68, %c0_69, %c0_70, %c0_71] : memref<8x2x16x16xf32, #tpu.memory_space<vmem>>, vector<1x2x16x16xf32>
    %169 = vector.shape_cast %168 : vector<1x2x16x16xf32> to vector<2x16x16xf32>
    %170 = vector.shape_cast %167 : vector<2x16x16xf32> to vector<1x2x16x16xf32>
    tpu.vector_store %arg19[%c5_68, %c0_69, %c0_70, %c0_71], %170 {strides = array<i32>} : memref<8x2x16x16xf32, #tpu.memory_space<vmem>>, vector<1x2x16x16xf32>,
    %cst_72 = arith.constant dense<0xFF800000> : vector<2x16xf32>
    %171 = vector.multi_reduction <maximumf>, %167, %cst_72 [2] : vector<2x16x16xf32> to vector<2x16xf32>
    %172 = vector.shape_cast %171 : vector<2x16xf32> to vector<2x16x1xf32>
    %173 = vector.broadcast %172 : vector<2x16x1xf32> to vector<2x16x16xf32>
    %174 = arith.subf %167, %173 : vector<2x16x16xf32>
    %175 = math.exp %174 : vector<2x16x16xf32>
    %cst_73 = arith.constant dense<0.000000e+00> : vector<2x16xf32>
    %176 = vector.multi_reduction <add>, %175, %cst_73 [2] : vector<2x16x16xf32> to vector<2x16xf32>
    %177 = vector.shape_cast %176 : vector<2x16xf32> to vector<2x16x1xf32>
    %178 = vector.broadcast %177 : vector<2x16x1xf32> to vector<2x16x16xf32>
    %179 = arith.divf %175, %178 : vector<2x16x16xf32>
    %180 = arith.truncf %179 : vector<2x16x16xf32> to vector<2x16x16xbf16>
    "tpu.trace_start"() <{level = 10 : i32, message = "bqk,bkd->bqd"}> : () -> ()
    %cst_74 = arith.constant dense<0.000000e+00> : vector<2x16x16xf32>
    %181 = tpu.matmul %180, %163, %cst_74 {dimension_numbers = #tpu.dot_dimension_numbers<[2], [1], [1], [2], [0, 0, 0, 1, 1, 2], [0], [0]>} : vector<2x16x16xbf16>, vector<2x16x16xbf16>, vector<2x16x16xf32> -> vector<2x16x16xf32>
    "tpu.trace_stop"() : () -> ()
    %182 = vector.shape_cast %181 : vector<2x16x16xf32> to vector<32x16xf32>
    %183 = vector.extract_strided_slice %12 {offsets = [0, 96], sizes = [32, 16], strides = [1, 1]} : vector<32x128xf32> to vector<32x16xf32>
    %184 = vector.shape_cast %183 : vector<32x16xf32> to vector<2x16x16xf32>
    %185 = arith.truncf %184 : vector<2x16x16xf32> to vector<2x16x16xbf16>
    %186 = vector.extract_strided_slice %13 {offsets = [0, 96], sizes = [32, 16], strides = [1, 1]} : vector<32x128xf32> to vector<32x16xf32>
    %187 = vector.shape_cast %186 : vector<32x16xf32> to vector<2x16x16xf32>
    %188 = arith.truncf %187 : vector<2x16x16xf32> to vector<2x16x16xbf16>
    %189 = vector.extract_strided_slice %14 {offsets = [0, 96], sizes = [32, 16], strides = [1, 1]} : vector<32x128xf32> to vector<32x16xf32>
    %190 = vector.shape_cast %189 : vector<32x16xf32> to vector<2x16x16xf32>
    %191 = arith.truncf %190 : vector<2x16x16xf32> to vector<2x16x16xbf16>
    "tpu.trace_start"() <{level = 10 : i32, message = "bqd,bkd->bqk"}> : () -> ()
    %cst_75 = arith.constant dense<0.000000e+00> : vector<2x16x16xf32>
    %192 = tpu.matmul %185, %188, %cst_75 {dimension_numbers = #tpu.dot_dimension_numbers<[2], [2], [1], [1], [0, 0, 0, 1, 1, 1], [0], [0]>} : vector<2x16x16xbf16>, vector<2x16x16xbf16>, vector<2x16x16xf32> -> vector<2x16x16xf32>
    "tpu.trace_stop"() : () -> ()
    %c6 = arith.constant 6 : index
    %c0_76 = arith.constant 0 : index
    %c0_77 = arith.constant 0 : index
    %c0_78 = arith.constant 0 : index
    %193 = vector.load %arg19[%c6, %c0_76, %c0_77, %c0_78] : memref<8x2x16x16xf32, #tpu.memory_space<vmem>>, vector<1x2x16x16xf32>
    %194 = vector.shape_cast %193 : vector<1x2x16x16xf32> to vector<2x16x16xf32>
    %195 = arith.addf %192, %194 : vector<2x16x16xf32>
    %c6_79 = arith.constant 6 : index
    %c0_80 = arith.constant 0 : index
    %c0_81 = arith.constant 0 : index
    %c0_82 = arith.constant 0 : index
    %196 = vector.load %arg19[%c6_79, %c0_80, %c0_81, %c0_82] : memref<8x2x16x16xf32, #tpu.memory_space<vmem>>, vector<1x2x16x16xf32>
    %197 = vector.shape_cast %196 : vector<1x2x16x16xf32> to vector<2x16x16xf32>
    %198 = vector.shape_cast %195 : vector<2x16x16xf32> to vector<1x2x16x16xf32>
    tpu.vector_store %arg19[%c6_79, %c0_80, %c0_81, %c0_82], %198 {strides = array<i32>} : memref<8x2x16x16xf32, #tpu.memory_space<vmem>>, vector<1x2x16x16xf32>,
    %cst_83 = arith.constant dense<0xFF800000> : vector<2x16xf32>
    %199 = vector.multi_reduction <maximumf>, %195, %cst_83 [2] : vector<2x16x16xf32> to vector<2x16xf32>
    %200 = vector.shape_cast %199 : vector<2x16xf32> to vector<2x16x1xf32>
    %201 = vector.broadcast %200 : vector<2x16x1xf32> to vector<2x16x16xf32>
    %202 = arith.subf %195, %201 : vector<2x16x16xf32>
    %203 = math.exp %202 : vector<2x16x16xf32>
    %cst_84 = arith.constant dense<0.000000e+00> : vector<2x16xf32>
    %204 = vector.multi_reduction <add>, %203, %cst_84 [2] : vector<2x16x16xf32> to vector<2x16xf32>
    %205 = vector.shape_cast %204 : vector<2x16xf32> to vector<2x16x1xf32>
    %206 = vector.broadcast %205 : vector<2x16x1xf32> to vector<2x16x16xf32>
    %207 = arith.divf %203, %206 : vector<2x16x16xf32>
    %208 = arith.truncf %207 : vector<2x16x16xf32> to vector<2x16x16xbf16>
    "tpu.trace_start"() <{level = 10 : i32, message = "bqk,bkd->bqd"}> : () -> ()
    %cst_85 = arith.constant dense<0.000000e+00> : vector<2x16x16xf32>
    %209 = tpu.matmul %208, %191, %cst_85 {dimension_numbers = #tpu.dot_dimension_numbers<[2], [1], [1], [2], [0, 0, 0, 1, 1, 2], [0], [0]>} : vector<2x16x16xbf16>, vector<2x16x16xbf16>, vector<2x16x16xf32> -> vector<2x16x16xf32>
    "tpu.trace_stop"() : () -> ()
    %210 = vector.shape_cast %209 : vector<2x16x16xf32> to vector<32x16xf32>
    %211 = vector.extract_strided_slice %12 {offsets = [0, 112], sizes = [32, 16], strides = [1, 1]} : vector<32x128xf32> to vector<32x16xf32>
    %212 = vector.shape_cast %211 : vector<32x16xf32> to vector<2x16x16xf32>
    %213 = arith.truncf %212 : vector<2x16x16xf32> to vector<2x16x16xbf16>
    %214 = vector.extract_strided_slice %13 {offsets = [0, 112], sizes = [32, 16], strides = [1, 1]} : vector<32x128xf32> to vector<32x16xf32>
    %215 = vector.shape_cast %214 : vector<32x16xf32> to vector<2x16x16xf32>
    %216 = arith.truncf %215 : vector<2x16x16xf32> to vector<2x16x16xbf16>
    %217 = vector.extract_strided_slice %14 {offsets = [0, 112], sizes = [32, 16], strides = [1, 1]} : vector<32x128xf32> to vector<32x16xf32>
    %218 = vector.shape_cast %217 : vector<32x16xf32> to vector<2x16x16xf32>
    %219 = arith.truncf %218 : vector<2x16x16xf32> to vector<2x16x16xbf16>
    "tpu.trace_start"() <{level = 10 : i32, message = "bqd,bkd->bqk"}> : () -> ()
    %cst_86 = arith.constant dense<0.000000e+00> : vector<2x16x16xf32>
    %220 = tpu.matmul %213, %216, %cst_86 {dimension_numbers = #tpu.dot_dimension_numbers<[2], [2], [1], [1], [0, 0, 0, 1, 1, 1], [0], [0]>} : vector<2x16x16xbf16>, vector<2x16x16xbf16>, vector<2x16x16xf32> -> vector<2x16x16xf32>
    "tpu.trace_stop"() : () -> ()
    %c7 = arith.constant 7 : index
    %c0_87 = arith.constant 0 : index
    %c0_88 = arith.constant 0 : index
    %c0_89 = arith.constant 0 : index
    %221 = vector.load %arg19[%c7, %c0_87, %c0_88, %c0_89] : memref<8x2x16x16xf32, #tpu.memory_space<vmem>>, vector<1x2x16x16xf32>
    %222 = vector.shape_cast %221 : vector<1x2x16x16xf32> to vector<2x16x16xf32>
    %223 = arith.addf %220, %222 : vector<2x16x16xf32>
    %c7_90 = arith.constant 7 : index
    %c0_91 = arith.constant 0 : index
    %c0_92 = arith.constant 0 : index
    %c0_93 = arith.constant 0 : index
    %224 = vector.load %arg19[%c7_90, %c0_91, %c0_92, %c0_93] : memref<8x2x16x16xf32, #tpu.memory_space<vmem>>, vector<1x2x16x16xf32>
    %225 = vector.shape_cast %224 : vector<1x2x16x16xf32> to vector<2x16x16xf32>
    %226 = vector.shape_cast %223 : vector<2x16x16xf32> to vector<1x2x16x16xf32>
    tpu.vector_store %arg19[%c7_90, %c0_91, %c0_92, %c0_93], %226 {strides = array<i32>} : memref<8x2x16x16xf32, #tpu.memory_space<vmem>>, vector<1x2x16x16xf32>,
    %cst_94 = arith.constant dense<0xFF800000> : vector<2x16xf32>
    %227 = vector.multi_reduction <maximumf>, %223, %cst_94 [2] : vector<2x16x16xf32> to vector<2x16xf32>
    %228 = vector.shape_cast %227 : vector<2x16xf32> to vector<2x16x1xf32>
    %229 = vector.broadcast %228 : vector<2x16x1xf32> to vector<2x16x16xf32>
    %230 = arith.subf %223, %229 : vector<2x16x16xf32>
    %231 = math.exp %230 : vector<2x16x16xf32>
    %cst_95 = arith.constant dense<0.000000e+00> : vector<2x16xf32>
    %232 = vector.multi_reduction <add>, %231, %cst_95 [2] : vector<2x16x16xf32> to vector<2x16xf32>
    %233 = vector.shape_cast %232 : vector<2x16xf32> to vector<2x16x1xf32>
    %234 = vector.broadcast %233 : vector<2x16x1xf32> to vector<2x16x16xf32>
    %235 = arith.divf %231, %234 : vector<2x16x16xf32>
    %236 = arith.truncf %235 : vector<2x16x16xf32> to vector<2x16x16xbf16>
    "tpu.trace_start"() <{level = 10 : i32, message = "bqk,bkd->bqd"}> : () -> ()
    %cst_96 = arith.constant dense<0.000000e+00> : vector<2x16x16xf32>
    %237 = tpu.matmul %236, %219, %cst_96 {dimension_numbers = #tpu.dot_dimension_numbers<[2], [1], [1], [2], [0, 0, 0, 1, 1, 2], [0], [0]>} : vector<2x16x16xbf16>, vector<2x16x16xbf16>, vector<2x16x16xf32> -> vector<2x16x16xf32>
    "tpu.trace_stop"() : () -> ()
    %238 = vector.shape_cast %237 : vector<2x16x16xf32> to vector<32x16xf32>
    %239 = tpu.concatenate %42, %70, %98, %126, %154, %182, %210, %238 in 1 : vector<32x16xf32>, vector<32x16xf32>, vector<32x16xf32>, vector<32x16xf32>, vector<32x16xf32>, vector<32x16xf32>, vector<32x16xf32>, vector<32x16xf32> -> vector<32x128xf32>
    %240 = arith.truncf %239 : vector<32x128xf32> to vector<32x128xbf16>
    %c0_97 = arith.constant 0 : index
    %c0_98 = arith.constant 0 : index
    %c0_99 = arith.constant 0 : index
    %241 = vector.load %arg7[%c0_97, %c0_98, %c0_99] : memref<1x128x128xbf16, #tpu.memory_space<vmem>>, vector<1x128x128xbf16>
    %242 = vector.shape_cast %241 : vector<1x128x128xbf16> to vector<128x128xbf16>
    %cst_100 = arith.constant dense<0.000000e+00> : vector<32x128xf32>
    %243 = tpu.matmul %240, %242, %cst_100 {dimension_numbers = #tpu.dot_dimension_numbers<[1], [0], [0], [1], [0, 0, 1, 1], [], []>} : vector<32x128xbf16>, vector<128x128xbf16>, vector<32x128xf32> -> vector<32x128xf32>
    %c0_101 = arith.constant 0 : index
    %c0_102 = arith.constant 0 : index
    %c0_103 = arith.constant 0 : index
    %244 = vector.load %arg8[%c0_101, %c0_102, %c0_103] : memref<1x1x128xf32, #tpu.memory_space<vmem>>, vector<1x1x128xf32>
    %245 = vector.shape_cast %244 : vector<1x1x128xf32> to vector<1x128xf32>
    %246 = vector.broadcast %245 : vector<1x128xf32> to vector<32x128xf32>
    %247 = arith.addf %243, %246 : vector<32x128xf32>
    %248 = arith.addf %3, %247 : vector<32x128xf32>
    %c0_104 = arith.constant 0 : index
    %c0_105 = arith.constant 0 : index
    %c0_106 = arith.constant 0 : index
    %249 = vector.load %arg9[%c0_104, %c0_105, %c0_106] : memref<1x1x128xf32, #tpu.memory_space<vmem>>, vector<1x1x128xf32>
    %250 = vector.shape_cast %249 : vector<1x1x128xf32> to vector<1x128xf32>
    %c0_107 = arith.constant 0 : index
    %c0_108 = arith.constant 0 : index
    %c0_109 = arith.constant 0 : index
    %251 = vector.load %arg10[%c0_107, %c0_108, %c0_109] : memref<1x1x128xf32, #tpu.memory_space<vmem>>, vector<1x1x128xf32>
    %252 = vector.shape_cast %251 : vector<1x1x128xf32> to vector<1x128xf32>
    %cst_110 = arith.constant dense<0.000000e+00> : vector<128xf32>
    %253 = vector.multi_reduction <add>, %248, %cst_110 [0] : vector<32x128xf32> to vector<128xf32>
    %254 = vector.shape_cast %253 : vector<128xf32> to vector<1x128xf32>
    %cst_111 = arith.constant 3.200000e+01 : f32
    %255 = vector.broadcast %cst_111 : f32 to vector<1x128xf32>
    %256 = arith.divf %254, %255 : vector<1x128xf32>
    %257 = vector.broadcast %256 : vector<1x128xf32> to vector<32x128xf32>
    %258 = arith.subf %248, %257 : vector<32x128xf32>
    %259 = arith.mulf %258, %258 : vector<32x128xf32>
    %cst_112 = arith.constant dense<0.000000e+00> : vector<128xf32>
    %260 = vector.multi_reduction <add>, %259, %cst_112 [0] : vector<32x128xf32> to vector<128xf32>
    %261 = vector.shape_cast %260 : vector<128xf32> to vector<1x128xf32>
    %cst_113 = arith.constant 3.200000e+01 : f32
    %262 = vector.broadcast %cst_113 : f32 to vector<1x128xf32>
    %263 = arith.divf %261, %262 : vector<1x128xf32>
    %cst_114 = arith.constant 9.99999974E-6 : f32
    %264 = vector.broadcast %cst_114 : f32 to vector<1x128xf32>
    %265 = arith.addf %263, %264 : vector<1x128xf32>
    %266 = math.rsqrt %265 : vector<1x128xf32>
    %267 = arith.mulf %266, %250 : vector<1x128xf32>
    %268 = vector.broadcast %267 : vector<1x128xf32> to vector<32x128xf32>
    %269 = arith.mulf %258, %268 : vector<32x128xf32>
    %270 = vector.broadcast %252 : vector<1x128xf32> to vector<32x128xf32>
    %271 = arith.addf %269, %270 : vector<32x128xf32>
    %272 = arith.truncf %271 : vector<32x128xf32> to vector<32x128xbf16>
    %c0_115 = arith.constant 0 : index
    %c0_116 = arith.constant 0 : index
    %c0_117 = arith.constant 0 : index
    %273 = vector.load %arg11[%c0_115, %c0_116, %c0_117] : memref<1x128x256xbf16, #tpu.memory_space<vmem>>, vector<1x128x256xbf16>
    %274 = vector.shape_cast %273 : vector<1x128x256xbf16> to vector<128x256xbf16>
    %cst_118 = arith.constant dense<0.000000e+00> : vector<32x256xf32>
    %275 = tpu.matmul %272, %274, %cst_118 {dimension_numbers = #tpu.dot_dimension_numbers<[1], [0], [0], [1], [0, 0, 1, 1], [], []>} : vector<32x128xbf16>, vector<128x256xbf16>, vector<32x256xf32> -> vector<32x256xf32>
    %c0_119 = arith.constant 0 : index
    %c0_120 = arith.constant 0 : index
    %c0_121 = arith.constant 0 : index
    %276 = vector.load %arg12[%c0_119, %c0_120, %c0_121] : memref<1x1x256xf32, #tpu.memory_space<vmem>>, vector<1x1x256xf32>
    %277 = vector.shape_cast %276 : vector<1x1x256xf32> to vector<1x256xf32>
    %278 = vector.broadcast %277 : vector<1x256xf32> to vector<32x256xf32>
    %279 = arith.addf %275, %278 : vector<32x256xf32>
    %cst_122 = arith.constant 5.000000e-01 : f32
    %280 = vector.broadcast %cst_122 : f32 to vector<32x256xf32>
    %281 = arith.mulf %280, %279 : vector<32x256xf32>
    %cst_123 = arith.constant 0.707106769 : f32
    %282 = vector.broadcast %cst_123 : f32 to vector<32x256xf32>
    %283 = arith.mulf %279, %282 : vector<32x256xf32>
    %284 = math.absf %283 : vector<32x256xf32>
    %cst_124 = arith.constant 0.327591091 : f32
    %285 = vector.broadcast %cst_124 : f32 to vector<32x256xf32>
    %286 = arith.mulf %285, %284 : vector<32x256xf32>
    %cst_125 = arith.constant 1.000000e+00 : f32
    %287 = vector.broadcast %cst_125 : f32 to vector<32x256xf32>
    %288 = arith.addf %287, %286 : vector<32x256xf32>
    %cst_126 = arith.constant 1.000000e+00 : f32
    %289 = vector.broadcast %cst_126 : f32 to vector<32x256xf32>
    %290 = arith.divf %289, %288 : vector<32x256xf32>
    %cst_127 = arith.constant 1.06140542 : f32
    %291 = vector.broadcast %cst_127 : f32 to vector<32x256xf32>
    %292 = arith.mulf %291, %290 : vector<32x256xf32>
    %cst_128 = arith.constant -1.45315206 : f32
    %293 = vector.broadcast %cst_128 : f32 to vector<32x256xf32>
    %294 = arith.addf %292, %293 : vector<32x256xf32>
    %295 = arith.mulf %294, %290 : vector<32x256xf32>
    %cst_129 = arith.constant 1.42141378 : f32
    %296 = vector.broadcast %cst_129 : f32 to vector<32x256xf32>
    %297 = arith.addf %295, %296 : vector<32x256xf32>
    %298 = arith.mulf %297, %290 : vector<32x256xf32>
    %cst_130 = arith.constant -0.284496725 : f32
    %299 = vector.broadcast %cst_130 : f32 to vector<32x256xf32>
    %300 = arith.addf %298, %299 : vector<32x256xf32>
    %301 = arith.mulf %300, %290 : vector<32x256xf32>
    %cst_131 = arith.constant 0.254829586 : f32
    %302 = vector.broadcast %cst_131 : f32 to vector<32x256xf32>
    %303 = arith.addf %301, %302 : vector<32x256xf32>
    %304 = arith.mulf %303, %290 : vector<32x256xf32>
    %305 = arith.mulf %284, %284 : vector<32x256xf32>
    %cst_132 = arith.constant 0.000000e+00 : f32
    %306 = vector.broadcast %cst_132 : f32 to vector<32x256xf32>
    %307 = arith.subf %306, %305 : vector<32x256xf32>
    %308 = math.exp %307 : vector<32x256xf32>
    %309 = arith.mulf %304, %308 : vector<32x256xf32>
    %cst_133 = arith.constant 1.000000e+00 : f32
    %310 = vector.broadcast %cst_133 : f32 to vector<32x256xf32>
    %311 = arith.subf %310, %309 : vector<32x256xf32>
    %cst_134 = arith.constant 0.000000e+00 : f32
    %312 = vector.broadcast %cst_134 : f32 to vector<32x256xf32>
    %313 = arith.cmpf oge, %283, %312 : vector<32x256xf32>
    %cst_135 = arith.constant 0.000000e+00 : f32
    %314 = vector.broadcast %cst_135 : f32 to vector<32x256xf32>
    %315 = arith.subf %314, %311 : vector<32x256xf32>
    %316 = arith.select %313, %311, %315 : vector<32x256xi1>, vector<32x256xf32>
    %cst_136 = arith.constant 1.000000e+00 : f32
    %317 = vector.broadcast %cst_136 : f32 to vector<32x256xf32>
    %318 = arith.addf %317, %316 : vector<32x256xf32>
    %319 = arith.mulf %281, %318 : vector<32x256xf32>
    %320 = arith.truncf %319 : vector<32x256xf32> to vector<32x256xbf16>
    %c0_137 = arith.constant 0 : index
    %c0_138 = arith.constant 0 : index
    %c0_139 = arith.constant 0 : index
    %321 = vector.load %arg13[%c0_137, %c0_138, %c0_139] : memref<1x256x128xbf16, #tpu.memory_space<vmem>>, vector<1x256x128xbf16>
    %322 = vector.shape_cast %321 : vector<1x256x128xbf16> to vector<256x128xbf16>
    %cst_140 = arith.constant dense<0.000000e+00> : vector<32x128xf32>
    %323 = tpu.matmul %320, %322, %cst_140 {dimension_numbers = #tpu.dot_dimension_numbers<[1], [0], [0], [1], [0, 0, 1, 1], [], []>} : vector<32x256xbf16>, vector<256x128xbf16>, vector<32x128xf32> -> vector<32x128xf32>
    %c0_141 = arith.constant 0 : index
    %c0_142 = arith.constant 0 : index
    %c0_143 = arith.constant 0 : index
    %324 = vector.load %arg14[%c0_141, %c0_142, %c0_143] : memref<1x1x128xf32, #tpu.memory_space<vmem>>, vector<1x1x128xf32>
    %325 = vector.shape_cast %324 : vector<1x1x128xf32> to vector<1x128xf32>
    %326 = vector.broadcast %325 : vector<1x128xf32> to vector<32x128xf32>
    %327 = arith.addf %323, %326 : vector<32x128xf32>
    %328 = arith.addf %271, %327 : vector<32x128xf32>
    %c0_144 = arith.constant 0 : index
    %c0_145 = arith.constant 0 : index
    %c0_146 = arith.constant 0 : index
    %329 = vector.load %arg15[%c0_144, %c0_145, %c0_146] : memref<1x1x128xf32, #tpu.memory_space<vmem>>, vector<1x1x128xf32>
    %330 = vector.shape_cast %329 : vector<1x1x128xf32> to vector<1x128xf32>
    %c0_147 = arith.constant 0 : index
    %c0_148 = arith.constant 0 : index
    %c0_149 = arith.constant 0 : index
    %331 = vector.load %arg16[%c0_147, %c0_148, %c0_149] : memref<1x1x128xf32, #tpu.memory_space<vmem>>, vector<1x1x128xf32>
    %332 = vector.shape_cast %331 : vector<1x1x128xf32> to vector<1x128xf32>
    %cst_150 = arith.constant dense<0.000000e+00> : vector<128xf32>
    %333 = vector.multi_reduction <add>, %328, %cst_150 [0] : vector<32x128xf32> to vector<128xf32>
    %334 = vector.shape_cast %333 : vector<128xf32> to vector<1x128xf32>
    %cst_151 = arith.constant 3.200000e+01 : f32
    %335 = vector.broadcast %cst_151 : f32 to vector<1x128xf32>
    %336 = arith.divf %334, %335 : vector<1x128xf32>
    %337 = vector.broadcast %336 : vector<1x128xf32> to vector<32x128xf32>
    %338 = arith.subf %328, %337 : vector<32x128xf32>
    %339 = arith.mulf %338, %338 : vector<32x128xf32>
    %cst_152 = arith.constant dense<0.000000e+00> : vector<128xf32>
    %340 = vector.multi_reduction <add>, %339, %cst_152 [0] : vector<32x128xf32> to vector<128xf32>
    %341 = vector.shape_cast %340 : vector<128xf32> to vector<1x128xf32>
    %cst_153 = arith.constant 3.200000e+01 : f32
    %342 = vector.broadcast %cst_153 : f32 to vector<1x128xf32>
    %343 = arith.divf %341, %342 : vector<1x128xf32>
    %cst_154 = arith.constant 9.99999974E-6 : f32
    %344 = vector.broadcast %cst_154 : f32 to vector<1x128xf32>
    %345 = arith.addf %343, %344 : vector<1x128xf32>
    %346 = math.rsqrt %345 : vector<1x128xf32>
    %347 = arith.mulf %346, %330 : vector<1x128xf32>
    %348 = vector.broadcast %347 : vector<1x128xf32> to vector<32x128xf32>
    %349 = arith.mulf %338, %348 : vector<32x128xf32>
    %350 = vector.broadcast %332 : vector<1x128xf32> to vector<32x128xf32>
    %351 = arith.addf %349, %350 : vector<32x128xf32>
    %c0_155 = arith.constant 0 : index
    %c0_156 = arith.constant 0 : index
    %352 = vector.load %arg18[%c0_155, %c0_156] : memref<32x128xf32, #tpu.memory_space<vmem>>, vector<32x128xf32>
    tpu.vector_store %arg18[%c0_155, %c0_156], %351 {strides = array<i32>} : memref<32x128xf32, #tpu.memory_space<vmem>>, vector<32x128xf32>,
    %c2_i32 = arith.constant 2 : i32
    %353 = arith.cmpi eq, %arg0, %c2_i32 : i32
    %354 = arith.extui %353 : i1 to i32
    %c0_i32_157 = arith.constant 0 : i32
    %355 = arith.cmpi ne, %354, %c0_i32_157 : i32
    scf.if %355 {
      %356 = vector.extract_strided_slice %351 {offsets = [0, 0], sizes = [16, 128], strides = [1, 1]} : vector<32x128xf32> to vector<16x128xf32>
      %cst_158 = arith.constant dense<0.000000e+00> : vector<128xf32>
      %357 = vector.multi_reduction <add>, %356, %cst_158 [0] : vector<16x128xf32> to vector<128xf32>
      %358 = vector.shape_cast %357 : vector<128xf32> to vector<1x128xf32>
      %cst_159 = arith.constant 1.600000e+01 : f32
      %359 = vector.broadcast %cst_159 : f32 to vector<1x128xf32>
      %360 = arith.divf %358, %359 : vector<1x128xf32>
      %361 = vector.extract_strided_slice %351 {offsets = [16, 0], sizes = [16, 128], strides = [1, 1]} : vector<32x128xf32> to vector<16x128xf32>
      %cst_160 = arith.constant dense<0.000000e+00> : vector<128xf32>
      %362 = vector.multi_reduction <add>, %361, %cst_160 [0] : vector<16x128xf32> to vector<128xf32>
      %363 = vector.shape_cast %362 : vector<128xf32> to vector<1x128xf32>
      %cst_161 = arith.constant 1.600000e+01 : f32
      %364 = vector.broadcast %cst_161 : f32 to vector<1x128xf32>
      %365 = arith.divf %363, %364 : vector<1x128xf32>
      %366 = tpu.concatenate %360, %365 in 0 : vector<1x128xf32>, vector<1x128xf32> -> vector<2x128xf32>
      %c0_162 = arith.constant 0 : index
      %c0_163 = arith.constant 0 : index
      %367 = vector.load %arg17[%c0_162, %c0_163] : memref<2x128xf32, #tpu.memory_space<vmem>>, vector<2x128xf32>
      tpu.vector_store %arg17[%c0_162, %c0_163], %366 {strides = array<i32>} : memref<2x128xf32, #tpu.memory_space<vmem>>, vector<2x128xf32>,
    } else {
    }
    return
  }
  func.func @transform_0(%arg0: i32) -> (i32, i32, i32) {
    %c0_i32 = arith.constant 0 : i32
    %c0_i32_0 = arith.constant 0 : i32
    %c0_i32_1 = arith.constant 0 : i32
    %c0_i32_2 = arith.constant 0 : i32
    return %c0_i32, %c0_i32_0, %c0_i32_1 : i32, i32, i32
  }
  func.func @transform_1(%arg0: i32) -> (i32, i32) {
    %c0_i32 = arith.constant 0 : i32
    %c0_i32_0 = arith.constant 0 : i32
    %c0_i32_1 = arith.constant 0 : i32
    return %c0_i32, %c0_i32_0 : i32, i32
  }
  func.func @transform_2(%arg0: i32) -> (i32, i32) {
    %c0_i32 = arith.constant 0 : i32
    %c0_i32_0 = arith.constant 0 : i32
    %c0_i32_1 = arith.constant 0 : i32
    return %c0_i32, %c0_i32_0 : i32, i32
  }
  func.func @transform_3(%arg0: i32) -> (i32, i32) {
    %c0_i32 = arith.constant 0 : i32
    %c0_i32_0 = arith.constant 0 : i32
    %c0_i32_1 = arith.constant 0 : i32
    return %c0_i32, %c0_i32_0 : i32, i32
  }
  func.func @transform_4(%arg0: i32) -> (i32, i32, i32) {
    %c0_i32 = arith.constant 0 : i32
    %c0_i32_0 = arith.constant 0 : i32
    %c0_i32_1 = arith.constant 0 : i32
    return %arg0, %c0_i32, %c0_i32_0 : i32, i32, i32
  }
  func.func @transform_5(%arg0: i32) -> (i32, i32, i32) {
    %c0_i32 = arith.constant 0 : i32
    %c0_i32_0 = arith.constant 0 : i32
    %c0_i32_1 = arith.constant 0 : i32
    return %arg0, %c0_i32, %c0_i32_0 : i32, i32, i32
  }
  func.func @transform_6(%arg0: i32) -> (i32, i32, i32) {
    %c0_i32 = arith.constant 0 : i32
    %c0_i32_0 = arith.constant 0 : i32
    %c0_i32_1 = arith.constant 0 : i32
    return %arg0, %c0_i32, %c0_i32_0 : i32, i32, i32
  }
  func.func @transform_7(%arg0: i32) -> (i32, i32, i32) {
    %c0_i32 = arith.constant 0 : i32
    %c0_i32_0 = arith.constant 0 : i32
    %c0_i32_1 = arith.constant 0 : i32
    return %arg0, %c0_i32, %c0_i32_0 : i32, i32, i32
  }
  func.func @transform_8(%arg0: i32) -> (i32, i32, i32) {
    %c0_i32 = arith.constant 0 : i32
    %c0_i32_0 = arith.constant 0 : i32
    %c0_i32_1 = arith.constant 0 : i32
    return %arg0, %c0_i32, %c0_i32_0 : i32, i32, i32
  }
  func.func @transform_9(%arg0: i32) -> (i32, i32, i32) {
    %c0_i32 = arith.constant 0 : i32
    %c0_i32_0 = arith.constant 0 : i32
    %c0_i32_1 = arith.constant 0 : i32
    return %arg0, %c0_i32, %c0_i32_0 : i32, i32, i32
  }
  func.func @transform_10(%arg0: i32) -> (i32, i32, i32) {
    %c0_i32 = arith.constant 0 : i32
    %c0_i32_0 = arith.constant 0 : i32
    %c0_i32_1 = arith.constant 0 : i32
    return %arg0, %c0_i32, %c0_i32_0 : i32, i32, i32
  }
  func.func @transform_11(%arg0: i32) -> (i32, i32, i32) {
    %c0_i32 = arith.constant 0 : i32
    %c0_i32_0 = arith.constant 0 : i32
    %c0_i32_1 = arith.constant 0 : i32
    return %arg0, %c0_i32, %c0_i32_0 : i32, i32, i32
  }
  func.func @transform_12(%arg0: i32) -> (i32, i32, i32) {
    %c0_i32 = arith.constant 0 : i32
    %c0_i32_0 = arith.constant 0 : i32
    %c0_i32_1 = arith.constant 0 : i32
    return %arg0, %c0_i32, %c0_i32_0 : i32, i32, i32
  }
  func.func @transform_13(%arg0: i32) -> (i32, i32, i32) {
    %c0_i32 = arith.constant 0 : i32
    %c0_i32_0 = arith.constant 0 : i32
    %c0_i32_1 = arith.constant 0 : i32
    return %arg0, %c0_i32, %c0_i32_0 : i32, i32, i32
  }
  func.func @transform_14(%arg0: i32) -> (i32, i32, i32) {
    %c0_i32 = arith.constant 0 : i32
    %c0_i32_0 = arith.constant 0 : i32
    %c0_i32_1 = arith.constant 0 : i32
    return %arg0, %c0_i32, %c0_i32_0 : i32, i32, i32
  }
  func.func @transform_15(%arg0: i32) -> (i32, i32, i32) {
    %c0_i32 = arith.constant 0 : i32
    %c0_i32_0 = arith.constant 0 : i32
    %c0_i32_1 = arith.constant 0 : i32
    return %arg0, %c0_i32, %c0_i32_0 : i32, i32, i32
  }
  func.func @transform_16(%arg0: i32) -> (i32, i32) {
    %c0_i32 = arith.constant 0 : i32
    %c0_i32_0 = arith.constant 0 : i32
    %c0_i32_1 = arith.constant 0 : i32
    return %c0_i32, %c0_i32_0 : i32, i32
  }
}

</mosaic_0001>

<bundles_post_ra>
// kernel: tst_encoder_forward.1
= control target key start
LH: loop header
LB: loop body
LE: loop exit
PB: predicated region body
PF: predicated region fallthrough
CT: control target
= control target key end

     0   :  { %s6763_s0 = inlined_call_operand.vmem [shape: f32[2,16,4], index: 0, kind: input, shape index: {}]   ;;  %s6764_s1 = inlined_call_operand.hbm [shape: bf16[4,128], index: 1, kind: input, shape index: {}]   ;;  %s6765_s2 = inlined_call_operand.hbm [shape: f32[1,128], index: 2, kind: input, shape index: {}]   ;;  %s6766_s3 = inlined_call_operand.vmem [shape: f32[16,128], index: 3, kind: input, shape index: {}]   ;;  %s6767_s4 = inlined_call_operand.hbm [shape: bf16[3,128,384], index: 4, kind: input, shape index: {}]   ;;  %s6768_s5 = inlined_call_operand.vmem [shape: f32[3,1,384], index: 5, kind: input, shape index: {}]   ;;  %s6769_s6 = inlined_call_operand.hbm [shape: bf16[3,128,128], index: 6, kind: input, shape index: {}]   ;;  %s6770_s7 = inlined_call_operand.vmem [shape: f32[3,1,128], index: 7, kind: input, shape index: {}]   ;;  %s6771_s8 = inlined_call_operand.vmem [shape: f32[3,1,128], index: 8, kind: input, shape index: {}]   ;;  %s6772_s9 = inlined_call_operand.vmem [shape: f32[3,1,128], index: 9, kind: input, shape index: {}]   ;;  %s6773_s10 = inlined_call_operand.hbm [shape: bf16[3,128,256], index: 10, kind: input, shape index: {}]   ;;  %s6774_s11 = inlined_call_operand.vmem [shape: f32[3,1,256], index: 11, kind: input, shape index: {}]   ;;  %s6775_s12 = inlined_call_operand.hbm [shape: bf16[3,256,128], index: 12, kind: input, shape index: {}]   ;;  %s6776_s13 = inlined_call_operand.vmem [shape: f32[3,1,128], index: 13, kind: input, shape index: {}]   ;;  %s6777_s14 = inlined_call_operand.vmem [shape: f32[3,1,128], index: 14, kind: input, shape index: {}]   ;;  %s6778_s15 = inlined_call_operand.vmem [shape: f32[3,1,128], index: 15, kind: input, shape index: {}]   ;;  %s6779_s16 = inlined_call_operand.hbm [shape: f32[2,128], index: 16, kind: output, shape index: {}]  }
   0x1   :  { %6793 = sst [smem:[#allocation21_spill]] %s6763_s0 }
   0x2   :  { %6794 = sst [smem:[#allocation22_spill]] %s6764_s1 }
   0x3   :  { %6795 = sst [smem:[#allocation23_spill]] %s6765_s2 }
   0x4   :  { %6796 = sst [smem:[#allocation24_spill]] %s6766_s3 }
   0x5   :  { %6797 = sst [smem:[#allocation25_spill]] %s6767_s4 }
   0x6   :  { %6798 = sst [smem:[#allocation26_spill]] %s6768_s5 }
   0x7   :  { %6799 = sst [smem:[#allocation27_spill]] %s6769_s6 }
   0x8   :  { %6800 = sst [smem:[#allocation28_spill]] %s6773_s10 }
   0x9   :  { %6801 = sst [smem:[#allocation29_spill]] %s6774_s11 }
   0xa   :  { %6802 = sst [smem:[#allocation30_spill]] %s6776_s13 }
   0xb   :  { %6803 = sst [smem:[#allocation31_spill]] %s6777_s14 }
   0xc   :  { %6804 = sst [smem:[#allocation32_spill]] %s6778_s15 }
   0xd   :  { %6805 = sst [smem:[#allocation33_spill]] %s6779_s16 }
   0xe   :  { %21 = vsyncpa [#allocation5], 0 }
   0xf   :  { %22 = vsyncpa [#allocation8], 0 }
  0x10   :  { %23 = vsyncpa [#allocation6], 0  ;;  %s5639_s21 = smov 0   ;;  %s5641_s22 = smov 0  }
  0x11   :  { %s5643_s23 = smov 0   ;;  %s5645_s24 = smov 0  }
  0x12 LB: > { %6806 = sst [smem:[#allocation18_spill]] %s5524_s23  ;;  %s5658_s25 = sadd.s32 4294967295, %s5528_s24   ;;  %s5528_s24 = sphi %s5645_s24, %s6845_s24   ;;  %s5524_s23 = sphi %s5643_s23, %s6847_s23   ;;  %s5520_s22 = sphi %s5641_s22, %s6849_s22   ;;  %s5516_s21 = sphi %s5639_s21, %s6848_s21  }
  0x13   : > { %s5661_s26 = sadd.s32 1, %s5528_s24   ;;  %s120_s28 = sadd.s32 1, %s5524_s23 }
  0x14   : > { %6807 = sst [smem:[#allocation19_spill]] %s5661_s26  ;;  %s117_s27 = ssub.s32 %s5528_s24, %s5661_s26 }
  0x15   : > { %p118_p0 = scmp.eq.s32.totalorder %s117_s27, 0  ;;  %p127_p1 = scmp.ne.s32.totalorder %s5524_s23, %s5520_s22 }
  0x16   : > { %p128_p2 = scmp.eq.s32.totalorder %s5528_s24, 0  ;;  %p133_p3 = scmp.ne.s32.totalorder %s5520_s22, %s5516_s21 }
  0x17   : > { %s5671_s29 = scalar_select %p118_p0, %s5524_s23, %s120_s28  }
  0x18   : > { %p5673_p4 = por %p128_p2, %p127_p1  ;;  %p6781_p5 = scmp.eq.s32.totalorder %s5658_s25, 0 }
  0x19   : > { %6808 = sst [smem:[#allocation20_spill]] %s5671_s29  ;;  %p4386_p6 = scmp.ge.s32.totalorder %s5528_s24, 1 }
  0x1a   : > { %p451_p7 = scmp.lt.s32.totalorder %s5528_s24, 4  ;;  %p5682_p8 = por %p6781_p5, %p133_p3 }
  0x1b   : > { %s5530_s18 = smov [#allocation4]   ;;  %p4919_p12 = scmp.lt.s32.totalorder %s5528_s24, 3 }
  0x1c   : > { %s6810_s0 = scalar_select %p5682_p8, 1, 0 }
  0x1d   : > { %p5687_p10 = pnand %p4386_p6, %p451_p7  ;;  %s467_s19 = sshll.u32 %s5530_s18, 4  ;;  %s468_s19 = int_to_ptr.vmem [resolvable:$true] %s467_s19 }
  0x1e   : > { %s492_s20 = sand.u32 1, %s5528_s24   ;;  %p5703_p0 = pnand %p4919_p12, %p5673_p4 }
  0x1f   : > { %s6811_s17 = scalar_select %p5687_p10, 1, 0 }
  0x20   : > { %p4897_p11 = pneg %p5687_p10  ;;  %s5708_s28 = sand.u32 1, %s5524_s23  }
  0x21   : > { %s4873_s18 = smul.u32 192, %s5708_s28  ;;  %s5305_s29 = scalar_lea.vmem %s468_s19, 32 }
  0x22   : > { %p5697_p13 = pnand %p4897_p11, %p6781_p5  ;;  %p5306_p2 = scmp.ne.s32.totalorder %s468_s19, %s5305_s29 }
  0x23   : > { %p5313_p7 = scmp.lt.s32.totalorder %s468_s19, %s468_s19  ;;  %p5314_p11 = scmp.lt.s32.totalorder %s5305_s29, %s5305_s29 }
  0x24   : > { %s6812_s21 = scalar_select %p5697_p13, 1, 0 }
  0x25   : > { %p6786_p1 = pneg %p5697_p13  ;;  %p5315_p9 = por %p5314_p11, %p5313_p7 }
  0x27   : > { %p5308_p3 = pnand %p5306_p2, %p6786_p1 }
  0x29   : > { %p5309_p6 = pneg %p5308_p3 }
  0x2b   : > { %p5316_p5 = pnand %p5315_p9, %p5309_p6 }
  0x2d   : > { %5319 = shalt.err (!%p5316_p5)
}
  0x2e   : > { %s6814_s1 = sld [smem:[#allocation22_spill]]  ;;  %s4874_s26 = smul.u32 3072, %s5528_s24 }
  0x2f   : > { %s496_s16 = scalar_lea.vmem [#allocation9], %s4873_s18  ;;  %s6815_s4 = sld [smem:[#allocation25_spill]] }
  0x30   : > { %s503_s3 = sshll.u32 %s496_s16, 4  ;;  %s5729_s13 = scalar_lea.sflag [#allocation5], %s492_s20  ;;  %s5722_s3 = int_to_ptr.vmem [resolvable:$true] %s503_s3 }
  0x31   : > { %p5735_p5 = pneg %p5703_p0 }
  0x34   : > { %4900 = dma.hbm_to_vmem [thread:$0]  (!%p5697_p13), %s6814_s1, 32, %s468_s19, [#allocation5]  }
  0x35   : > { %s5727_s29 = scalar_lea.hbm %s6815_s4, %s4874_s26  ;;  %s5325_s15 = scalar_lea.hbm %s6815_s4, 9216 }
  0x36   : > { %s5320_s11 = scalar_lea.hbm %s5727_s29, 3072  ;;  %p5326_p2 = scmp.lt.s32.totalorder %s5727_s29, %s6815_s4 }
  0x37   : > { %p5321_p4 = scmp.ne.s32.totalorder %s5727_s29, %s5320_s11  ;;  %p5327_p3 = scmp.lt.s32.totalorder %s5325_s15, %s5320_s11 }
  0x39   : > { %p5323_p9 = pnand %p5735_p5, %p5321_p4  ;;  %p5328_p6 = por %p5327_p3, %p5326_p2 }
  0x3b   : > { %p5324_p12 = pneg %p5323_p9 }
  0x3d   : > { %p5329_p7 = pnand %p5328_p6, %p5324_p12 }
  0x3f   : > { %5332 = shalt.err (!%p5329_p7)
}
  0x40   : > { %s5333_s20 = scalar_lea.vmem %s5722_s3, 3072  ;;  %s5531_s18 = smov [#allocation9]  }
  0x41   : > { %p5334_p11 = scmp.ne.s32.totalorder %s5722_s3, %s5333_s20  ;;  %s5338_s30 = sshll.u32 %s5531_s18, 4  ;;  %s5339_s30 = int_to_ptr.vmem [resolvable:$false] %s5338_s30 }
  0x42   : > { %s5340_s16 = scalar_lea.vmem %s5339_s30, 6144  ;;  %p5341_p1 = scmp.lt.s32.totalorder %s5722_s3, %s5339_s30 }
  0x43   : > { %p5336_p4 = pnand %p5334_p11, %p5735_p5  ;;  %p5342_p8 = scmp.lt.s32.totalorder %s5340_s16, %s5333_s20 }
  0x45   : > { %p5337_p9 = pneg %p5336_p4  ;;  %p5343_p10 = por %p5342_p8, %p5341_p1 }
  0x47   : > { %p5344_p13 = pnand %p5343_p10, %p5337_p9 }
  0x49   : > { %5347 = shalt.err (!%p5344_p13)
}
  0x4a   : > { %s5532_s11 = smov 192   ;;  %s5533_s14 = smov 12  }
  0x4b   : > { %4907 = dma.hbm_to_vmem [thread:$0]  (!%p5703_p0), %s5727_s29, 3072, %s5722_s3, %s5729_s13, %s5532_s11, %s5532_s11, %s5533_s14  }
  0x4c   : > { %s4391_s15 = sshll.u32 %s5708_s28, 6  ;;  %s4516_s26 = sshll.u32 %s5528_s24, 10 }
  0x4d   : > { %s6817_s6 = sld [smem:[#allocation27_spill]]  ;;  %s524_s30 = scalar_lea.vmem [#allocation10], %s4391_s15 }
  0x4e   : > { %s531_s16 = sshll.u32 %s524_s30, 4  ;;  %s5765_s16 = int_to_ptr.vmem [resolvable:$true] %s531_s16 }
  0x53   : > { %s5763_s20 = scalar_lea.hbm %s6817_s6, %s4516_s26  ;;  %s5353_s11 = scalar_lea.hbm %s6817_s6, 3072 }
  0x54   : > { %s5348_s1 = scalar_lea.hbm %s5763_s20, 1024  ;;  %p5354_p1 = scmp.lt.s32.totalorder %s5763_s20, %s6817_s6 }
  0x55   : > { %p5349_p8 = scmp.ne.s32.totalorder %s5763_s20, %s5348_s1  ;;  %p5355_p12 = scmp.lt.s32.totalorder %s5353_s11, %s5348_s1 }
  0x57   : > { %p5351_p10 = pnand %p5349_p8, %p5735_p5  ;;  %p5356_p2 = por %p5355_p12, %p5354_p1 }
  0x59   : > { %p5352_p13 = pneg %p5351_p10 }
  0x5b   : > { %p5357_p3 = pnand %p5356_p2, %p5352_p13 }
  0x5d   : > { %5360 = shalt.err (!%p5357_p3)
}
  0x5e   : > { %s5361_s15 = scalar_lea.vmem %s5765_s16, 1024  ;;  %s5534_s26 = smov [#allocation10]  }
  0x5f   : > { %p5362_p6 = scmp.ne.s32.totalorder %s5765_s16, %s5361_s15  ;;  %s5366_s18 = sshll.u32 %s5534_s26, 4  ;;  %s5367_s18 = int_to_ptr.vmem [resolvable:$false] %s5366_s18 }
  0x60   : > { %s5368_s30 = scalar_lea.vmem %s5367_s18, 2048  ;;  %p5369_p4 = scmp.lt.s32.totalorder %s5765_s16, %s5367_s18 }
  0x61   : > { %p5364_p7 = pnand %p5362_p6, %p5735_p5  ;;  %p5370_p9 = scmp.lt.s32.totalorder %s5368_s30, %s5361_s15 }
  0x63   : > { %p5365_p11 = pneg %p5364_p7  ;;  %p5371_p8 = por %p5370_p9, %p5369_p4 }
  0x65   : > { %p5372_p10 = pnand %p5371_p8, %p5365_p11 }
  0x67   : > { %5375 = shalt.err (!%p5372_p10)
}
  0x68   : > { %s6791_s1 = smov 64   ;;  %s6792_s3 = smov 4  }
  0x69   : > { %4910 = dma.hbm_to_vmem [thread:$0]  (!%p5703_p0), %s5763_s20, 1024, %s5765_s16, %s5729_s13, %s6791_s1, %s6791_s1, %s6792_s3  }
  0x6a   : > { %s4394_s29 = sshll.u32 %s5708_s28, 7  ;;  %s4517_s11 = sshll.u32 %s5528_s24, 11 }
  0x6b   : > { %s6818_s10 = sld [smem:[#allocation28_spill]]  ;;  %s563_s26 = scalar_lea.vmem [#allocation11], %s4394_s29 }
  0x6c   : > { %s570_s18 = sshll.u32 %s563_s26, 4  ;;  %s5802_s18 = int_to_ptr.vmem [resolvable:$true] %s570_s18 }
  0x71   : > { %s5798_s15 = scalar_lea.hbm %s6818_s10, %s4517_s11  ;;  %s5381_s1 = scalar_lea.hbm %s6818_s10, 6144 }
  0x72   : > { %s5376_s30 = scalar_lea.hbm %s5798_s15, 2048  ;;  %p5382_p2 = scmp.lt.s32.totalorder %s5798_s15, %s6818_s10 }
  0x73   : > { %p5377_p13 = scmp.ne.s32.totalorder %s5798_s15, %s5376_s30  ;;  %p5383_p3 = scmp.lt.s32.totalorder %s5381_s1, %s5376_s30 }
  0x75   : > { %p5379_p1 = pnand %p5377_p13, %p5735_p5  ;;  %p5384_p6 = por %p5383_p3, %p5382_p2 }
  0x77   : > { %p5380_p12 = pneg %p5379_p1 }
  0x79   : > { %p5385_p7 = pnand %p5384_p6, %p5380_p12 }
  0x7b   : > { %5388 = shalt.err (!%p5385_p7)
}
  0x7c   : > { %s5389_s26 = scalar_lea.vmem %s5802_s18, 2048  ;;  %s5537_s3 = smov [#allocation11]  }
  0x7d   : > { %p5390_p11 = scmp.ne.s32.totalorder %s5802_s18, %s5389_s26  ;;  %s5394_s20 = sshll.u32 %s5537_s3, 4  ;;  %s5395_s20 = int_to_ptr.vmem [resolvable:$false] %s5394_s20 }
  0x7e   : > { %s5396_s16 = scalar_lea.vmem %s5395_s20, 4096  ;;  %p5397_p8 = scmp.lt.s32.totalorder %s5802_s18, %s5395_s20 }
  0x7f   : > { %p5392_p4 = pnand %p5390_p11, %p5735_p5  ;;  %p5398_p10 = scmp.lt.s32.totalorder %s5396_s16, %s5389_s26 }
  0x81   : > { %p5393_p9 = pneg %p5392_p4  ;;  %p5399_p13 = por %p5398_p10, %p5397_p8 }
  0x83   : > { %p5400_p1 = pnand %p5399_p13, %p5393_p9 }
  0x85   : > { %5403 = shalt.err (!%p5400_p1)
}
  0x86   : > { %s5538_s1 = smov 128   ;;  %s5539_s30 = smov 8  }
  0x87   : > { %4913 = dma.hbm_to_vmem [thread:$0]  (!%p5703_p0), %s5798_s15, 2048, %s5802_s18, %s5729_s13, %s5538_s1, %s5538_s1, %s5539_s30  }
  0x88   : > { %s5540_s14 = smov [#allocation7]   ;;  %s5830_s26 = scalar_lea.hbm %s6775_s12, %s4517_s11 }
  0x89   : > { %s478_s3 = sshll.u32 %s5540_s14, 4  ;;  %s591_s16 = scalar_lea.vmem [#allocation12], %s4394_s29  ;;  %s479_s3 = int_to_ptr.vmem [resolvable:$true] %s478_s3 }
  0x8a   : > { %s598_s4 = sshll.u32 %s591_s16, 4  ;;  %s5415_s6 = scalar_lea.vmem %s479_s3, 16  ;;  %s599_s4 = int_to_ptr.vmem [resolvable:$true] %s598_s4 }
  0x8b   : > { %p5416_p12 = scmp.ne.s32.totalorder %s479_s3, %s5415_s6  ;;  %p6819_p2 = scmp.ne.s32.totalorder %s6812_s21, 0 }
  0x8c   : > { %s5422_s10 = scalar_lea.vmem %s479_s3, 32  ;;  %p5423_p11 = scmp.lt.s32.totalorder %s479_s3, %s479_s3 }
  0x8d   : > { %p6820_p3 = pneg %p6819_p2  ;;  %p5424_p4 = scmp.lt.s32.totalorder %s5422_s10, %s5415_s6 }
  0x8f   : > { %p5418_p6 = pnand %p5416_p12, %p6820_p3  ;;  %p5425_p9 = por %p5424_p4, %p5423_p11 }
  0x91   : > { %p5419_p7 = pneg %p5418_p6 }
  0x93   : > { %p5426_p8 = pnand %p5425_p9, %p5419_p7 }
  0x95   : > { %5429 = shalt.err (!%p5426_p8)
}
  0x96   : > { %s6821_s2 = sld [smem:[#allocation23_spill]]  ;;  %s5430_s28 = scalar_lea.hbm %s5830_s26, 2048 }
  0x97   : > { %p5431_p10 = scmp.ne.s32.totalorder %s5830_s26, %s5430_s28  ;;  %s5435_s29 = scalar_lea.hbm %s6775_s12, 6144 }
  0x98   : > { %p5436_p12 = scmp.lt.s32.totalorder %s5830_s26, %s6775_s12  ;;  %p5437_p3 = scmp.lt.s32.totalorder %s5435_s29, %s5430_s28 }
  0x99   : > { %p5433_p13 = pnand %p5431_p10, %p5735_p5 }
  0x9a   : > { %p5438_p6 = por %p5437_p3, %p5436_p12 }
  0x9b   : > { %p5434_p1 = pneg %p5433_p13 }
  0x9c   : > { %4903 = dma.hbm_to_vmem [thread:$0]  (!%p6819_p2), %s6821_s2, 16, %s479_s3, [#allocation8]  }
  0x9d   : > { %p5439_p7 = pnand %p5438_p6, %p5434_p1 }
  0x9f   : > { %5442 = shalt.err (!%p5439_p7)
}
  0xa0   : > { %s5443_s18 = scalar_lea.vmem %s599_s4, 2048  ;;  %s5541_s1 = smov [#allocation12]  }
  0xa1   : > { %p5444_p2 = scmp.ne.s32.totalorder %s599_s4, %s5443_s18  ;;  %s5448_s30 = sshll.u32 %s5541_s1, 4  ;;  %s5449_s30 = int_to_ptr.vmem [resolvable:$false] %s5448_s30 }
  0xa2   : > { %s5450_s14 = scalar_lea.vmem %s5449_s30, 4096  ;;  %p5451_p9 = scmp.lt.s32.totalorder %s599_s4, %s5449_s30 }
  0xa3   : > { %p5446_p11 = pnand %p5444_p2, %p5735_p5  ;;  %p5452_p8 = scmp.lt.s32.totalorder %s5450_s14, %s5443_s18 }
  0xa5   : > { %p5447_p4 = pneg %p5446_p11  ;;  %p5453_p10 = por %p5452_p8, %p5451_p9 }
  0xa7   : > { %p5454_p13 = pnand %p5453_p10, %p5447_p4 }
  0xa9   : > { %5457 = shalt.err (!%p5454_p13)
}
  0xaa   : > { %s6822_s3 = smov 4   ;;  %s6823_s19 = smov 64  }
  0xab   : > { %4916 = dma.hbm_to_vmem [thread:$0]  (!%p5703_p0), %s5830_s26, 2048, %s599_s4, %s5729_s13, %s6823_s19, %s6823_s19, %s6822_s3  }
  0xac   : > { %p6824_p5 = scmp.ne.s32.totalorder %s6811_s17, 0 }
  0xad   : > { %p6825_p1 = scmp.eq.s32.totalorder (!%p6824_p5), %s5658_s25, 0 }
  0xae   : > { %628 = sbr.rel (%p6824_p5) target bundleno = 6164 (0x1814), region = 84 }
  0xb3   : > { %5499 = dma.done.wait (%p6825_p1), [#allocation5], 32   ;;  %p6826_p12 = pmov %p6825_p1 }
  0xb4   : > { %p6827_p3 = pmov %p6825_p1 }
  0xb5   : > { %5501 = vsyncadd (%p6826_p12), [#allocation5], 4294967264 }
  0xb6   : > { %5503 = dma.done.wait (%p6827_p3), [#allocation8], 16   ;;  %p6828_p6 = pmov %p6825_p1 }
  0xb7   : > { %s638_s27 = sand.u32 1, %s5658_s25   ;;  %s640_s4 = sand.u32 1, %s5520_s22  }
  0xb8   : > { %5505 = vsyncadd (%p6828_p6), [#allocation8], 4294967280  ;;  %s4875_s13 = smul.u32 192, %s640_s4  ;;  %s639_s17 = scalar_lea.sflag [#allocation5], %s638_s27 }
  0xb9   : > { %p6829_p0 = scmp.ne.s32.totalorder %s6810_s0, 0 }
  0xba   : > { %s5874_s23 = scalar_lea.vmem [#allocation9], %s4875_s13 }
  0xbb   : > { %5507 = dma.done.wait (%p6829_p0), %s639_s17, 8192  }
  0xbc   : > { %5509 = vsyncadd (%p6829_p0), %s639_s17, 4294959104  ;;  %s4403_s20 = sshll.u32 %s640_s4, 6  ;;  %s4404_s26 = sshll.u32 %s640_s4, 7 }
  0xbd   : > { %p754_p7 = scmp.lt.s32.totalorder %s5658_s25, 2  ;;  %s6830_s5 = sld [smem:[#allocation26_spill]] }
  0xbe   : > { %s6831_s4 = sld [smem:[#allocation29_spill]]  ;;  %s5922_s30 = scalar_lea.vmem [#allocation11], %s4404_s26 }
  0xbf   : > { %s5882_s16 = scalar_select %p754_p7, %s5658_s25, 2 }
  0xc0   : > { %s6832_s28 = sld [smem:[#allocation30_spill]]  ;;  %p6835_p2 = scmp.ne.s32.totalorder %s5658_s25, 0 }
  0xc1   : > { %s4876_s24 = smul.u32 3, %s5882_s16  ;;  %s4406_s3 = sshll.u32 %s5882_s16, 1 }
  0xc2   : > { %s6833_s0 = sld [smem:[#allocation31_spill]] }
  0xc3   : > { %s5900_s14 = scalar_lea.vmem %s6830_s5, %s4876_s24  ;;  %s6834_s2 = sld [smem:[#allocation32_spill]] }
  0xc4   : > { %s5906_s13 = scalar_lea.vmem %s6831_s4, %s4406_s3  ;;  %s5920_s24 = scalar_lea.vmem [#allocation10], %s4403_s20 }
  0xc5   : > { %s5924_s5 = scalar_lea.vmem [#allocation12], %s4404_s26  ;;  %784 = sbr.rel (%p6835_p2) target bundleno = 412 (0x19c), region = 112 }
  0xc6   : > { %s773_s6 = scalar_lea.vmem %s6832_s28, %s5882_s16  ;;  %s6836_s27 = sld [smem:[#allocation21_spill]] (!%p6835_p2) }
  0xc7   : > { %s6837_s11 = sld [smem:[#allocation24_spill]] (!%p6835_p2) }
  0xc8   : > { %s776_s15 = scalar_lea.vmem %s6833_s0, %s5882_s16 }
  0xc9   : > { %s779_s1 = scalar_lea.vmem %s6834_s2, %s5882_s16 }
  0xca   : > { %v791_v0 = vld [vmem:[#allocation4] sm:$0x3]  ;;  %vm799_vm0 = vcmask 1041408   ;;  %vm792_vm1 = vcmask 31744   ;;  %vm873_vm2 = vcmask 130048   ;;  %v5542_v8 = vmov 0.0  }
  0xcb   : > { %4872 = vmatprep.subr.msk.bf16.mxu0 %vm799_vm0, %v791_v0  ;;  %v801_v3 = vsel %vm799_vm0, %v791_v0, 0  ;;  %874 = vst.msk [vmem:[#allocation3] sm:$0xff] %vm873_vm2, %v5542_v8  ;;  %875 = vst.msk [vmem:[#allocation3 + $0x8] sm:$0xff] %vm873_vm2, %v5542_v8  ;;  %v4410_v9 = vld [vmem:[#allocation7] ss:$0 sm:$0xff] }
  0xcc   : > { %v785_v1 = vld [vmem:[%s6836_s27] sm:$0xff]  ;;  %v786_v2 = vld [vmem:[%s6836_s27 + $0x8] sm:$0xff]  ;;  %v787_v5 = vld [vmem:[%s6836_s27 + $0x10] sm:$0xff]  ;;  %4635 = vmatpush3.bf16.msra.mxu0 %v801_v3  ;;  %876 = vst.msk [vmem:[#allocation3 + $0x10] sm:$0xff] %vm873_vm2, %v5542_v8 }
  0xcd   : > { %v789_v4 = vpack.c.bf16 %v786_v2, %v785_v1  ;;  %v788_v6 = vld [vmem:[%s6836_s27 + $0x18] sm:$0xff]  ;;  %877 = vst.msk [vmem:[#allocation3 + $0x18] sm:$0xff] %vm873_vm2, %v5542_v8  ;;  %878 = vst.msk [vmem:[#allocation3 + $0x20] sm:$0xff] %vm873_vm2, %v5542_v8  ;;  %v863_v11 = vld [vmem:[%s6837_s11] sm:$0xff] }
  0xce   : > { %v790_v7 = vpack.c.bf16 %v788_v6, %v787_v5  ;;  %879 = vst.msk [vmem:[#allocation3 + $0x28] sm:$0xff] %vm873_vm2, %v5542_v8  ;;  %880 = vst.msk [vmem:[#allocation3 + $0x30] sm:$0xff] %vm873_vm2, %v5542_v8  ;;  %v864_v17 = vld [vmem:[%s6837_s11 + $0x8] sm:$0xff] }
  0xcf   : > { %4636 = vmatprep.mubr.msk.bf16.mxu0 %vm792_vm1, %v789_v4  ;;  %881 = vst.msk [vmem:[#allocation3 + $0x38] sm:$0xff] %vm873_vm2, %v5542_v8  ;;  %882 = vst.msk [vmem:[#allocation3 + $0x40] sm:$0xff] %vm873_vm2, %v5542_v8 }
  0xd0   : > { %4637 = vmatmul.mubr.msk.bf16.vlgmr.msra.gmra.mxu0 %vm792_vm1, %v790_v7  ;;  %883 = vst.msk [vmem:[#allocation3 + $0x48] sm:$0xff] %vm873_vm2, %v5542_v8  ;;  %884 = vst.msk [vmem:[#allocation3 + $0x50] sm:$0xff] %vm873_vm2, %v5542_v8 }
  0xd1   : > { %885 = vst.msk [vmem:[#allocation3 + $0x58] sm:$0xff] %vm873_vm2, %v5542_v8  ;;  %886 = vst.msk [vmem:[#allocation3 + $0x60] sm:$0xff] %vm873_vm2, %v5542_v8 }
  0xd2   : > { %887 = vst.msk [vmem:[#allocation3 + $0x68] sm:$0xff] %vm873_vm2, %v5542_v8  ;;  %888 = vst.msk [vmem:[#allocation3 + $0x70] sm:$0xff] %vm873_vm2, %v5542_v8 }
  0xd3   : > { %889 = vst.msk [vmem:[#allocation3 + $0x78] sm:$0xff] %vm873_vm2, %v5542_v8  ;;  %890 = vst.msk [vmem:[#allocation3 + $0x80] sm:$0xff] %vm873_vm2, %v5542_v8 }
  0xd4   : > { %891 = vst.msk [vmem:[#allocation3 + $0x88] sm:$0xff] %vm873_vm2, %v5542_v8  ;;  %892 = vst.msk [vmem:[#allocation3 + $0x90] sm:$0xff] %vm873_vm2, %v5542_v8 }
  0xd5   : > { %893 = vst.msk [vmem:[#allocation3 + $0x98] sm:$0xff] %vm873_vm2, %v5542_v8  ;;  %894 = vst.msk [vmem:[#allocation3 + $0xa0] sm:$0xff] %vm873_vm2, %v5542_v8 }
  0xd6   : > { %895 = vst.msk [vmem:[#allocation3 + $0xa8] sm:$0xff] %vm873_vm2, %v5542_v8  ;;  %896 = vst.msk [vmem:[#allocation3 + $0xb0] sm:$0xff] %vm873_vm2, %v5542_v8 }
  0xd7   : > { %897 = vst.msk [vmem:[#allocation3 + $0xb8] sm:$0xff] %vm873_vm2, %v5542_v8  ;;  %898 = vst.msk [vmem:[#allocation3 + $0xc0] sm:$0xff] %vm873_vm2, %v5542_v8 }
  0xd8   : > { %899 = vst.msk [vmem:[#allocation3 + $0xc8] sm:$0xff] %vm873_vm2, %v5542_v8  ;;  %900 = vst.msk [vmem:[#allocation3 + $0xd0] sm:$0xff] %vm873_vm2, %v5542_v8 }
  0xd9   : > { %901 = vst.msk [vmem:[#allocation3 + $0xd8] sm:$0xff] %vm873_vm2, %v5542_v8  ;;  %902 = vst.msk [vmem:[#allocation3 + $0xe0] sm:$0xff] %vm873_vm2, %v5542_v8 }
  0xda   : > { %903 = vst.msk [vmem:[#allocation3 + $0xe8] sm:$0xff] %vm873_vm2, %v5542_v8  ;;  %904 = vst.msk [vmem:[#allocation3 + $0xf0] sm:$0xff] %vm873_vm2, %v5542_v8 }
  0xdb   : > { %905 = vst.msk [vmem:[#allocation3 + $0xf8] sm:$0xff] %vm873_vm2, %v5542_v8 }
 0x190   : > { %v4638_v10 = vpop.f32.mrf.mxu0 }
 0x191   : > { %v861_v12 = vadd.f32 %v4638_v10, %v4410_v9 }
 0x192   : > { %v837_v13 = vpop.f32.mrf.mxu0 }
 0x193   : > { %v867_v14 = vadd.f32 %v863_v11, %v861_v12  ;;  %v859_v15 = vadd.f32 %v4410_v9, %v837_v13 }
 0x194   : > { %v4639_v16 = vpop.f32.mrf.mxu0 }
 0x195   : > { %871 = vst [vmem:[#allocation2 + $0x18] sm:$0xff] %v867_v14  ;;  %v865_v18 = vadd.f32 %v863_v11, %v859_v15  ;;  %v862_v19 = vadd.f32 %v4639_v16, %v4410_v9 }
 0x196   : > { %v840_v20 = vpop.f32.mrf.mxu0 }
 0x197   : > { %869 = vst [vmem:[#allocation2 + $0x10] sm:$0xff] %v865_v18  ;;  %v868_v21 = vadd.f32 %v864_v17, %v862_v19  ;;  %v860_v22 = vadd.f32 %v4410_v9, %v840_v20 }
 0x199   : > { %872 = vst [vmem:[#allocation2 + $0x8] sm:$0xff] %v868_v21  ;;  %v866_v23 = vadd.f32 %v864_v17, %v860_v22 }
 0x19b   : > { %870 = vst [vmem:[#allocation2] sm:$0xff] %v866_v23 }
 0x19c PF: > { %v5046_v24 = vld [vmem:[%s5874_s23 + $0xac] ss:$12 sps:$4 sm:$0xff]   ;;  %v5048_v25 = vld [vmem:[%s5874_s23 + $0xa8] ss:$12 sps:$4 sm:$0xff]   ;;  %v5543_v26 = vmov 0   ;;  %v5544_v47 = vmov 0.0   ;;  %v946_v48 = vlaneseq  ;;  %s6838_s20 = scalar_lea.vmem %s6770_s7, %s5882_s16  ;;  %s6839_s18 = scalar_lea.vmem %s6771_s8, %s5882_s16 }
 0x19d   : > { %1121 = vmatprep.mubr.bf16.mxu0 %v5543_v26  ;;  %1089 = vmatprep.subr.bf16.mxu0 %v5046_v24  ;;  %v5049_v27 = vld [vmem:[%s5874_s23 + $0x94] ss:$12 sps:$4 sm:$0xff]   ;;  %v5051_v28 = vld [vmem:[%s5874_s23 + $0x90] ss:$12 sps:$4 sm:$0xff]   ;;  %v5054_v30 = vld [vmem:[%s5874_s23 + $0x78] ss:$12 sps:$4 sm:$0xff]   ;;  %s6840_s28 = scalar_lea.vmem %s6772_s9, %s5882_s16 }
 0x19e   : > { %1090 = vmatpush1.bf16.msra.mxu0 %v5048_v25  ;;  %v5052_v29 = vld [vmem:[%s5874_s23 + $0x7c] ss:$12 sps:$4 sm:$0xff]   ;;  %v5055_v31 = vld [vmem:[%s5874_s23 + $0x64] ss:$12 sps:$4 sm:$0xff]   ;;  %v5057_v33 = vld [vmem:[%s5874_s23 + $0x60] ss:$12 sps:$4 sm:$0xff]  }
 0x19f   : > { %1091 = vmatprep.subr.bf16.mxu0 %v5049_v27  ;;  %v906_v32 = vld [vmem:[#allocation2 + $0x10] sm:$0xff]  ;;  %v5060_v37 = vld [vmem:[%s5874_s23 + $0x48] ss:$12 sps:$4 sm:$0xff]   ;;  %v5066_v41 = vld [vmem:[%s5874_s23 + $0x18] ss:$12 sps:$4 sm:$0xff]   ;;  %vm5545_vm3 = vmmov 0  }
 0x1a0   : > { %v5058_v35 = vld [vmem:[%s5874_s23 + $0x4c] ss:$12 sps:$4 sm:$0xff]   ;;  %v5061_v38 = vld [vmem:[%s5874_s23 + $0x34] ss:$12 sps:$4 sm:$0xff]   ;;  %v5063_v39 = vld [vmem:[%s5874_s23 + $0x30] ss:$12 sps:$4 sm:$0xff]  }
 0x1a1   : > { %v5064_v40 = vld [vmem:[%s5874_s23 + $0x1c] ss:$12 sps:$4 sm:$0xff]   ;;  %v5067_v42 = vld [vmem:[%s5874_s23 + $0x4] ss:$12 sps:$4 sm:$0xff]   ;;  %v5069_v43 = vld [vmem:[%s5874_s23] ss:$12 sps:$4 sm:$0xff]  }
 0x1a2   : > { %1092 = vmatpush1.bf16.msra.mxu0 %v5051_v28  ;;  %v907_v34 = vld [vmem:[#allocation2] sm:$0xff]  ;;  %v908_v44 = vld [vmem:[#allocation2 + $0x18] sm:$0xff]  ;;  %v909_v45 = vld [vmem:[#allocation2 + $0x8] sm:$0xff]  ;;  %v6002_v49 = vshrl.u32 %v946_v48, 7  ;;  %vm1201_vm4 = vcmask 130048   ;;  %s5548_s21 = smov 80  }
 0x1a3   : > { %1093 = vmatprep.subr.bf16.mxu0 %v5052_v29  ;;  %v910_v36 = vpack.c.bf16 %v907_v34, %v906_v32  ;;  %v5996_v46 = vpack.c.bf16 %v909_v45, %v908_v44  ;;  %v6006_v52 = vld [vmem:[%s5900_s14] sm:$0x7]  ;;  %v5071_v14 = vld [vmem:[%s5874_s23 + $0x98] ss:$12 sps:$4 sm:$0xff]   ;;  %v5072_v15 = vld [vmem:[%s5874_s23 + $0x80] ss:$12 sps:$4 sm:$0xff]  }
 0x1a4   : > { %v952_v50 = vsub.s32 1, %v6002_v49  ;;  %v6012_v57 = vsub.s32 0, %v6002_v49  ;;  %v5070_v13 = vld [vmem:[%s5874_s23 + $0xb0] ss:$12 sps:$4 sm:$0xff]   ;;  %v5073_v16 = vld [vmem:[%s5874_s23 + $0x68] ss:$12 sps:$4 sm:$0xff]  }
 0x1a5   : > { %4656 = vmatprep.mubr.bf16.mxu1 %v910_v36  ;;  %4640 = vmatprep.subr.bf16.mxu1 %v5070_v13  ;;  %v5074_v17 = vld [vmem:[%s5874_s23 + $0x50] ss:$12 sps:$4 sm:$0xff]   ;;  %v5075_v18 = vld [vmem:[%s5874_s23 + $0x38] ss:$12 sps:$4 sm:$0xff]   ;;  %v5076_v19 = vld [vmem:[%s5874_s23 + $0x20] ss:$12 sps:$4 sm:$0xff]  }
 0x1a6   : > { %1094 = vmatpush1.bf16.msra.mxu0 %v5054_v30  ;;  %v953_v54 = vrot.slane %v6006_v52, %v952_v50  ;;  %v949_v63 = vrot.slane %v6006_v52, %v6012_v57  ;;  %4641 = vmatpush3.bf16.msra.mxu1 %v5070_v13  ;;  %v5077_v20 = vld [vmem:[%s5874_s23 + $0x8] ss:$12 sps:$4 sm:$0xff]   ;;  %v1197_v21 = vld [vmem:[#allocation3] sm:$0xff]  ;;  %s5546_s23 = smov 112   ;;  %s5547_s14 = smov 96   ;;  %vm3313_vm5 = vcmask 261120  }
 0x1a7   : > { %1095 = vmatprep.subr.bf16.mxu0 %v5055_v31  ;;  %4642 = vmatprep.subr.bf16.mxu1 %v5071_v14  ;;  %v1198_v25 = vld [vmem:[#allocation3 + $0x8] sm:$0xff]  ;;  %v1199_v31 = vld [vmem:[#allocation3 + $0x10] sm:$0xff]  ;;  %s5549_s3 = smov 64   ;;  %s5550_s19 = smov 48   ;;  %vm3318_vm6 = vcmask 392192   ;;  %vm3323_vm7 = vcmask 523264  }
 0x1a8   : > { %s5551_s0 = smov 32   ;;  %s5552_s29 = smov 16   ;;  %vm3328_vm8 = vcmask 654336   ;;  %vm3333_vm9 = vcmask 785408   ;;  %vm3338_vm10 = vcmask 916480  }
 0x1a9   : > { %p4511_p11 = scmp.ne.s32.totalorder %s5658_s25, 2 }
 0x1aa   : > { %1096 = vmatpush1.bf16.msra.mxu0 %v5057_v33  ;;  %4643 = vmatpush3.bf16.msra.mxu1 %v5071_v14 }
 0x1ab   : > { %1097 = vmatprep.subr.bf16.mxu0 %v5058_v35  ;;  %4644 = vmatprep.subr.bf16.mxu1 %v5072_v15 }
 0x1ae   : > { %1098 = vmatpush1.bf16.msra.mxu0 %v5060_v37  ;;  %4645 = vmatpush3.bf16.msra.mxu1 %v5072_v15 }
 0x1af   : > { %1099 = vmatprep.subr.bf16.mxu0 %v5061_v38  ;;  %4646 = vmatprep.subr.bf16.mxu1 %v5073_v16 }
 0x1b2   : > { %1100 = vmatpush1.bf16.msra.mxu0 %v5063_v39  ;;  %4647 = vmatpush3.bf16.msra.mxu1 %v5073_v16 }
 0x1b3   : > { %1101 = vmatprep.subr.bf16.mxu0 %v5064_v40  ;;  %4648 = vmatprep.subr.bf16.mxu1 %v5074_v17 }
 0x1b6   : > { %1102 = vmatpush1.bf16.msra.mxu0 %v5066_v41  ;;  %4649 = vmatpush3.bf16.msra.mxu1 %v5074_v17 }
 0x1b7   : > { %1103 = vmatprep.subr.bf16.mxu0 %v5067_v42  ;;  %4650 = vmatprep.subr.bf16.mxu1 %v5075_v18 }
 0x1ba   : > { %1104 = vmatpush1.bf16.msra.mxu0 %v5069_v43  ;;  %4651 = vmatpush3.bf16.msra.mxu1 %v5075_v18 }
 0x1bb   : > { %4660 = vmatprep.subr.bf16.mxu0 %v5544_v47  ;;  %4652 = vmatprep.subr.bf16.mxu1 %v5076_v19 }
 0x1bd   : > { %1122 = vmatmul.mubr.bf16.vlgmr.msra.gmra.mxu0 %v910_v36  ;;  %v1200_v36 = vld [vmem:[#allocation3 + $0x18] sm:$0xff] }
 0x1be   : > { %1131 = vmatprep.mubr.bf16.mxu0 %v5543_v26  ;;  %4653 = vmatpush3.bf16.msra.mxu1 %v5076_v19 }
 0x1bf   : > { %4654 = vmatprep.subr.bf16.mxu1 %v5077_v20 }
 0x1c2   : > { %4655 = vmatpush3.bf16.msra.mxu1 %v5077_v20 }
 0x1c3   : > { %4672 = vmatprep.subr.bf16.mxu1 %v5544_v47 }
 0x1c5   : > { %1132 = vmatmul.mubr.bf16.gmra.mxu0 %v5996_v46  ;;  %4657 = vmatmul.mubr.bf16.vlgmr.msra.gmra.mxu1 %v5996_v46 }
 0x1c6   : > { %4662 = vmatprep.mubr.msk.bf16.mxu0 %vm5545_vm3, %v5544_v47  ;;  %4674 = vmatprep.mubr.msk.bf16.mxu1 %vm5545_vm3, %v5544_v47 }
 0x27d   : > { %v1123_v51 = vpop.f32.mrf.mxu0 }
 0x27e   : > { %v1124_v5 = vadd.f32 %v1123_v51, %v949_v63 }
 0x27f   : > { %v1125_v53 = vpop.f32.mrf.mxu0 }
 0x280   : > { %v1126_v58 = vadd.f32 %v1125_v53, %v953_v54 }
 0x281   : > { %v1127_v55 = vpop.f32.mrf.mxu0 }
 0x282   : > { %v1128_v2 = vadd.f32 %v1127_v55, %v949_v63 }
 0x283   : > { %v1129_v56 = vpop.f32.mrf.mxu0 }
 0x284   : > { %v1130_v59 = vadd.f32 %v1129_v56, %v953_v54  ;;  %v6021_v7 = vpack.c.bf16 %v1128_v2, %v1124_v5 }
 0x285   : > { %v1133_v60 = vpop.f32.mrf.mxu0 }
 0x286   : > { %v6014_v61 = vpack.c.bf16 %v1130_v59, %v1126_v58  ;;  %v1134_v9 = vadd.f32 %v1133_v60, %v949_v63 }
 0x287   : > { %v1135_v62 = vpop.f32.mrf.mxu0 }
 0x288   : > { %v1206_v0 = vsel %vm1201_vm4, %v6014_v61, 0  ;;  %v1136_v3 = vadd.f32 %v1135_v62, %v953_v54 }
 0x289   : > { %v1137_v1 = vpop.f32.mrf.mxu0  ;;  %4661 = vmatpush3.bf16.xpose.msra.mxu0 %v1206_v0  ;;  %v4658_v0 = vpop.f32.mrf.mxu1 }
 0x28a   : > { %4666 = vmatprep.subr.bf16.mxu0 %v5544_v47  ;;  %v1138_v10 = vadd.f32 %v1137_v1, %v949_v63  ;;  %v956_v63 = vsub.s32 2, %v6002_v49 }
 0x28b   : > { %v1139_v4 = vpop.f32.mrf.mxu0  ;;  %v1176_v2 = vpop.f32.mrf.mxu1 }
 0x28c   : > { %v1140_v6 = vadd.f32 %v1139_v4, %v953_v54  ;;  %v6032_v12 = vpack.c.bf16 %v1138_v10, %v1134_v9  ;;  %v957_v1 = vrot.slane %v6006_v52, %v956_v63  ;;  %v1437_v63 = vld [vmem:[#allocation3 + $0x30] sm:$0xff] }
 0x28d   : > { %v4659_v4 = vpop.f32.mrf.mxu1 }
 0x28e   : > { %v6023_v8 = vpack.c.bf16 %v1140_v6, %v1136_v3  ;;  %v1185_v3 = vadd.f32 %v4658_v0, %v957_v1  ;;  %v1177_v5 = vadd.f32 %v1176_v2, %v957_v1  ;;  %v1188_v6 = vadd.f32 %v4659_v4, %v957_v1 }
 0x28f   : > { %v1179_v9 = vpop.f32.mrf.mxu1 }
 0x290   : > { %4663 = vmatmul.mubr.msk.bf16.vlgmr.msra.gmra.mxu0 %vm1201_vm4, %v6021_v7  ;;  %v1253_v11 = vsel %vm1201_vm4, %v6023_v8, 0  ;;  %v6065_v10 = vpack.c.bf16 %v1188_v6, %v1185_v3  ;;  %v1438_v3 = vld [vmem:[#allocation3 + $0x38] sm:$0xff] }
 0x291   : > { %4667 = vmatpush3.bf16.xpose.msra.mxu0 %v1253_v11  ;;  %4668 = vmatprep.mubr.msk.bf16.mxu0 %vm5545_vm3, %v5544_v47  ;;  %v1180_v11 = vadd.f32 %v1179_v9, %v957_v1 }
 0x292   : > { %4678 = vmatprep.subr.bf16.mxu0 %v5544_v47 }
 0x293   : > { %v6067_v13 = vpack.c.bf16 %v1180_v11, %v1177_v5 }
 0x295   : > { %4673 = vmatpush3.bf16.msra.mxu1 %v6067_v13 }
 0x296   : > { %4684 = vmatprep.subr.bf16.mxu1 %v5544_v47 }
 0x298   : > { %4669 = vmatmul.mubr.msk.bf16.vlgmr.msra.gmra.mxu0 %vm1201_vm4, %v6032_v12 }
 0x299   : > { %4680 = vmatprep.mubr.msk.bf16.mxu0 %vm5545_vm3, %v5544_v47  ;;  %4679 = vmatpush3.bf16.msra.mxu0 %v6065_v10 }
 0x29a   : > { %4690 = vmatprep.subr.bf16.mxu0 %v5544_v47 }
 0x350   : > { %v1242_v22 = vpop.f32.mrf.mxu0 }
 0x351   : > { %v1243_v23 = vadd.f32 %v1242_v22, %v1197_v21 }
 0x352   : > { %v4664_v24 = vpop.f32.mrf.mxu0 }
 0x353   : > { %1296 = vst.msk [vmem:[#allocation3] sm:$0xff] %vm1201_vm4, %v1243_v23  ;;  %v1300_v27 = vsel %vm1201_vm4, %v1243_v23, -inf }
 0x354   : > { %1301 = vmax.xlane.f32.xlu0 %v1300_v27  ;;  %v1245_v28 = vpop.f32.mrf.mxu0 }
 0x355   : > { %v1246_v29 = vadd.f32 %v1245_v28, %v1198_v25 }
 0x356   : > { %v4665_v30 = vpop.f32.mrf.mxu0 }
 0x357   : > { %1297 = vst.msk [vmem:[#allocation3 + $0x8] sm:$0xff] %vm1201_vm4, %v1246_v29  ;;  %v1303_v32 = vsel %vm1201_vm4, %v1246_v29, -inf }
 0x358   : > { %1304 = vmax.xlane.f32.xlu0 %v1303_v32  ;;  %v1289_v33 = vpop.f32.mrf.mxu0 }
 0x359   : > { %v1290_v34 = vadd.f32 %v1289_v33, %v1199_v31 }
 0x35a   : > { %v4670_v35 = vpop.f32.mrf.mxu0 }
 0x35b   : > { %1298 = vst.msk [vmem:[#allocation3 + $0x10] sm:$0xff] %vm1201_vm4, %v1290_v34  ;;  %v1306_v37 = vsel %vm1201_vm4, %v1290_v34, -inf }
 0x35c   : > { %1307 = vmax.xlane.f32.xlu1 %v1306_v37  ;;  %v1292_v38 = vpop.f32.mrf.mxu0 }
 0x35d   : > { %v1293_v39 = vadd.f32 %v1292_v38, %v1200_v36 }
 0x35e   : > { %v4671_v40 = vpop.f32.mrf.mxu0 }
 0x35f   : > { %1299 = vst.msk [vmem:[#allocation3 + $0x18] sm:$0xff] %vm1201_vm4, %v1293_v39  ;;  %v1309_v41 = vsel %vm1201_vm4, %v1293_v39, -inf }
 0x360   : > { %1310 = vmax.xlane.f32.xlu1 %v1309_v41 }
 0x3dd   : > { %v1302_v42 = vpop.xlane.xlu0 %1301 }
 0x3de   : > { %v1312_v43 = vsub.f32 %v1243_v23, %v1302_v42 }
 0x3e0   : > { %v1316_v44 = vmul.f32 1.442695, %v1312_v43  ;;  %v1435_v43 = vld [vmem:[#allocation3 + $0x20] sm:$0xff] }
 0x3e1   : > { %v1305_v45 = vpop.xlane.xlu0 %1304 }
 0x3e2   : > { %5126 = vpow2.f32 %v1316_v44  ;;  %v1313_v46 = vsub.f32 %v1246_v29, %v1305_v45 }
 0x3e4   : > { %v1318_v48 = vmul.f32 1.442695, %v1313_v46 }
 0x3e5   : > { %v1308_v51 = vpop.xlane.xlu1 %1307 }
 0x3e6   : > { %5128 = vpow2.f32 %v1318_v48  ;;  %v1314_v53 = vsub.f32 %v1290_v34, %v1308_v51  ;;  %v1436_v48 = vld [vmem:[#allocation3 + $0x28] sm:$0xff] }
 0x3e8   : > { %v1320_v54 = vmul.f32 1.442695, %v1314_v53 }
 0x3e9   : > { %v1311_v52 = vpop.xlane.xlu1 %1310 }
 0x3ea   : > { %5130 = vpow2.f32 %v1320_v54  ;;  %v1315_v14 = vsub.f32 %v1293_v39, %v1311_v52 }
 0x3ec   : > { %v1322_v15 = vmul.f32 1.442695, %v1315_v14 }
 0x3ee   : > { %5132 = vpow2.f32 %v1322_v15 }
 0x3ef   : > { %v5127_v55 = vpop.eup %5126 }
 0x3f0   : > { %v1324_v56 = vsel %vm1201_vm4, %v5127_v55, 0.0 }
 0x3f1   : > { %1325 = vadd.xlane.f32.xlu0 %v1324_v56 }
 0x3f3   : > { %v5129_v58 = vpop.eup %5128 }
 0x3f4   : > { %v1327_v59 = vsel %vm1201_vm4, %v5129_v58, 0.0 }
 0x3f5   : > { %1328 = vadd.xlane.f32.xlu1 %v1327_v59 }
 0x3f7   : > { %v5131_v60 = vpop.eup %5130 }
 0x3f8   : > { %v1330_v62 = vsel %vm1201_vm4, %v5131_v60, 0.0 }
 0x3f9   : > { %1331 = vadd.xlane.f32.xlu0 %v1330_v62 }
 0x3fb   : > { %v5133_v16 = vpop.eup %5132 }
 0x3fc   : > { %v1333_v17 = vsel %vm1201_vm4, %v5133_v16, 0.0 }
 0x406   : > { %1496 = vrot.lane.b32.xlu1 %v6023_v8, %s5546_s23 }
 0x40f   : > { %1443 = vrot.lane.b32.xlu0 %v6014_v61, %s5546_s23 }
 0x42a   : > { %1334 = vadd.xlane.f32.xlu1 %v1333_v17 }
 0x43b   : > { %1440 = vrot.lane.b32.xlu1 %v6021_v7, %s5546_s23 }
 0x43f   : > { %1493 = vrot.lane.b32.xlu1 %v6032_v12, %s5546_s23 }
 0x47a   : > { %v1326_v18 = vpop.xlane.xlu0 %1325 }
 0x47b   : > { %5134 = vrcp.f32 %v1326_v18 }
 0x47e   : > { %v1329_v19 = vpop.xlane.xlu1 %1328 }
 0x47f   : > { %5136 = vrcp.f32 %v1329_v19 }
 0x482   : > { %v1332_v20 = vpop.xlane.xlu0 %1331  ;;  %v1497_v29 = vpop.permute.xlu1 %1496 }
 0x483   : > { %5138 = vrcp.f32 %v1332_v20  ;;  %v1502_v37 = vsel %vm1201_vm4, %v1497_v29, 0 }
 0x486   : > { %v1444_v25 = vpop.permute.xlu0 %1443 }
 0x487   : > { %v1449_v28 = vsel %vm1201_vm4, %v1444_v25, 0 }
 0x488   : > { %v5135_v21 = vpop.eup %5134 }
 0x489   : > { %v1337_v23 = vmul.f32 %v5135_v21, %v5127_v55 }
 0x48c   : > { %v5137_v22 = vpop.eup %5136 }
 0x48d   : > { %v1339_v24 = vmul.f32 %v5137_v22, %v5129_v58 }
 0x48f   : > { %v1344_v27 = vpack.c.bf16 %v1339_v24, %v1337_v23 }
 0x490   : > { %v5139_v32 = vpop.eup %5138 }
 0x491   : > { %4675 = vmatmul.mubr.msk.bf16.vlgmr.msra.gmra.mxu1 %vm1201_vm4, %v1344_v27  ;;  %v1341_v34 = vmul.f32 %v5139_v32, %v5131_v60 }
 0x492   : > { %4685 = vmatpush3.bf16.xpose.msra.mxu1 %v1449_v28  ;;  %4686 = vmatprep.mubr.msk.bf16.mxu1 %vm5545_vm3, %v5544_v47 }
 0x493   : > { %4696 = vmatprep.subr.bf16.mxu1 %v5544_v47 }
 0x4b3   : > { %v1335_v30 = vpop.xlane.xlu1 %1334 }
 0x4b4   : > { %5140 = vrcp.f32 %v1335_v30 }
 0x4b7   : > { %v1441_v31 = vpop.permute.xlu1 %1440 }
 0x4b8   : > { %4687 = vmatmul.mubr.msk.bf16.vlgmr.msra.gmra.mxu1 %vm1201_vm4, %v1441_v31 }
 0x4b9   : > { %4698 = vmatprep.mubr.msk.bf16.mxu1 %vm5545_vm3, %v5544_v47 }
 0x4bb   : > { %v1494_v38 = vpop.permute.xlu1 %1493 }
 0x4c1   : > { %v5141_v33 = vpop.eup %5140 }
 0x4c2   : > { %v1343_v35 = vmul.f32 %v5141_v33, %v5133_v16 }
 0x4c4   : > { %v1345_v36 = vpack.c.bf16 %v1343_v35, %v1341_v34 }
 0x4c6   : > { %4681 = vmatmul.mubr.msk.bf16.vlgmr.msra.gmra.mxu0 %vm1201_vm4, %v1345_v36 }
 0x4c7   : > { %4691 = vmatpush3.bf16.xpose.msra.mxu0 %v1502_v37  ;;  %4692 = vmatprep.mubr.msk.bf16.mxu0 %vm5545_vm3, %v5544_v47 }
 0x4c8   : > { %4702 = vmatprep.subr.bf16.mxu0 %v5544_v47 }
 0x4ce   : > { %4693 = vmatmul.mubr.msk.bf16.vlgmr.msra.gmra.mxu0 %vm1201_vm4, %v1494_v38 }
 0x4cf   : > { %4704 = vmatprep.mubr.msk.bf16.mxu0 %vm5545_vm3, %v5544_v47 }
 0x551   : > { %v6096_v39 = vpop.f32.mrf.mxu1 }
 0x553   : > { %v4676_v40 = vpop.f32.mrf.mxu1 }
 0x555   : > { %v6098_v41 = vpop.f32.mrf.mxu1 }
 0x557   : > { %v4677_v42 = vpop.f32.mrf.mxu1 }
 0x578   : > { %v1485_v44 = vpop.f32.mrf.mxu1 }
 0x579   : > { %v1486_v45 = vadd.f32 %v1485_v44, %v1435_v43 }
 0x57a   : > { %v4688_v46 = vpop.f32.mrf.mxu1 }
 0x57b   : > { %1545 = vst.msk [vmem:[#allocation3 + $0x20] sm:$0xff] %vm1201_vm4, %v1486_v45  ;;  %v1549_v51 = vsel %vm1201_vm4, %v1486_v45, -inf }
 0x57c   : > { %1550 = vmax.xlane.f32.xlu0 %v1549_v51  ;;  %v1488_v53 = vpop.f32.mrf.mxu1 }
 0x57d   : > { %v1489_v54 = vadd.f32 %v1488_v53, %v1436_v48 }
 0x57e   : > { %v4689_v55 = vpop.f32.mrf.mxu1 }
 0x57f   : > { %1546 = vst.msk [vmem:[#allocation3 + $0x28] sm:$0xff] %vm1201_vm4, %v1489_v54  ;;  %v1552_v56 = vsel %vm1201_vm4, %v1489_v54, -inf }
 0x580   : > { %1553 = vmax.xlane.f32.xlu1 %v1552_v56 }
 0x586   : > { %v6104_v58 = vpop.f32.mrf.mxu0 }
 0x588   : > { %v4682_v59 = vpop.f32.mrf.mxu0 }
 0x58a   : > { %v6106_v60 = vpop.f32.mrf.mxu0 }
 0x58c   : > { %v4683_v62 = vpop.f32.mrf.mxu0 }
 0x58e   : > { %v1538_v0 = vpop.f32.mrf.mxu0 }
 0x58f   : > { %v1539_v1 = vadd.f32 %v1538_v0, %v1437_v63 }
 0x590   : > { %v4694_v2 = vpop.f32.mrf.mxu0 }
 0x591   : > { %1547 = vst.msk [vmem:[#allocation3 + $0x30] sm:$0xff] %vm1201_vm4, %v1539_v1  ;;  %v1555_v4 = vsel %vm1201_vm4, %v1539_v1, -inf }
 0x592   : > { %1556 = vmax.xlane.f32.xlu0 %v1555_v4  ;;  %v1541_v5 = vpop.f32.mrf.mxu0 }
 0x593   : > { %v1542_v6 = vadd.f32 %v1541_v5, %v1438_v3 }
 0x594   : > { %v4695_v9 = vpop.f32.mrf.mxu0 }
 0x595   : > { %1548 = vst.msk [vmem:[#allocation3 + $0x38] sm:$0xff] %vm1201_vm4, %v1542_v6  ;;  %v1558_v11 = vsel %vm1201_vm4, %v1542_v6, -inf  ;;  %v1692_v9 = vld [vmem:[#allocation3 + $0x40] sm:$0xff] }
 0x596   : > { %1559 = vmax.xlane.f32.xlu0 %v1558_v11 }
 0x605   : > { %v1551_v52 = vpop.xlane.xlu0 %1550 }
 0x606   : > { %v1561_v14 = vsub.f32 %v1486_v45, %v1551_v52 }
 0x608   : > { %v1565_v15 = vmul.f32 1.442695, %v1561_v14 }
 0x609   : > { %v1554_v16 = vpop.xlane.xlu1 %1553 }
 0x60a   : > { %5142 = vpow2.f32 %v1565_v15  ;;  %v1562_v17 = vsub.f32 %v1489_v54, %v1554_v16  ;;  %v1693_v15 = vld [vmem:[#allocation3 + $0x48] sm:$0xff] }
 0x60c   : > { %v1567_v18 = vmul.f32 1.442695, %v1562_v17 }
 0x60e   : > { %5144 = vpow2.f32 %v1567_v18 }
 0x617   : > { %v5143_v19 = vpop.eup %5142 }
 0x618   : > { %v1573_v20 = vsel %vm1201_vm4, %v5143_v19, 0.0 }
 0x619   : > { %1574 = vadd.xlane.f32.xlu0 %v1573_v20 }
 0x61b   : > { %v5145_v21 = vpop.eup %5144  ;;  %v1557_v22 = vpop.xlane.xlu0 %1556 }
 0x61c   : > { %v1563_v23 = vsub.f32 %v1539_v1, %v1557_v22  ;;  %v1576_v24 = vsel %vm1201_vm4, %v5145_v21, 0.0 }
 0x61d   : > { %1577 = vadd.xlane.f32.xlu1 %v1576_v24 }
 0x61e   : > { %v1569_v25 = vmul.f32 1.442695, %v1563_v23 }
 0x61f   : > { %v1560_v29 = vpop.xlane.xlu0 %1559 }
 0x620   : > { %5146 = vpow2.f32 %v1569_v25  ;;  %v1564_v30 = vsub.f32 %v1542_v6, %v1560_v29 }
 0x622   : > { %v1571_v31 = vmul.f32 1.442695, %v1564_v30 }
 0x624   : > { %5148 = vpow2.f32 %v1571_v31  ;;  %v1695_v31 = vld [vmem:[#allocation3 + $0x58] sm:$0xff] }
 0x62d   : > { %v5147_v27 = vpop.eup %5146 }
 0x62e   : > { %1644 = vrot.lane.b32.xlu1 %v6065_v10, %s5546_s23  ;;  %v1579_v28 = vsel %vm1201_vm4, %v5147_v27, 0.0 }
 0x62f   : > { %1580 = vadd.xlane.f32.xlu0 %v1579_v28 }
 0x631   : > { %v5149_v32 = vpop.eup %5148 }
 0x632   : > { %1698 = vrot.lane.b32.xlu1 %v6014_v61, %s5547_s14  ;;  %v1582_v33 = vsel %vm1201_vm4, %v5149_v32, 0.0 }
 0x645   : > { %1596 = vrot.lane.b32.xlu0 %v6067_v13, %s5546_s23 }
 0x649   : > { %1696 = vrot.lane.b32.xlu0 %v6021_v7, %s5547_s14 }
 0x656   : > { %1583 = vadd.xlane.f32.xlu1 %v1582_v33 }
 0x667   : > { %1749 = vrot.lane.b32.xlu1 %v6023_v8, %s5547_s14 }
 0x66b   : > { %1747 = vrot.lane.b32.xlu1 %v6032_v12, %s5547_s14 }
 0x6a2   : > { %v1575_v35 = vpop.xlane.xlu0 %1574 }
 0x6a6   : > { %v1578_v34 = vpop.xlane.xlu1 %1577 }
 0x6a7   : > { %5150 = vrcp.f32 %v1578_v34 }
 0x6a8   : > { %5152 = vrcp.f32 %v1575_v35 }
 0x6aa   : > { %v1645_v36 = vpop.permute.xlu1 %1644 }
 0x6ab   : > { %4703 = vmatpush3.bf16.msra.mxu0 %v1645_v36 }
 0x6ac   : > { %4714 = vmatprep.subr.bf16.mxu0 %v5544_v47 }
 0x6ae   : > { %v1699_v45 = vpop.permute.xlu1 %1698 }
 0x6af   : > { %v1704_v48 = vsel %vm1201_vm4, %v1699_v45, 0 }
 0x6b4   : > { %v5151_v37 = vpop.eup %5150 }
 0x6b5   : > { %v5153_v40 = vpop.eup %5152  ;;  %v1588_v42 = vmul.f32 %v5151_v37, %v5145_v21 }
 0x6b6   : > { %v1586_v44 = vmul.f32 %v5153_v40, %v5143_v19 }
 0x6b8   : > { %v1581_v38 = vpop.xlane.xlu0 %1580  ;;  %v1593_v46 = vpack.c.bf16 %v1588_v42, %v1586_v44 }
 0x6b9   : > { %5154 = vrcp.f32 %v1581_v38 }
 0x6bc   : > { %v1597_v43 = vpop.permute.xlu0 %1596 }
 0x6bd   : > { %4697 = vmatpush3.bf16.msra.mxu1 %v1597_v43 }
 0x6be   : > { %4708 = vmatprep.subr.bf16.mxu1 %v5544_v47 }
 0x6c0   : > { %4699 = vmatmul.mubr.msk.bf16.vlgmr.msra.gmra.mxu1 %vm1201_vm4, %v1593_v46  ;;  %v1697_v51 = vpop.permute.xlu0 %1696 }
 0x6c1   : > { %4709 = vmatpush3.bf16.xpose.msra.mxu1 %v1704_v48  ;;  %4710 = vmatprep.mubr.msk.bf16.mxu1 %vm5545_vm3, %v5544_v47 }
 0x6c2   : > { %4720 = vmatprep.subr.bf16.mxu1 %v5544_v47 }
 0x6c6   : > { %v5155_v54 = vpop.eup %5154 }
 0x6c7   : > { %v1590_v56 = vmul.f32 %v5155_v54, %v5147_v27  ;;  %v1694_v27 = vld [vmem:[#allocation3 + $0x50] sm:$0xff] }
 0x6c8   : > { %4711 = vmatmul.mubr.msk.bf16.vlgmr.msra.gmra.mxu1 %vm1201_vm4, %v1697_v51 }
 0x6c9   : > { %4722 = vmatprep.mubr.msk.bf16.mxu1 %vm5545_vm3, %v5544_v47 }
 0x6df   : > { %v1584_v53 = vpop.xlane.xlu1 %1583 }
 0x6e0   : > { %5156 = vrcp.f32 %v1584_v53 }
 0x6e3   : > { %v1750_v62 = vpop.permute.xlu1 %1749 }
 0x6e4   : > { %v1755_v0 = vsel %vm1201_vm4, %v1750_v62, 0 }
 0x6e7   : > { %v1748_v1 = vpop.permute.xlu1 %1747 }
 0x6ed   : > { %v5157_v55 = vpop.eup %5156 }
 0x6ee   : > { %v1592_v59 = vmul.f32 %v5157_v55, %v5149_v32 }
 0x6f0   : > { %v1594_v63 = vpack.c.bf16 %v1592_v59, %v1590_v56 }
 0x6f2   : > { %4705 = vmatmul.mubr.msk.bf16.vlgmr.msra.gmra.mxu0 %vm1201_vm4, %v1594_v63 }
 0x6f3   : > { %4715 = vmatpush3.bf16.xpose.msra.mxu0 %v1755_v0  ;;  %4716 = vmatprep.mubr.msk.bf16.mxu0 %vm5545_vm3, %v5544_v47 }
 0x6f4   : > { %4726 = vmatprep.subr.bf16.mxu0 %v5544_v47 }
 0x6fa   : > { %4717 = vmatmul.mubr.msk.bf16.vlgmr.msra.gmra.mxu0 %vm1201_vm4, %v1748_v1 }
 0x6fb   : > { %4728 = vmatprep.mubr.msk.bf16.mxu0 %vm5545_vm3, %v5544_v47 }
 0x780   : > { %v6146_v2 = vpop.f32.mrf.mxu1 }
 0x782   : > { %v4700_v3 = vpop.f32.mrf.mxu1 }
 0x784   : > { %v6148_v4 = vpop.f32.mrf.mxu1 }
 0x785   : > { %v4976_v5 = vpack.i.bf16 %v6148_v4, %v6146_v2 }
 0x786   : > { %v4701_v6 = vpop.f32.mrf.mxu1 }
 0x788   : > { %v1740_v11 = vpop.f32.mrf.mxu1 }
 0x789   : > { %v1741_v52 = vadd.f32 %v1740_v11, %v1692_v9 }
 0x78a   : > { %v4712_v14 = vpop.f32.mrf.mxu1 }
 0x78b   : > { %1798 = vst.msk [vmem:[#allocation3 + $0x40] sm:$0xff] %vm1201_vm4, %v1741_v52  ;;  %v1802_v16 = vsel %vm1201_vm4, %v1741_v52, -inf }
 0x78c   : > { %1803 = vmax.xlane.f32.xlu0 %v1802_v16  ;;  %v1743_v17 = vpop.f32.mrf.mxu1 }
 0x78d   : > { %v1744_v18 = vadd.f32 %v1743_v17, %v1693_v15 }
 0x78e   : > { %v4713_v19 = vpop.f32.mrf.mxu1 }
 0x78f   : > { %1799 = vst.msk [vmem:[#allocation3 + $0x48] sm:$0xff] %vm1201_vm4, %v1744_v18  ;;  %v1805_v20 = vsel %vm1201_vm4, %v1744_v18, -inf }
 0x790   : > { %1806 = vmax.xlane.f32.xlu1 %v1805_v20 }
 0x7b2   : > { %v6156_v21 = vpop.f32.mrf.mxu0 }
 0x7b4   : > { %v4706_v22 = vpop.f32.mrf.mxu0 }
 0x7b6   : > { %v6158_v23 = vpop.f32.mrf.mxu0 }
 0x7b7   : > { %v4981_v24 = vpack.i.bf16 %v6158_v23, %v6156_v21 }
 0x7b8   : > { %v4707_v25 = vpop.f32.mrf.mxu0 }
 0x7ba   : > { %v1791_v28 = vpop.f32.mrf.mxu0 }
 0x7bb   : > { %v1792_v29 = vadd.f32 %v1791_v28, %v1694_v27 }
 0x7bc   : > { %v4718_v30 = vpop.f32.mrf.mxu0 }
 0x7bd   : > { %1800 = vst.msk [vmem:[#allocation3 + $0x50] sm:$0xff] %vm1201_vm4, %v1792_v29  ;;  %v1808_v32 = vsel %vm1201_vm4, %v1792_v29, -inf }
 0x7be   : > { %1809 = vmax.xlane.f32.xlu0 %v1808_v32  ;;  %v1794_v33 = vpop.f32.mrf.mxu0 }
 0x7bf   : > { %v1795_v34 = vadd.f32 %v1794_v33, %v1695_v31 }
 0x7c0   : > { %v4719_v35 = vpop.f32.mrf.mxu0 }
 0x7c1   : > { %1801 = vst.msk [vmem:[#allocation3 + $0x58] sm:$0xff] %vm1201_vm4, %v1795_v34  ;;  %v1811_v36 = vsel %vm1201_vm4, %v1795_v34, -inf }
 0x7c2   : > { %1812 = vmax.xlane.f32.xlu0 %v1811_v36 }
 0x815   : > { %v1804_v37 = vpop.xlane.xlu0 %1803 }
 0x816   : > { %v1814_v38 = vsub.f32 %v1741_v52, %v1804_v37 }
 0x818   : > { %v1818_v40 = vmul.f32 1.442695, %v1814_v38 }
 0x819   : > { %v1807_v42 = vpop.xlane.xlu1 %1806 }
 0x81a   : > { %5158 = vpow2.f32 %v1818_v40  ;;  %v1815_v43 = vsub.f32 %v1744_v18, %v1807_v42 }
 0x81c   : > { %v1820_v44 = vmul.f32 1.442695, %v1815_v43  ;;  %v1943_v43 = vld [vmem:[#allocation3 + $0x60] sm:$0xff] }
 0x81e   : > { %5160 = vpow2.f32 %v1820_v44 }
 0x827   : > { %v5159_v45 = vpop.eup %5158 }
 0x828   : > { %v1826_v46 = vsel %vm1201_vm4, %v5159_v45, 0.0 }
 0x829   : > { %1827 = vadd.xlane.f32.xlu0 %v1826_v46 }
 0x82b   : > { %v5161_v48 = vpop.eup %5160 }
 0x82c   : > { %v1829_v51 = vsel %vm1201_vm4, %v5161_v48, 0.0 }
 0x82d   : > { %1830 = vadd.xlane.f32.xlu1 %v1829_v51 }
 0x83e   : > { %1895 = vrot.lane.b32.xlu1 %v6065_v10, %s5547_s14 }
 0x842   : > { %1949 = vrot.lane.b32.xlu1 %v6014_v61, %s5548_s21 }
 0x847   : > { %v1810_v53 = vpop.xlane.xlu0 %1809 }
 0x848   : > { %v1816_v54 = vsub.f32 %v1792_v29, %v1810_v53 }
 0x84a   : > { %v1822_v55 = vmul.f32 1.442695, %v1816_v54 }
 0x84b   : > { %v1813_v56 = vpop.xlane.xlu0 %1812 }
 0x84c   : > { %5162 = vpow2.f32 %v1822_v55  ;;  %v1817_v59 = vsub.f32 %v1795_v34, %v1813_v56 }
 0x84e   : > { %v1824_v62 = vmul.f32 1.442695, %v1817_v59 }
 0x850   : > { %5164 = vpow2.f32 %v1824_v62 }
 0x859   : > { %v5163_v63 = vpop.eup %5162 }
 0x85a   : > { %v1832_v0 = vsel %vm1201_vm4, %v5163_v63, 0.0 }
 0x85b   : > { %1833 = vadd.xlane.f32.xlu0 %v1832_v0 }
 0x85d   : > { %v5165_v1 = vpop.eup %5164 }
 0x85e   : > { %v1835_v3 = vsel %vm1201_vm4, %v5165_v1, 0.0 }
 0x866   : > { %1836 = vadd.xlane.f32.xlu1 %v1835_v3  ;;  %v1945_v3 = vld [vmem:[#allocation3 + $0x70] sm:$0xff] }
 0x871   : > { %1848 = vrot.lane.b32.xlu0 %v6067_v13, %s5547_s14 }
 0x875   : > { %1947 = vrot.lane.b32.xlu0 %v6021_v7, %s5548_s21 }
 0x877   : > { %2000 = vrot.lane.b32.xlu1 %v6023_v8, %s5548_s21 }
 0x87b   : > { %1998 = vrot.lane.b32.xlu1 %v6032_v12, %s5548_s21 }
 0x8b2   : > { %v1828_v11 = vpop.xlane.xlu0 %1827 }
 0x8b6   : > { %v1831_v6 = vpop.xlane.xlu1 %1830 }
 0x8b7   : > { %5166 = vrcp.f32 %v1831_v6 }
 0x8b8   : > { %5168 = vrcp.f32 %v1828_v11 }
 0x8ba   : > { %v1896_v9 = vpop.permute.xlu1 %1895 }
 0x8bb   : > { %4727 = vmatpush3.bf16.msra.mxu0 %v1896_v9 }
 0x8bc   : > { %4738 = vmatprep.subr.bf16.mxu0 %v5544_v47 }
 0x8be   : > { %v1950_v19 = vpop.permute.xlu1 %1949 }
 0x8bf   : > { %v1955_v22 = vsel %vm1201_vm4, %v1950_v19, 0 }
 0x8c4   : > { %v5167_v52 = vpop.eup %5166 }
 0x8c5   : > { %v5169_v15 = vpop.eup %5168  ;;  %v1841_v16 = vmul.f32 %v5167_v52, %v5161_v48  ;;  %v1944_v48 = vld [vmem:[#allocation3 + $0x68] sm:$0xff]  ;;  %v1946_v52 = vld [vmem:[#allocation3 + $0x78] sm:$0xff] }
 0x8c6   : > { %v1839_v18 = vmul.f32 %v5169_v15, %v5159_v45 }
 0x8c8   : > { %v1846_v20 = vpack.c.bf16 %v1841_v16, %v1839_v18 }
 0x8e4   : > { %v1834_v14 = vpop.xlane.xlu0 %1833 }
 0x8e5   : > { %5170 = vrcp.f32 %v1834_v14 }
 0x8e8   : > { %v1849_v17 = vpop.permute.xlu0 %1848 }
 0x8e9   : > { %4721 = vmatpush3.bf16.msra.mxu1 %v1849_v17 }
 0x8ea   : > { %4732 = vmatprep.subr.bf16.mxu1 %v5544_v47 }
 0x8ec   : > { %4723 = vmatmul.mubr.msk.bf16.vlgmr.msra.gmra.mxu1 %vm1201_vm4, %v1846_v20  ;;  %v1948_v27 = vpop.permute.xlu0 %1947 }
 0x8ed   : > { %4733 = vmatpush3.bf16.xpose.msra.mxu1 %v1955_v22  ;;  %4734 = vmatprep.mubr.msk.bf16.mxu1 %vm5545_vm3, %v5544_v47 }
 0x8ee   : > { %4744 = vmatprep.subr.bf16.mxu1 %v5544_v47 }
 0x8ef   : > { %v1837_v25 = vpop.xlane.xlu1 %1836 }
 0x8f0   : > { %5172 = vrcp.f32 %v1837_v25 }
 0x8f2   : > { %v5171_v28 = vpop.eup %5170 }
 0x8f3   : > { %v1843_v30 = vmul.f32 %v5171_v28, %v5163_v63  ;;  %v2001_v32 = vpop.permute.xlu1 %2000 }
 0x8f4   : > { %4735 = vmatmul.mubr.msk.bf16.vlgmr.msra.gmra.mxu1 %vm1201_vm4, %v1948_v27  ;;  %v2006_v34 = vsel %vm1201_vm4, %v2001_v32, 0 }
 0x8f5   : > { %4746 = vmatprep.mubr.msk.bf16.mxu1 %vm5545_vm3, %v5544_v47 }
 0x8f7   : > { %v1999_v35 = vpop.permute.xlu1 %1998 }
 0x8fd   : > { %v5173_v29 = vpop.eup %5172 }
 0x8fe   : > { %v1845_v31 = vmul.f32 %v5173_v29, %v5165_v1 }
 0x900   : > { %v1847_v33 = vpack.c.bf16 %v1845_v31, %v1843_v30 }
 0x902   : > { %4729 = vmatmul.mubr.msk.bf16.vlgmr.msra.gmra.mxu0 %vm1201_vm4, %v1847_v33 }
 0x903   : > { %4739 = vmatpush3.bf16.xpose.msra.mxu0 %v2006_v34  ;;  %4740 = vmatprep.mubr.msk.bf16.mxu0 %vm5545_vm3, %v5544_v47 }
 0x904   : > { %4750 = vmatprep.subr.bf16.mxu0 %v5544_v47 }
 0x90a   : > { %4741 = vmatmul.mubr.msk.bf16.vlgmr.msra.gmra.mxu0 %vm1201_vm4, %v1999_v35 }
 0x90b   : > { %4752 = vmatprep.mubr.msk.bf16.mxu0 %vm5545_vm3, %v5544_v47 }
 0x9ac   : > { %v6200_v36 = vpop.f32.mrf.mxu1 }
 0x9ae   : > { %v4724_v37 = vpop.f32.mrf.mxu1 }
 0x9b0   : > { %v6202_v38 = vpop.f32.mrf.mxu1 }
 0x9b1   : > { %v4986_v40 = vpack.i.bf16 %v6202_v38, %v6200_v36 }
 0x9b2   : > { %v4725_v42 = vpop.f32.mrf.mxu1 }
 0x9b4   : > { %v1991_v44 = vpop.f32.mrf.mxu1 }
 0x9b5   : > { %v1992_v45 = vadd.f32 %v1991_v44, %v1943_v43 }
 0x9b6   : > { %v4736_v46 = vpop.f32.mrf.mxu1 }
 0x9b7   : > { %2049 = vst.msk [vmem:[#allocation3 + $0x60] sm:$0xff] %vm1201_vm4, %v1992_v45  ;;  %v2053_v51 = vsel %vm1201_vm4, %v1992_v45, -inf }
 0x9b8   : > { %2054 = vmax.xlane.f32.xlu0 %v2053_v51  ;;  %v1994_v53 = vpop.f32.mrf.mxu1 }
 0x9b9   : > { %v1995_v54 = vadd.f32 %v1994_v53, %v1944_v48 }
 0x9ba   : > { %v4737_v55 = vpop.f32.mrf.mxu1 }
 0x9bb   : > { %2050 = vst.msk [vmem:[#allocation3 + $0x68] sm:$0xff] %vm1201_vm4, %v1995_v54  ;;  %v2056_v56 = vsel %vm1201_vm4, %v1995_v54, -inf }
 0x9bc   : > { %2057 = vmax.xlane.f32.xlu1 %v2056_v56 }
 0x9c2   : > { %v6210_v59 = vpop.f32.mrf.mxu0 }
 0x9c4   : > { %v4730_v62 = vpop.f32.mrf.mxu0 }
 0x9c6   : > { %v6212_v63 = vpop.f32.mrf.mxu0 }
 0x9c7   : > { %v4991_v0 = vpack.i.bf16 %v6212_v63, %v6210_v59 }
 0x9c8   : > { %v4731_v1 = vpop.f32.mrf.mxu0 }
 0x9ca   : > { %v2042_v6 = vpop.f32.mrf.mxu0 }
 0x9cb   : > { %v2043_v9 = vadd.f32 %v2042_v6, %v1945_v3 }
 0x9cc   : > { %v4742_v11 = vpop.f32.mrf.mxu0 }
 0x9cd   : > { %2051 = vst.msk [vmem:[#allocation3 + $0x70] sm:$0xff] %vm1201_vm4, %v2043_v9  ;;  %v2059_v14 = vsel %vm1201_vm4, %v2043_v9, -inf }
 0x9ce   : > { %2060 = vmax.xlane.f32.xlu0 %v2059_v14  ;;  %v2045_v15 = vpop.f32.mrf.mxu0 }
 0x9cf   : > { %v2046_v16 = vadd.f32 %v2045_v15, %v1946_v52 }
 0x9d0   : > { %v4743_v17 = vpop.f32.mrf.mxu0 }
 0x9d1   : > { %2052 = vst.msk [vmem:[#allocation3 + $0x78] sm:$0xff] %vm1201_vm4, %v2046_v16  ;;  %v2062_v18 = vsel %vm1201_vm4, %v2046_v16, -inf }
 0x9d2   : > { %2063 = vmax.xlane.f32.xlu0 %v2062_v18 }
 0xa41   : > { %v2055_v19 = vpop.xlane.xlu0 %2054 }
 0xa42   : > { %v2065_v20 = vsub.f32 %v1992_v45, %v2055_v19 }
 0xa44   : > { %v2069_v22 = vmul.f32 1.442695, %v2065_v20 }
 0xa45   : > { %v2058_v25 = vpop.xlane.xlu1 %2057 }
 0xa46   : > { %5174 = vpow2.f32 %v2069_v22  ;;  %v2066_v27 = vsub.f32 %v1995_v54, %v2058_v25 }
 0xa48   : > { %v2071_v28 = vmul.f32 1.442695, %v2066_v27 }
 0xa4a   : > { %5176 = vpow2.f32 %v2071_v28 }
 0xa53   : > { %v5175_v29 = vpop.eup %5174 }
 0xa54   : > { %v2077_v30 = vsel %vm1201_vm4, %v5175_v29, 0.0 }
 0xa55   : > { %2078 = vadd.xlane.f32.xlu0 %v2077_v30 }
 0xa57   : > { %v5177_v31 = vpop.eup %5176  ;;  %v2061_v32 = vpop.xlane.xlu0 %2060 }
 0xa58   : > { %v2067_v33 = vsub.f32 %v2043_v9, %v2061_v32  ;;  %v2080_v34 = vsel %vm1201_vm4, %v5177_v31, 0.0 }
 0xa59   : > { %2081 = vadd.xlane.f32.xlu1 %v2080_v34 }
 0xa5a   : > { %v2073_v35 = vmul.f32 1.442695, %v2067_v33  ;;  %v2194_v33 = vld [vmem:[#allocation3 + $0x80] sm:$0xff] }
 0xa5b   : > { %v2064_v43 = vpop.xlane.xlu0 %2063 }
 0xa5c   : > { %5178 = vpow2.f32 %v2073_v35  ;;  %v2068_v44 = vsub.f32 %v2046_v16, %v2064_v43 }
 0xa5e   : > { %v2075_v45 = vmul.f32 1.442695, %v2068_v44 }
 0xa60   : > { %5180 = vpow2.f32 %v2075_v45 }
 0xa69   : > { %v5179_v37 = vpop.eup %5178 }
 0xa6a   : > { %2146 = vrot.lane.b32.xlu1 %v6065_v10, %s5548_s21  ;;  %v2083_v42 = vsel %vm1201_vm4, %v5179_v37, 0.0 }
 0xa6b   : > { %2084 = vadd.xlane.f32.xlu0 %v2083_v42  ;;  %v2195_v42 = vld [vmem:[#allocation3 + $0x88] sm:$0xff] }
 0xa6d   : > { %v5181_v46 = vpop.eup %5180 }
 0xa6e   : > { %2200 = vrot.lane.b32.xlu1 %v6014_v61, %s5549_s3  ;;  %v2086_v48 = vsel %vm1201_vm4, %v5181_v46, 0.0 }
 0xa81   : > { %2099 = vrot.lane.b32.xlu0 %v6067_v13, %s5548_s21 }
 0xa85   : > { %2198 = vrot.lane.b32.xlu0 %v6021_v7, %s5549_s3 }
 0xa92   : > { %2087 = vadd.xlane.f32.xlu1 %v2086_v48 }
 0xaa3   : > { %2251 = vrot.lane.b32.xlu1 %v6023_v8, %s5549_s3 }
 0xaa7   : > { %2249 = vrot.lane.b32.xlu1 %v6032_v12, %s5549_s3 }
 0xade   : > { %v2079_v53 = vpop.xlane.xlu0 %2078 }
 0xae2   : > { %v2082_v51 = vpop.xlane.xlu1 %2081 }
 0xae3   : > { %5182 = vrcp.f32 %v2082_v51 }
 0xae4   : > { %5184 = vrcp.f32 %v2079_v53 }
 0xae6   : > { %v2147_v54 = vpop.permute.xlu1 %2146 }
 0xae7   : > { %4751 = vmatpush3.bf16.msra.mxu0 %v2147_v54 }
 0xae8   : > { %4762 = vmatprep.subr.bf16.mxu0 %v5544_v47 }
 0xaea   : > { %v2201_v9 = vpop.permute.xlu1 %2200 }
 0xaeb   : > { %v2206_v52 = vsel %vm1201_vm4, %v2201_v9, 0  ;;  %v2197_v9 = vld [vmem:[#allocation3 + $0x98] sm:$0xff] }
 0xaf0   : > { %v5183_v55 = vpop.eup %5182 }
 0xaf1   : > { %v5185_v62 = vpop.eup %5184  ;;  %v2092_v1 = vmul.f32 %v5183_v55, %v5177_v31 }
 0xaf2   : > { %v2090_v6 = vmul.f32 %v5185_v62, %v5175_v29  ;;  %v2196_v62 = vld [vmem:[#allocation3 + $0x90] sm:$0xff] }
 0xaf4   : > { %v2085_v56 = vpop.xlane.xlu0 %2084  ;;  %v2097_v11 = vpack.c.bf16 %v2092_v1, %v2090_v6 }
 0xaf5   : > { %5186 = vrcp.f32 %v2085_v56 }
 0xaf8   : > { %v2100_v3 = vpop.permute.xlu0 %2099 }
 0xaf9   : > { %4745 = vmatpush3.bf16.msra.mxu1 %v2100_v3 }
 0xafa   : > { %4756 = vmatprep.subr.bf16.mxu1 %v5544_v47 }
 0xafc   : > { %4747 = vmatmul.mubr.msk.bf16.vlgmr.msra.gmra.mxu1 %vm1201_vm4, %v2097_v11  ;;  %v2199_v14 = vpop.permute.xlu0 %2198 }
 0xafd   : > { %4757 = vmatpush3.bf16.xpose.msra.mxu1 %v2206_v52  ;;  %4758 = vmatprep.mubr.msk.bf16.mxu1 %vm5545_vm3, %v5544_v47 }
 0xafe   : > { %4768 = vmatprep.subr.bf16.mxu1 %v5544_v47 }
 0xb02   : > { %v5187_v16 = vpop.eup %5186 }
 0xb03   : > { %v2094_v18 = vmul.f32 %v5187_v16, %v5179_v37 }
 0xb04   : > { %4759 = vmatmul.mubr.msk.bf16.vlgmr.msra.gmra.mxu1 %vm1201_vm4, %v2199_v14 }
 0xb05   : > { %4770 = vmatprep.mubr.msk.bf16.mxu1 %vm5545_vm3, %v5544_v47 }
 0xb1b   : > { %v2088_v15 = vpop.xlane.xlu1 %2087 }
 0xb1c   : > { %5188 = vrcp.f32 %v2088_v15 }
 0xb1f   : > { %v2252_v20 = vpop.permute.xlu1 %2251 }
 0xb20   : > { %v2257_v25 = vsel %vm1201_vm4, %v2252_v20, 0 }
 0xb23   : > { %v2250_v27 = vpop.permute.xlu1 %2249 }
 0xb29   : > { %v5189_v17 = vpop.eup %5188 }
 0xb2a   : > { %v2096_v19 = vmul.f32 %v5189_v17, %v5181_v46 }
 0xb2c   : > { %v2098_v22 = vpack.c.bf16 %v2096_v19, %v2094_v18 }
 0xb2e   : > { %4753 = vmatmul.mubr.msk.bf16.vlgmr.msra.gmra.mxu0 %vm1201_vm4, %v2098_v22 }
 0xb2f   : > { %4763 = vmatpush3.bf16.xpose.msra.mxu0 %v2257_v25  ;;  %4764 = vmatprep.mubr.msk.bf16.mxu0 %vm5545_vm3, %v5544_v47 }
 0xb30   : > { %4774 = vmatprep.subr.bf16.mxu0 %v5544_v47 }
 0xb36   : > { %4765 = vmatmul.mubr.msk.bf16.vlgmr.msra.gmra.mxu0 %vm1201_vm4, %v2250_v27 }
 0xb37   : > { %4776 = vmatprep.mubr.msk.bf16.mxu0 %vm5545_vm3, %v5544_v47 }
 0xbbc   : > { %v6254_v28 = vpop.f32.mrf.mxu1 }
 0xbbe   : > { %v4748_v29 = vpop.f32.mrf.mxu1 }
 0xbc0   : > { %v6256_v30 = vpop.f32.mrf.mxu1 }
 0xbc1   : > { %v4996_v31 = vpack.i.bf16 %v6256_v30, %v6254_v28 }
 0xbc2   : > { %v4749_v32 = vpop.f32.mrf.mxu1 }
 0xbc4   : > { %v2242_v34 = vpop.f32.mrf.mxu1 }
 0xbc5   : > { %v2243_v35 = vadd.f32 %v2242_v34, %v2194_v33 }
 0xbc6   : > { %v4760_v37 = vpop.f32.mrf.mxu1 }
 0xbc7   : > { %2300 = vst.msk [vmem:[#allocation3 + $0x80] sm:$0xff] %vm1201_vm4, %v2243_v35  ;;  %v2304_v43 = vsel %vm1201_vm4, %v2243_v35, -inf }
 0xbc8   : > { %2305 = vmax.xlane.f32.xlu0 %v2304_v43  ;;  %v2245_v44 = vpop.f32.mrf.mxu1 }
 0xbc9   : > { %v2246_v45 = vadd.f32 %v2245_v44, %v2195_v42 }
 0xbca   : > { %v4761_v46 = vpop.f32.mrf.mxu1 }
 0xbcb   : > { %2301 = vst.msk [vmem:[#allocation3 + $0x88] sm:$0xff] %vm1201_vm4, %v2246_v45  ;;  %v2307_v48 = vsel %vm1201_vm4, %v2246_v45, -inf }
 0xbcc   : > { %2308 = vmax.xlane.f32.xlu1 %v2307_v48 }
 0xbee   : > { %v6264_v51 = vpop.f32.mrf.mxu0 }
 0xbf0   : > { %v4754_v53 = vpop.f32.mrf.mxu0 }
 0xbf2   : > { %v6266_v54 = vpop.f32.mrf.mxu0 }
 0xbf3   : > { %v5001_v55 = vpack.i.bf16 %v6266_v54, %v6264_v51  ;;  %v5079_v51 = vld [vmem:[%s5920_s24 + $0x30] sm:$0xff]   ;;  %v5080_v54 = vld [vmem:[%s5920_s24 + $0x28] sm:$0xff]  }
 0xbf4   : > { %v4755_v56 = vpop.f32.mrf.mxu0 }
 0xbf6   : > { %v2293_v1 = vpop.f32.mrf.mxu0 }
 0xbf7   : > { %v2294_v3 = vadd.f32 %v2293_v1, %v2196_v62 }
 0xbf8   : > { %v4766_v6 = vpop.f32.mrf.mxu0 }
 0xbf9   : > { %2302 = vst.msk [vmem:[#allocation3 + $0x90] sm:$0xff] %vm1201_vm4, %v2294_v3  ;;  %v2310_v11 = vsel %vm1201_vm4, %v2294_v3, -inf }
 0xbfa   : > { %2311 = vmax.xlane.f32.xlu0 %v2310_v11  ;;  %v2296_v52 = vpop.f32.mrf.mxu0 }
 0xbfb   : > { %v2297_v14 = vadd.f32 %v2296_v52, %v2197_v9 }
 0xbfc   : > { %v4767_v15 = vpop.f32.mrf.mxu0 }
 0xbfd   : > { %2303 = vst.msk [vmem:[#allocation3 + $0x98] sm:$0xff] %vm1201_vm4, %v2297_v14  ;;  %v2313_v16 = vsel %vm1201_vm4, %v2297_v14, -inf }
 0xbfe   : > { %2314 = vmax.xlane.f32.xlu0 %v2313_v16 }
 0xc51   : > { %v2306_v17 = vpop.xlane.xlu0 %2305 }
 0xc52   : > { %v2316_v18 = vsub.f32 %v2243_v35, %v2306_v17 }
 0xc54   : > { %v2320_v19 = vmul.f32 1.442695, %v2316_v18 }
 0xc55   : > { %v2309_v20 = vpop.xlane.xlu1 %2308 }
 0xc56   : > { %5190 = vpow2.f32 %v2320_v19  ;;  %v2317_v22 = vsub.f32 %v2246_v45, %v2309_v20 }
 0xc58   : > { %v2322_v25 = vmul.f32 1.442695, %v2317_v22 }
 0xc5a   : > { %5192 = vpow2.f32 %v2322_v25 }
 0xc63   : > { %v5191_v27 = vpop.eup %5190 }
 0xc64   : > { %v2328_v29 = vsel %vm1201_vm4, %v5191_v27, 0.0 }
 0xc65   : > { %2329 = vadd.xlane.f32.xlu0 %v2328_v29 }
 0xc67   : > { %v5193_v32 = vpop.eup %5192 }
 0xc68   : > { %v2331_v33 = vsel %vm1201_vm4, %v5193_v32, 0.0 }
 0xc69   : > { %2332 = vadd.xlane.f32.xlu1 %v2331_v33 }
 0xc7a   : > { %2397 = vrot.lane.b32.xlu1 %v6065_v10, %s5549_s3 }
 0xc7e   : > { %2451 = vrot.lane.b32.xlu1 %v6014_v61, %s5550_s19 }
 0xc83   : > { %v2312_v34 = vpop.xlane.xlu0 %2311 }
 0xc84   : > { %v2318_v35 = vsub.f32 %v2294_v3, %v2312_v34 }
 0xc86   : > { %v2324_v37 = vmul.f32 1.442695, %v2318_v35 }
 0xc87   : > { %v2315_v42 = vpop.xlane.xlu0 %2314 }
 0xc88   : > { %5194 = vpow2.f32 %v2324_v37  ;;  %v2319_v43 = vsub.f32 %v2297_v14, %v2315_v42 }
 0xc8a   : > { %v2326_v44 = vmul.f32 1.442695, %v2319_v43 }
 0xc8c   : > { %5196 = vpow2.f32 %v2326_v44 }
 0xc95   : > { %v5195_v45 = vpop.eup %5194 }
 0xc96   : > { %v2334_v46 = vsel %vm1201_vm4, %v5195_v45, 0.0 }
 0xc97   : > { %2335 = vadd.xlane.f32.xlu0 %v2334_v46 }
 0xc99   : > { %v5197_v48 = vpop.eup %5196 }
 0xc9a   : > { %v2337_v53 = vsel %vm1201_vm4, %v5197_v48, 0.0 }
 0xca2   : > { %2338 = vadd.xlane.f32.xlu1 %v2337_v53 }
 0xcad   : > { %2350 = vrot.lane.b32.xlu0 %v6067_v13, %s5549_s3 }
 0xcb1   : > { %2449 = vrot.lane.b32.xlu0 %v6021_v7, %s5550_s19 }
 0xcb3   : > { %2502 = vrot.lane.b32.xlu1 %v6023_v8, %s5550_s19 }
 0xcb7   : > { %2500 = vrot.lane.b32.xlu1 %v6032_v12, %s5550_s19 }
 0xcee   : > { %v2330_v1 = vpop.xlane.xlu0 %2329 }
 0xcf2   : > { %v2333_v56 = vpop.xlane.xlu1 %2332 }
 0xcf3   : > { %5198 = vrcp.f32 %v2333_v56  ;;  %v2446_v56 = vld [vmem:[#allocation3 + $0xa8] sm:$0xff] }
 0xcf4   : > { %5200 = vrcp.f32 %v2330_v1 }
 0xcf6   : > { %v2398_v62 = vpop.permute.xlu1 %2397 }
 0xcf7   : > { %4775 = vmatpush3.bf16.msra.mxu0 %v2398_v62 }
 0xcf8   : > { %4786 = vmatprep.subr.bf16.mxu0 %v5544_v47 }
 0xcfa   : > { %v2452_v15 = vpop.permute.xlu1 %2451 }
 0xcfb   : > { %v2457_v17 = vsel %vm1201_vm4, %v2452_v15, 0 }
 0xd00   : > { %v5199_v3 = vpop.eup %5198 }
 0xd01   : > { %v5201_v9 = vpop.eup %5200  ;;  %v2343_v11 = vmul.f32 %v5199_v3, %v5193_v32 }
 0xd02   : > { %v2341_v14 = vmul.f32 %v5201_v9, %v5191_v27 }
 0xd04   : > { %v2348_v16 = vpack.c.bf16 %v2343_v11, %v2341_v14 }
 0xd20   : > { %v2336_v6 = vpop.xlane.xlu0 %2335 }
 0xd21   : > { %5202 = vrcp.f32 %v2336_v6 }
 0xd24   : > { %v2351_v52 = vpop.permute.xlu0 %2350 }
 0xd25   : > { %4769 = vmatpush3.bf16.msra.mxu1 %v2351_v52 }
 0xd26   : > { %4780 = vmatprep.subr.bf16.mxu1 %v5544_v47 }
 0xd28   : > { %4771 = vmatmul.mubr.msk.bf16.vlgmr.msra.gmra.mxu1 %vm1201_vm4, %v2348_v16  ;;  %v2450_v19 = vpop.permute.xlu0 %2449 }
 0xd29   : > { %4781 = vmatpush3.bf16.xpose.msra.mxu1 %v2457_v17  ;;  %4782 = vmatprep.mubr.msk.bf16.mxu1 %vm5545_vm3, %v5544_v47  ;;  %v2447_v17 = vld [vmem:[#allocation3 + $0xb0] sm:$0xff] }
 0xd2a   : > { %4792 = vmatprep.subr.bf16.mxu1 %v5544_v47 }
 0xd2b   : > { %v2339_v18 = vpop.xlane.xlu1 %2338 }
 0xd2c   : > { %5204 = vrcp.f32 %v2339_v18 }
 0xd2e   : > { %v5203_v20 = vpop.eup %5202 }
 0xd2f   : > { %v2345_v25 = vmul.f32 %v5203_v20, %v5195_v45  ;;  %v2503_v29 = vpop.permute.xlu1 %2502  ;;  %v2445_v45 = vld [vmem:[#allocation3 + $0xa0] sm:$0xff] }
 0xd30   : > { %4783 = vmatmul.mubr.msk.bf16.vlgmr.msra.gmra.mxu1 %vm1201_vm4, %v2450_v19  ;;  %v2508_v33 = vsel %vm1201_vm4, %v2503_v29, 0 }
 0xd31   : > { %4794 = vmatprep.mubr.msk.bf16.mxu1 %vm5545_vm3, %v5544_v47 }
 0xd33   : > { %v2501_v34 = vpop.permute.xlu1 %2500 }
 0xd39   : > { %v5205_v22 = vpop.eup %5204 }
 0xd3a   : > { %v2347_v27 = vmul.f32 %v5205_v22, %v5197_v48  ;;  %v2448_v22 = vld [vmem:[#allocation3 + $0xb8] sm:$0xff] }
 0xd3c   : > { %v2349_v32 = vpack.c.bf16 %v2347_v27, %v2345_v25 }
 0xd3e   : > { %4777 = vmatmul.mubr.msk.bf16.vlgmr.msra.gmra.mxu0 %vm1201_vm4, %v2349_v32 }
 0xd3f   : > { %4787 = vmatpush3.bf16.xpose.msra.mxu0 %v2508_v33  ;;  %4788 = vmatprep.mubr.msk.bf16.mxu0 %vm5545_vm3, %v5544_v47 }
 0xd40   : > { %4798 = vmatprep.subr.bf16.mxu0 %v5544_v47 }
 0xd46   : > { %4789 = vmatmul.mubr.msk.bf16.vlgmr.msra.gmra.mxu0 %vm1201_vm4, %v2501_v34 }
 0xd47   : > { %4800 = vmatprep.mubr.msk.bf16.mxu0 %vm5545_vm3, %v5544_v47 }
 0xde8   : > { %v6308_v35 = vpop.f32.mrf.mxu1 }
 0xdea   : > { %v4772_v37 = vpop.f32.mrf.mxu1 }
 0xdec   : > { %v6310_v42 = vpop.f32.mrf.mxu1 }
 0xded   : > { %v5006_v43 = vpack.i.bf16 %v6310_v42, %v6308_v35  ;;  %v5082_v35 = vld [vmem:[%s5920_s24 + $0x18] sm:$0xff]   ;;  %v5083_v42 = vld [vmem:[%s5920_s24 + $0x10] sm:$0xff]  }
 0xdee   : > { %v4773_v44 = vpop.f32.mrf.mxu1 }
 0xdf0   : > { %v2493_v46 = vpop.f32.mrf.mxu1 }
 0xdf1   : > { %v2494_v48 = vadd.f32 %v2493_v46, %v2445_v45 }
 0xdf2   : > { %v4784_v53 = vpop.f32.mrf.mxu1 }
 0xdf3   : > { %2551 = vst.msk [vmem:[#allocation3 + $0xa0] sm:$0xff] %vm1201_vm4, %v2494_v48  ;;  %v2555_v62 = vsel %vm1201_vm4, %v2494_v48, -inf }
 0xdf4   : > { %2556 = vmax.xlane.f32.xlu0 %v2555_v62  ;;  %v2496_v1 = vpop.f32.mrf.mxu1 }
 0xdf5   : > { %v2497_v3 = vadd.f32 %v2496_v1, %v2446_v56 }
 0xdf6   : > { %v4785_v6 = vpop.f32.mrf.mxu1 }
 0xdf7   : > { %2552 = vst.msk [vmem:[#allocation3 + $0xa8] sm:$0xff] %vm1201_vm4, %v2497_v3  ;;  %v2558_v9 = vsel %vm1201_vm4, %v2497_v3, -inf }
 0xdf8   : > { %2559 = vmax.xlane.f32.xlu1 %v2558_v9 }
 0xdfe   : > { %v6318_v11 = vpop.f32.mrf.mxu0 }
 0xe00   : > { %v4778_v52 = vpop.f32.mrf.mxu0 }
 0xe02   : > { %v6320_v14 = vpop.f32.mrf.mxu0 }
 0xe03   : > { %v5011_v15 = vpack.i.bf16 %v6320_v14, %v6318_v11  ;;  %v5084_v11 = vld [vmem:[%s5920_s24 + $0x8] sm:$0xff]  }
 0xe04   : > { %v4779_v16 = vpop.f32.mrf.mxu0 }
 0xe06   : > { %v2544_v18 = vpop.f32.mrf.mxu0 }
 0xe07   : > { %v2545_v19 = vadd.f32 %v2544_v18, %v2447_v17 }
 0xe08   : > { %v4790_v20 = vpop.f32.mrf.mxu0 }
 0xe09   : > { %2553 = vst.msk [vmem:[#allocation3 + $0xb0] sm:$0xff] %vm1201_vm4, %v2545_v19  ;;  %v2561_v25 = vsel %vm1201_vm4, %v2545_v19, -inf }
 0xe0a   : > { %2562 = vmax.xlane.f32.xlu0 %v2561_v25  ;;  %v2547_v27 = vpop.f32.mrf.mxu0 }
 0xe0b   : > { %v2548_v29 = vadd.f32 %v2547_v27, %v2448_v22 }
 0xe0c   : > { %v4791_v32 = vpop.f32.mrf.mxu0 }
 0xe0d   : > { %2554 = vst.msk [vmem:[#allocation3 + $0xb8] sm:$0xff] %vm1201_vm4, %v2548_v29  ;;  %v2564_v33 = vsel %vm1201_vm4, %v2548_v29, -inf }
 0xe0e   : > { %2565 = vmax.xlane.f32.xlu0 %v2564_v33 }
 0xe7d   : > { %v2557_v34 = vpop.xlane.xlu0 %2556 }
 0xe7e   : > { %v2567_v37 = vsub.f32 %v2494_v48, %v2557_v34 }
 0xe80   : > { %v2571_v44 = vmul.f32 1.442695, %v2567_v37 }
 0xe81   : > { %v2560_v45 = vpop.xlane.xlu1 %2559 }
 0xe82   : > { %5206 = vpow2.f32 %v2571_v44  ;;  %v2568_v46 = vsub.f32 %v2497_v3, %v2560_v45 }
 0xe84   : > { %v2573_v53 = vmul.f32 1.442695, %v2568_v46 }
 0xe86   : > { %5208 = vpow2.f32 %v2573_v53 }
 0xe8f   : > { %v5207_v56 = vpop.eup %5206 }
 0xe90   : > { %v2579_v62 = vsel %vm1201_vm4, %v5207_v56, 0.0 }
 0xe91   : > { %2580 = vadd.xlane.f32.xlu0 %v2579_v62 }
 0xe93   : > { %v5209_v1 = vpop.eup %5208  ;;  %v2563_v6 = vpop.xlane.xlu0 %2562 }
 0xe94   : > { %v2569_v9 = vsub.f32 %v2545_v19, %v2563_v6  ;;  %v2582_v52 = vsel %vm1201_vm4, %v5209_v1, 0.0 }
 0xe95   : > { %2583 = vadd.xlane.f32.xlu1 %v2582_v52 }
 0xe96   : > { %v2575_v16 = vmul.f32 1.442695, %v2569_v9 }
 0xe97   : > { %v2566_v3 = vpop.xlane.xlu0 %2565 }
 0xe98   : > { %5210 = vpow2.f32 %v2575_v16  ;;  %v2570_v18 = vsub.f32 %v2548_v29, %v2566_v3 }
 0xe9a   : > { %v2577_v20 = vmul.f32 1.442695, %v2570_v18 }
 0xe9c   : > { %5212 = vpow2.f32 %v2577_v20 }
 0xea5   : > { %v5211_v17 = vpop.eup %5210 }
 0xea6   : > { %2648 = vrot.lane.b32.xlu1 %v6065_v10, %s5550_s19  ;;  %v2585_v48 = vsel %vm1201_vm4, %v5211_v17, 0.0 }
 0xea7   : > { %2586 = vadd.xlane.f32.xlu0 %v2585_v48 }
 0xea9   : > { %v5213_v19 = vpop.eup %5212 }
 0xeaa   : > { %2702 = vrot.lane.b32.xlu1 %v6014_v61, %s5551_s0  ;;  %v2588_v22 = vsel %vm1201_vm4, %v5213_v19, 0.0 }
 0xebd   : > { %2601 = vrot.lane.b32.xlu0 %v6067_v13, %s5550_s19 }
 0xec1   : > { %2700 = vrot.lane.b32.xlu0 %v6021_v7, %s5551_s0 }
 0xece   : > { %2589 = vadd.xlane.f32.xlu1 %v2588_v22 }
 0xedf   : > { %2753 = vrot.lane.b32.xlu1 %v6023_v8, %s5551_s0 }
 0xee3   : > { %2751 = vrot.lane.b32.xlu1 %v6032_v12, %s5551_s0 }
 0xf1a   : > { %v2581_v27 = vpop.xlane.xlu0 %2580 }
 0xf1e   : > { %v2584_v25 = vpop.xlane.xlu1 %2583 }
 0xf1f   : > { %5214 = vrcp.f32 %v2584_v25 }
 0xf20   : > { %5216 = vrcp.f32 %v2581_v27 }
 0xf22   : > { %v2649_v29 = vpop.permute.xlu1 %2648 }
 0xf23   : > { %4799 = vmatpush3.bf16.msra.mxu0 %v2649_v29  ;;  %v2696_v29 = vld [vmem:[#allocation3 + $0xc0] sm:$0xff] }
 0xf24   : > { %4810 = vmatprep.subr.bf16.mxu0 %v5544_v47 }
 0xf26   : > { %v2703_v46 = vpop.permute.xlu1 %2702 }
 0xf27   : > { %v2708_v62 = vsel %vm1201_vm4, %v2703_v46, 0 }
 0xf2c   : > { %v5215_v32 = vpop.eup %5214 }
 0xf2d   : > { %v5217_v34 = vpop.eup %5216  ;;  %v2594_v37 = vmul.f32 %v5215_v32, %v5209_v1 }
 0xf2e   : > { %v2592_v45 = vmul.f32 %v5217_v34, %v5207_v56 }
 0xf30   : > { %v2587_v33 = vpop.xlane.xlu0 %2586  ;;  %v2599_v53 = vpack.c.bf16 %v2594_v37, %v2592_v45  ;;  %v2697_v37 = vld [vmem:[#allocation3 + $0xc8] sm:$0xff] }
 0xf31   : > { %5218 = vrcp.f32 %v2587_v33 }
 0xf34   : > { %v2602_v44 = vpop.permute.xlu0 %2601 }
 0xf35   : > { %4793 = vmatpush3.bf16.msra.mxu1 %v2602_v44 }
 0xf36   : > { %4804 = vmatprep.subr.bf16.mxu1 %v5544_v47 }
 0xf38   : > { %4795 = vmatmul.mubr.msk.bf16.vlgmr.msra.gmra.mxu1 %vm1201_vm4, %v2599_v53  ;;  %v2701_v6 = vpop.permute.xlu0 %2700 }
 0xf39   : > { %4805 = vmatpush3.bf16.xpose.msra.mxu1 %v2708_v62  ;;  %4806 = vmatprep.mubr.msk.bf16.mxu1 %vm5545_vm3, %v5544_v47 }
 0xf3a   : > { %4816 = vmatprep.subr.bf16.mxu1 %v5544_v47 }
 0xf3e   : > { %v5219_v1 = vpop.eup %5218 }
 0xf3f   : > { %v2596_v52 = vmul.f32 %v5219_v1, %v5211_v17 }
 0xf40   : > { %4807 = vmatmul.mubr.msk.bf16.vlgmr.msra.gmra.mxu1 %vm1201_vm4, %v2701_v6 }
 0xf41   : > { %4818 = vmatprep.mubr.msk.bf16.mxu1 %vm5545_vm3, %v5544_v47 }
 0xf57   : > { %v2590_v56 = vpop.xlane.xlu1 %2589 }
 0xf58   : > { %5220 = vrcp.f32 %v2590_v56 }
 0xf5b   : > { %v2754_v48 = vpop.permute.xlu1 %2753 }
 0xf5c   : > { %v2759_v18 = vsel %vm1201_vm4, %v2754_v48, 0 }
 0xf5f   : > { %v2752_v20 = vpop.permute.xlu1 %2751 }
 0xf65   : > { %v5221_v9 = vpop.eup %5220 }
 0xf66   : > { %v2598_v16 = vmul.f32 %v5221_v9, %v5213_v19 }
 0xf68   : > { %v2600_v3 = vpack.c.bf16 %v2598_v16, %v2596_v52  ;;  %v2698_v16 = vld [vmem:[#allocation3 + $0xd0] sm:$0xff] }
 0xf6a   : > { %4801 = vmatmul.mubr.msk.bf16.vlgmr.msra.gmra.mxu0 %vm1201_vm4, %v2600_v3 }
 0xf6b   : > { %4811 = vmatpush3.bf16.xpose.msra.mxu0 %v2759_v18  ;;  %4812 = vmatprep.mubr.msk.bf16.mxu0 %vm5545_vm3, %v5544_v47 }
 0xf6c   : > { %4822 = vmatprep.subr.bf16.mxu0 %v5544_v47 }
 0xf72   : > { %4813 = vmatmul.mubr.msk.bf16.vlgmr.msra.gmra.mxu0 %vm1201_vm4, %v2752_v20  ;;  %v2699_v20 = vld [vmem:[#allocation3 + $0xd8] sm:$0xff] }
 0xf73   : > { %4824 = vmatprep.mubr.msk.bf16.mxu0 %vm5545_vm3, %v5544_v47 }
 0xff8   : > { %v6362_v17 = vpop.f32.mrf.mxu1 }
 0xffa   : > { %v4796_v19 = vpop.f32.mrf.mxu1 }
 0xffc   : > { %v6364_v22 = vpop.f32.mrf.mxu1 }
 0xffd   : > { %v5016_v25 = vpack.i.bf16 %v6364_v22, %v6362_v17 }
 0xffe   : > { %v4797_v27 = vpop.f32.mrf.mxu1 }
0x1000   : > { %v2744_v32 = vpop.f32.mrf.mxu1 }
0x1001   : > { %v2745_v33 = vadd.f32 %v2744_v32, %v2696_v29 }
0x1002   : > { %v4808_v34 = vpop.f32.mrf.mxu1 }
0x1003   : > { %2802 = vst.msk [vmem:[#allocation3 + $0xc0] sm:$0xff] %vm1201_vm4, %v2745_v33  ;;  %v2806_v44 = vsel %vm1201_vm4, %v2745_v33, -inf }
0x1004   : > { %2807 = vmax.xlane.f32.xlu0 %v2806_v44  ;;  %v2747_v45 = vpop.f32.mrf.mxu1 }
0x1005   : > { %v2748_v46 = vadd.f32 %v2747_v45, %v2697_v37 }
0x1006   : > { %v4809_v53 = vpop.f32.mrf.mxu1 }
0x1007   : > { %2803 = vst.msk [vmem:[#allocation3 + $0xc8] sm:$0xff] %vm1201_vm4, %v2748_v46  ;;  %v2809_v62 = vsel %vm1201_vm4, %v2748_v46, -inf }
0x1008   : > { %2810 = vmax.xlane.f32.xlu1 %v2809_v62 }
0x102a   : > { %v6372_v6 = vpop.f32.mrf.mxu0 }
0x102c   : > { %v4802_v56 = vpop.f32.mrf.mxu0 }
0x102e   : > { %v6374_v1 = vpop.f32.mrf.mxu0 }
0x102f   : > { %v5021_v9 = vpack.i.bf16 %v6374_v1, %v6372_v6 }
0x1030   : > { %v4803_v52 = vpop.f32.mrf.mxu0 }
0x1032   : > { %v2795_v48 = vpop.f32.mrf.mxu0 }
0x1033   : > { %v2796_v3 = vadd.f32 %v2795_v48, %v2698_v16 }
0x1034   : > { %v4814_v18 = vpop.f32.mrf.mxu0 }
0x1035   : > { %2804 = vst.msk [vmem:[#allocation3 + $0xd0] sm:$0xff] %vm1201_vm4, %v2796_v3  ;;  %v2812_v19 = vsel %vm1201_vm4, %v2796_v3, -inf }
0x1036   : > { %2813 = vmax.xlane.f32.xlu0 %v2812_v19  ;;  %v2798_v27 = vpop.f32.mrf.mxu0 }
0x1037   : > { %v2799_v29 = vadd.f32 %v2798_v27, %v2699_v20 }
0x1038   : > { %v4815_v32 = vpop.f32.mrf.mxu0 }
0x1039   : > { %2805 = vst.msk [vmem:[#allocation3 + $0xd8] sm:$0xff] %vm1201_vm4, %v2799_v29  ;;  %v2815_v34 = vsel %vm1201_vm4, %v2799_v29, -inf }
0x103a   : > { %2816 = vmax.xlane.f32.xlu0 %v2815_v34 }
0x108d   : > { %v2808_v37 = vpop.xlane.xlu0 %2807 }
0x108e   : > { %v2818_v44 = vsub.f32 %v2745_v33, %v2808_v37 }
0x1090   : > { %v2822_v45 = vmul.f32 1.442695, %v2818_v44 }
0x1091   : > { %v2811_v53 = vpop.xlane.xlu1 %2810 }
0x1092   : > { %5222 = vpow2.f32 %v2822_v45  ;;  %v2819_v62 = vsub.f32 %v2748_v46, %v2811_v53 }
0x1094   : > { %v2824_v56 = vmul.f32 1.442695, %v2819_v62 }
0x1096   : > { %5224 = vpow2.f32 %v2824_v56 }
0x109f   : > { %v5223_v52 = vpop.eup %5222 }
0x10a0   : > { %v2830_v16 = vsel %vm1201_vm4, %v5223_v52, 0.0 }
0x10a1   : > { %2831 = vadd.xlane.f32.xlu0 %v2830_v16 }
0x10a3   : > { %v5225_v48 = vpop.eup %5224 }
0x10a4   : > { %v2833_v18 = vsel %vm1201_vm4, %v5225_v48, 0.0 }
0x10a5   : > { %2834 = vadd.xlane.f32.xlu1 %v2833_v18 }
0x10b6   : > { %2899 = vrot.lane.b32.xlu1 %v6065_v10, %s5551_s0 }
0x10ba   : > { %2953 = vrot.lane.b32.xlu1 %v6014_v61, %s5552_s29 }
0x10bf   : > { %v2814_v33 = vpop.xlane.xlu0 %2813 }
0x10c0   : > { %v2820_v20 = vsub.f32 %v2796_v3, %v2814_v33 }
0x10c2   : > { %v2826_v46 = vmul.f32 1.442695, %v2820_v20 }
0x10c3   : > { %v2817_v19 = vpop.xlane.xlu0 %2816 }
0x10c4   : > { %5226 = vpow2.f32 %v2826_v46  ;;  %v2821_v27 = vsub.f32 %v2799_v29, %v2817_v19 }
0x10c6   : > { %v2828_v32 = vmul.f32 1.442695, %v2821_v27 }
0x10c8   : > { %5228 = vpow2.f32 %v2828_v32 }
0x10d1   : > { %v5227_v34 = vpop.eup %5226 }
0x10d2   : > { %v2836_v37 = vsel %vm1201_vm4, %v5227_v34, 0.0 }
0x10d3   : > { %2837 = vadd.xlane.f32.xlu0 %v2836_v37 }
0x10d5   : > { %v5229_v44 = vpop.eup %5228 }
0x10d6   : > { %v2839_v45 = vsel %vm1201_vm4, %v5229_v44, 0.0 }
0x10de   : > { %2840 = vadd.xlane.f32.xlu1 %v2839_v45 }
0x10e9   : > { %2852 = vrot.lane.b32.xlu0 %v6067_v13, %s5551_s0 }
0x10ed   : > { %2951 = vrot.lane.b32.xlu0 %v6021_v7, %s5552_s29 }
0x10ef   : > { %3004 = vrot.lane.b32.xlu1 %v6023_v8, %s5552_s29 }
0x10f3   : > { %3002 = vrot.lane.b32.xlu1 %v6032_v12, %s5552_s29 }
0x112a   : > { %v2832_v29 = vpop.xlane.xlu0 %2831 }
0x112e   : > { %v2835_v61 = vpop.xlane.xlu1 %2834 }
0x112f   : > { %5230 = vrcp.f32 %v2835_v61 }
0x1130   : > { %5232 = vrcp.f32 %v2832_v29 }
0x1132   : > { %v2900_v3 = vpop.permute.xlu1 %2899 }
0x1133   : > { %4823 = vmatpush3.bf16.msra.mxu0 %v2900_v3 }
0x1134   : > { %4834 = vmatprep.subr.bf16.mxu0 %v5544_v47 }
0x1136   : > { %v2954_v33 = vpop.permute.xlu1 %2953 }
0x1137   : > { %v2959_v12 = vsel %vm1201_vm4, %v2954_v33, 0 }
0x113c   : > { %v5231_v53 = vpop.eup %5230 }
0x113d   : > { %v5233_v56 = vpop.eup %5232  ;;  %v2845_v16 = vmul.f32 %v5231_v53, %v5225_v48 }
0x113e   : > { %v2843_v7 = vmul.f32 %v5233_v56, %v5223_v52 }
0x1140   : > { %v2850_v8 = vpack.c.bf16 %v2845_v16, %v2843_v7  ;;  %v2948_v7 = vld [vmem:[#allocation3 + $0xe8] sm:$0xff] }
0x115c   : > { %v2838_v62 = vpop.xlane.xlu0 %2837 }
0x115d   : > { %5234 = vrcp.f32 %v2838_v62  ;;  %v2947_v62 = vld [vmem:[#allocation3 + $0xe0] sm:$0xff] }
0x1160   : > { %v2853_v18 = vpop.permute.xlu0 %2852 }
0x1161   : > { %4817 = vmatpush3.bf16.msra.mxu1 %v2853_v18 }
0x1162   : > { %4828 = vmatprep.subr.bf16.mxu1 %v5544_v47 }
0x1164   : > { %4819 = vmatmul.mubr.msk.bf16.vlgmr.msra.gmra.mxu1 %vm1201_vm4, %v2850_v8  ;;  %v2952_v48 = vpop.permute.xlu0 %2951 }
0x1165   : > { %4829 = vmatpush3.bf16.xpose.msra.mxu1 %v2959_v12  ;;  %4830 = vmatprep.mubr.msk.bf16.mxu1 %vm5545_vm3, %v5544_v47 }
0x1166   : > { %4840 = vmatprep.subr.bf16.mxu1 %v5544_v47 }
0x1167   : > { %v2841_v20 = vpop.xlane.xlu1 %2840 }
0x1168   : > { %5236 = vrcp.f32 %v2841_v20 }
0x116a   : > { %v5235_v52 = vpop.eup %5234 }
0x116b   : > { %v2847_v19 = vmul.f32 %v5235_v52, %v5227_v34  ;;  %v3005_v32 = vpop.permute.xlu1 %3004 }
0x116c   : > { %4831 = vmatmul.mubr.msk.bf16.vlgmr.msra.gmra.mxu1 %vm1201_vm4, %v2952_v48  ;;  %v3010_v45 = vsel %vm1201_vm4, %v3005_v32, 0  ;;  %v2949_v32 = vld [vmem:[#allocation3 + $0xf0] sm:$0xff] }
0x116d   : > { %4842 = vmatprep.mubr.msk.bf16.mxu1 %vm5545_vm3, %v5544_v47 }
0x116f   : > { %v3003_v61 = vpop.permute.xlu1 %3002 }
0x1175   : > { %v5237_v46 = vpop.eup %5236 }
0x1176   : > { %v2849_v27 = vmul.f32 %v5237_v46, %v5229_v44 }
0x1178   : > { %v2851_v37 = vpack.c.bf16 %v2849_v27, %v2847_v19 }
0x117a   : > { %4825 = vmatmul.mubr.msk.bf16.vlgmr.msra.gmra.mxu0 %vm1201_vm4, %v2851_v37 }
0x117b   : > { %4835 = vmatpush3.bf16.xpose.msra.mxu0 %v3010_v45  ;;  %4836 = vmatprep.mubr.msk.bf16.mxu0 %vm5545_vm3, %v5544_v47 }
0x117c   : > { %4846 = vmatprep.subr.bf16.mxu0 %v5544_v47 }
0x1182   : > { %4837 = vmatmul.mubr.msk.bf16.vlgmr.msra.gmra.mxu0 %vm1201_vm4, %v3003_v61 }
0x1183   : > { %4848 = vmatprep.mubr.msk.bf16.mxu0 %vm5545_vm3, %v5544_v47 }
0x1224   : > { %v6416_v34 = vpop.f32.mrf.mxu1 }
0x1226   : > { %v4820_v44 = vpop.f32.mrf.mxu1 }
0x1227   : > { %v2950_v44 = vld [vmem:[#allocation3 + $0xf8] sm:$0xff] }
0x1228   : > { %v6418_v3 = vpop.f32.mrf.mxu1 }
0x1229   : > { %v5026_v29 = vpack.i.bf16 %v6418_v3, %v6416_v34 }
0x122a   : > { %v4821_v53 = vpop.f32.mrf.mxu1 }
0x122c   : > { %v2995_v56 = vpop.f32.mrf.mxu1 }
0x122d   : > { %v2996_v16 = vadd.f32 %v2995_v56, %v2947_v62 }
0x122e   : > { %v4832_v18 = vpop.f32.mrf.mxu1 }
0x122f   : > { %3053 = vst.msk [vmem:[#allocation3 + $0xe0] sm:$0xff] %vm1201_vm4, %v2996_v16  ;;  %v3057_v33 = vsel %vm1201_vm4, %v2996_v16, -inf }
0x1230   : > { %3058 = vmax.xlane.f32.xlu0 %v3057_v33  ;;  %v2998_v47 = vpop.f32.mrf.mxu1 }
0x1231   : > { %v2999_v8 = vadd.f32 %v2998_v47, %v2948_v7 }
0x1232   : > { %v4833_v12 = vpop.f32.mrf.mxu1 }
0x1233   : > { %3054 = vst.msk [vmem:[#allocation3 + $0xe8] sm:$0xff] %vm1201_vm4, %v2999_v8  ;;  %v3060_v20 = vsel %vm1201_vm4, %v2999_v8, -inf }
0x1234   : > { %3061 = vmax.xlane.f32.xlu1 %v3060_v20 }
0x123a   : > { %v2939_v48 = vpop.f32.mrf.mxu0 }
0x123c   : > { %v4826_v52 = vpop.f32.mrf.mxu0 }
0x123e   : > { %v2942_v46 = vpop.f32.mrf.mxu0 }
0x123f   : > { %v5031_v19 = vpack.i.bf16 %v2942_v46, %v2939_v48 }
0x1240   : > { %v4827_v27 = vpop.f32.mrf.mxu0 }
0x1242   : > { %v3046_v37 = vpop.f32.mrf.mxu0 }
0x1243   : > { %v3047_v45 = vadd.f32 %v3046_v37, %v2949_v32 }
0x1244   : > { %v4838_v61 = vpop.f32.mrf.mxu0 }
0x1245   : > { %3055 = vst.msk [vmem:[#allocation3 + $0xf0] sm:$0xff] %vm1201_vm4, %v3047_v45  ;;  %v3063_v53 = vsel %vm1201_vm4, %v3047_v45, -inf }
0x1246   : > { %3064 = vmax.xlane.f32.xlu0 %v3063_v53  ;;  %v3049_v62 = vpop.f32.mrf.mxu0 }
0x1247   : > { %v3050_v56 = vadd.f32 %v3049_v62, %v2950_v44 }
0x1248   : > { %v4839_v18 = vpop.f32.mrf.mxu0 }
0x1249   : > { %3056 = vst.msk [vmem:[#allocation3 + $0xf8] sm:$0xff] %vm1201_vm4, %v3050_v56  ;;  %v3066_v7 = vsel %vm1201_vm4, %v3050_v56, -inf }
0x124a   : > { %3067 = vmax.xlane.f32.xlu0 %v3066_v7 }
0x12b9   : > { %v3059_v33 = vpop.xlane.xlu0 %3058 }
0x12ba   : > { %v3069_v47 = vsub.f32 %v2996_v16, %v3059_v33 }
0x12bc   : > { %v3073_v12 = vmul.f32 1.442695, %v3069_v47 }
0x12bd   : > { %v3062_v20 = vpop.xlane.xlu1 %3061 }
0x12be   : > { %5238 = vpow2.f32 %v3073_v12  ;;  %v3070_v48 = vsub.f32 %v2999_v8, %v3062_v20 }
0x12c0   : > { %v3075_v52 = vmul.f32 1.442695, %v3070_v48 }
0x12c2   : > { %5240 = vpow2.f32 %v3075_v52 }
0x12cb   : > { %v5239_v46 = vpop.eup %5238 }
0x12cc   : > { %v3081_v27 = vsel %vm1201_vm4, %v5239_v46, 0.0 }
0x12cd   : > { %3082 = vadd.xlane.f32.xlu0 %v3081_v27 }
0x12cf   : > { %v5241_v32 = vpop.eup %5240  ;;  %v3065_v37 = vpop.xlane.xlu0 %3064 }
0x12d0   : > { %v3071_v61 = vsub.f32 %v3047_v45, %v3065_v37  ;;  %v3084_v44 = vsel %vm1201_vm4, %v5241_v32, 0.0 }
0x12d1   : > { %3085 = vadd.xlane.f32.xlu1 %v3084_v44 }
0x12d2   : > { %v3077_v53 = vmul.f32 1.442695, %v3071_v61 }
0x12d3   : > { %v3068_v62 = vpop.xlane.xlu0 %3067 }
0x12d4   : > { %5242 = vpow2.f32 %v3077_v53  ;;  %v3072_v16 = vsub.f32 %v3050_v56, %v3068_v62 }
0x12d6   : > { %v3079_v18 = vmul.f32 1.442695, %v3072_v16 }
0x12d8   : > { %5244 = vpow2.f32 %v3079_v18 }
0x12e1   : > { %v5243_v7 = vpop.eup %5242 }
0x12e2   : > { %v3087_v8 = vsel %vm1201_vm4, %v5243_v7, 0.0 }
0x12e3   : > { %3088 = vadd.xlane.f32.xlu0 %v3087_v8 }
0x12e5   : > { %v5245_v33 = vpop.eup %5244 }
0x12e6   : > { %v3090_v47 = vsel %vm1201_vm4, %v5245_v33, 0.0 }
0x12e7   : > { %3091 = vadd.xlane.f32.xlu1 %v3090_v47 }
0x12f8   : > { %3150 = vrot.lane.b32.xlu1 %v6065_v10, %s5552_s29 }
0x12f9   : > { %3103 = vrot.lane.b32.xlu0 %v6067_v13, %s5552_s29 }
0x12fc   : > { %4977 = vrot.lane.b32.xlu1 %v4976_v5, %s5552_s29 }
0x12fd   : > { %4987 = vrot.lane.b32.xlu0 %v4986_v40, %s5551_s0 }
0x1300   : > { %4982 = vrot.lane.b32.xlu1 %v4981_v24, %s5552_s29 }
0x1301   : > { %4997 = vrot.lane.b32.xlu0 %v4996_v31, %s5550_s19  ;;  %v5078_v31 = vld [vmem:[%s5920_s24 + $0x38] sm:$0xff]  }
0x1304   : > { %4992 = vrot.lane.b32.xlu1 %v4991_v0, %s5551_s0 }
0x1305   : > { %5007 = vrot.lane.b32.xlu0 %v5006_v43, %s5549_s3 }
0x1308   : > { %5002 = vrot.lane.b32.xlu1 %v5001_v55, %s5550_s19  ;;  %v5081_v55 = vld [vmem:[%s5920_s24 + $0x20] sm:$0xff]  }
0x1309   : > { %5017 = vrot.lane.b32.xlu0 %v5016_v25, %s5548_s21  ;;  %v5085_v25 = vld [vmem:[%s5920_s24] sm:$0xff]  }
0x130c   : > { %5012 = vrot.lane.b32.xlu1 %v5011_v15, %s5549_s3 }
0x130d   : > { %5027 = vrot.lane.b32.xlu0 %v5026_v29, %s5547_s14 }
0x1310   : > { %5022 = vrot.lane.b32.xlu1 %v5021_v9, %s5548_s21 }
0x1314   : > { %5032 = vrot.lane.b32.xlu1 %v5031_v19, %s5547_s14 }
0x1356   : > { %v3083_v13 = vpop.xlane.xlu0 %3082 }
0x135a   : > { %v3086_v10 = vpop.xlane.xlu1 %3085 }
0x135b   : > { %5246 = vrcp.f32 %v3086_v10 }
0x135c   : > { %5248 = vrcp.f32 %v3083_v13 }
0x1368   : > { %v5247_v2 = vpop.eup %5246 }
0x1369   : > { %v5249_v5 = vpop.eup %5248  ;;  %v3096_v21 = vmul.f32 %v5247_v2, %v5241_v32 }
0x136a   : > { %v3094_v36 = vmul.f32 %v5249_v5, %v5239_v46 }
0x136c   : > { %v3089_v4 = vpop.xlane.xlu0 %3088  ;;  %v3101_v38 = vpack.c.bf16 %v3096_v21, %v3094_v36 }
0x136d   : > { %5250 = vrcp.f32 %v3089_v4 }
0x1370   : > { %v3092_v23 = vpop.xlane.xlu1 %3091  ;;  %v3104_v24 = vpop.permute.xlu0 %3103 }
0x1371   : > { %5252 = vrcp.f32 %v3092_v23  ;;  %4841 = vmatpush3.bf16.msra.mxu1 %v3104_v24 }
0x1372   : > { %4852 = vmatprep.subr.bf16.mxu1 %v5078_v31 }
0x1374   : > { %v3151_v40 = vpop.permute.xlu1 %3150  ;;  %4843 = vmatmul.mubr.msk.bf16.vlgmr.msra.gmra.mxu1 %vm1201_vm4, %v3101_v38  ;;  %v4988_v29 = vpop.permute.xlu0 %4987 }
0x1375   : > { %4847 = vmatpush3.bf16.msra.mxu0 %v3151_v40  ;;  %4853 = vmatpush3.bf16.msra.mxu1 %v5078_v31  ;;  %v4990_v37 = vunpack.i.h.bf16 %v4988_v29  ;;  %v4989_v61 = vunpack.i.l.bf16 %v4988_v29 }
0x1376   : > { %4854 = vmatprep.subr.bf16.mxu1 %v5079_v51 }
0x1378   : > { %v4978_v19 = vpop.permute.xlu1 %4977  ;;  %v4998_v45 = vpop.permute.xlu0 %4997 }
0x1379   : > { %4855 = vmatpush3.bf16.msra.mxu1 %v5079_v51  ;;  %v4980_v20 = vunpack.i.h.bf16 %v4978_v19  ;;  %v4979_v48 = vunpack.i.l.bf16 %v4978_v19  ;;  %v5000_v16 = vunpack.i.h.bf16 %v4998_v45  ;;  %v4999_v18 = vunpack.i.l.bf16 %v4998_v45 }
0x137a   : > { %v5251_v59 = vpop.eup %5250  ;;  %4856 = vmatprep.subr.bf16.mxu1 %v5080_v54 }
0x137b   : > { %v3098_v28 = vmul.f32 %v5251_v59, %v5243_v7  ;;  %v3310_v27 = vsel %vm1201_vm4, %v6098_v41, %v4980_v20  ;;  %v3309_v32 = vsel %vm1201_vm4, %v6096_v39, %v4979_v48 }
0x137c   : > { %v4983_v56 = vpop.permute.xlu1 %4982  ;;  %v5008_v12 = vpop.permute.xlu0 %5007  ;;  %v3314_v53 = vsel %vm3313_vm5, %v3309_v32, %v4989_v61  ;;  %v3315_v62 = vsel %vm3313_vm5, %v3310_v27, %v4990_v37  ;;  %v5088_v61 = vld [vmem:[%s5922_s30 + $0x74] ss:$8 sps:$4 sm:$0xff]  }
0x137d   : > { %4857 = vmatpush3.bf16.msra.mxu1 %v5080_v54  ;;  %v5010_v8 = vunpack.i.h.bf16 %v5008_v12  ;;  %v3319_v41 = vsel %vm3318_vm6, %v3314_v53, %v4999_v18  ;;  %v3320_v47 = vsel %vm3318_vm6, %v3315_v62, %v5000_v16  ;;  %v4985_v51 = vunpack.i.h.bf16 %v4983_v56  ;;  %3631 = vmatprep.subr.bf16.mxu0 %v5088_v61  ;;  %v5091_v53 = vld [vmem:[%s5922_s30 + $0x64] ss:$8 sps:$4 sm:$0xff]   ;;  %v5089_v62 = vld [vmem:[%s5922_s30 + $0x60] ss:$8 sps:$4 sm:$0xff]   ;;  %v5094_v16 = vld [vmem:[%s5922_s30 + $0x54] ss:$8 sps:$4 sm:$0xff]  }
0x137e   : > { %v5253_v63 = vpop.eup %5252  ;;  %4858 = vmatprep.subr.bf16.mxu1 %v5081_v55  ;;  %v4984_v54 = vunpack.i.l.bf16 %v4983_v56  ;;  %v5092_v18 = vld [vmem:[%s5922_s30 + $0x50] ss:$8 sps:$4 sm:$0xff]  }
0x137f   : > { %v3100_v0 = vmul.f32 %v5253_v63, %v5245_v33  ;;  %v5009_v33 = vunpack.i.l.bf16 %v5008_v12  ;;  %v3325_v21 = vsel %vm3323_vm7, %v3320_v47, %v5010_v8  ;;  %v5095_v8 = vld [vmem:[%s5922_s30 + $0x40] ss:$8 sps:$4 sm:$0xff]   ;;  %v5103_v47 = vld [vmem:[%s5922_s30 + $0x24] ss:$8 sps:$4 sm:$0xff]  }
0x1380   : > { %v4993_v52 = vpop.permute.xlu1 %4992  ;;  %v5018_v46 = vpop.permute.xlu0 %5017 }
0x1381   : > { %v3102_v30 = vpack.c.bf16 %v3100_v0, %v3098_v28  ;;  %4859 = vmatpush3.bf16.msra.mxu1 %v5081_v55  ;;  %v5020_v39 = vunpack.i.h.bf16 %v5018_v46  ;;  %v5019_v10 = vunpack.i.l.bf16 %v5018_v46  ;;  %v3324_v5 = vsel %vm3323_vm7, %v3319_v41, %v5009_v33  ;;  %v5100_v33 = vld [vmem:[%s5922_s30 + $0x34] ss:$8 sps:$4 sm:$0xff]   ;;  %v5098_v41 = vld [vmem:[%s5922_s30 + $0x30] ss:$8 sps:$4 sm:$0xff]  }
0x1382   : > { %4860 = vmatprep.subr.bf16.mxu1 %v5082_v35  ;;  %v4995_v55 = vunpack.i.h.bf16 %v4993_v52 }
0x1383   : > { %4849 = vmatmul.mubr.msk.bf16.vlgmr.msra.gmra.mxu0 %vm1201_vm4, %v3102_v30  ;;  %v3329_v24 = vsel %vm3328_vm8, %v3324_v5, %v5019_v10  ;;  %v3330_v36 = vsel %vm3328_vm8, %v3325_v21, %v5020_v39  ;;  %v5101_v39 = vld [vmem:[%s5922_s30 + $0x20] ss:$8 sps:$4 sm:$0xff]   ;;  %v5106_v10 = vld [vmem:[%s5922_s30 + $0x14] ss:$8 sps:$4 sm:$0xff]  }
0x1384   : > { %3663 = vmatprep.mubr.bf16.mxu0 %v5543_v26  ;;  %v5003_v44 = vpop.permute.xlu1 %5002  ;;  %v5028_v7 = vpop.permute.xlu0 %5027 }
0x1385   : > { %4861 = vmatpush3.bf16.msra.mxu1 %v5082_v35  ;;  %v5030_v13 = vunpack.i.h.bf16 %v5028_v7  ;;  %v5029_v2 = vunpack.i.l.bf16 %v5028_v7  ;;  %v4994_v35 = vunpack.i.l.bf16 %v4993_v52  ;;  %v5097_v7 = vld [vmem:[%s5922_s30 + $0x44] ss:$8 sps:$4 sm:$0xff]  }
0x1386   : > { %4862 = vmatprep.subr.bf16.mxu1 %v5083_v42 }
0x1387   : > { %v3334_v59 = vsel %vm3333_vm9, %v3329_v24, %v5029_v2  ;;  %v3335_v63 = vsel %vm3333_vm9, %v3330_v36, %v5030_v13  ;;  %v5104_v13 = vld [vmem:[%s5922_s30 + $0x10] ss:$8 sps:$4 sm:$0xff]   ;;  %v5109_v2 = vld [vmem:[%s5922_s30 + $0x4] ss:$8 sps:$4 sm:$0xff]  }
0x1388   : > { %v5013_v4 = vpop.permute.xlu1 %5012 }
0x1389   : > { %4863 = vmatpush3.bf16.msra.mxu1 %v5083_v42  ;;  %v5005_v42 = vunpack.i.h.bf16 %v5003_v44 }
0x138a   : > { %4864 = vmatprep.subr.bf16.mxu1 %v5084_v11 }
0x138c   : > { %v5023_v31 = vpop.permute.xlu1 %5022 }
0x138d   : > { %4865 = vmatpush3.bf16.msra.mxu1 %v5084_v11 }
0x138e   : > { %4866 = vmatprep.subr.bf16.mxu1 %v5085_v25 }
0x1390   : > { %v5033_v11 = vpop.permute.xlu1 %5032 }
0x1391   : > { %4867 = vmatpush3.bf16.msra.mxu1 %v5085_v25  ;;  %v5025_v25 = vunpack.i.h.bf16 %v5023_v31 }
0x1434   : > { %v3143_v43 = vpop.f32.mrf.mxu1 }
0x1436   : > { %v4844_v14 = vpop.f32.mrf.mxu1 }
0x1437   : > { %v5015_v14 = vunpack.i.h.bf16 %v5013_v4 }
0x1438   : > { %v3146_v15 = vpop.f32.mrf.mxu1 }
0x1439   : > { %v5036_v17 = vpack.i.bf16 %v3146_v15, %v3143_v43  ;;  %v5004_v43 = vunpack.i.l.bf16 %v5003_v44  ;;  %v5014_v15 = vunpack.i.l.bf16 %v5013_v4  ;;  %v5086_v44 = vld [vmem:[%s5922_s30 + $0x70] ss:$8 sps:$4 sm:$0xff]   ;;  %v5107_v4 = vld [vmem:[%s5922_s30] ss:$8 sps:$4 sm:$0xff]  }
0x143a   : > { %v4845_v22 = vpop.f32.mrf.mxu1  ;;  %3632 = vmatpush1.bf16.msra.mxu0 %v5086_v44 }
0x143b   : > { %5037 = vrot.lane.b32.xlu0 %v5036_v17, %s5546_s23  ;;  %v3312_v17 = vsel %vm1201_vm4, %v6106_v60, %v4985_v51  ;;  %v3311_v22 = vsel %vm1201_vm4, %v6104_v58, %v4984_v54  ;;  %3633 = vmatprep.subr.bf16.mxu0 %v5091_v53  ;;  %v5292_v51 = vld [vmem:[#allocation2 + $0x18] sm:$0xff]  ;;  %v3469_v53 = vld [vmem:[%s6839_s18] sm:$0x1] }
0x143e   : > { %3634 = vmatpush1.bf16.msra.mxu0 %v5089_v62 }
0x143f   : > { %3635 = vmatprep.subr.bf16.mxu0 %v5094_v16 }
0x1442   : > { %3636 = vmatpush1.bf16.msra.mxu0 %v5092_v18 }
0x1443   : > { %v3190_v6 = vpop.f32.mrf.mxu0  ;;  %3637 = vmatprep.subr.bf16.mxu0 %v5097_v7  ;;  %v4476_v7 = vld [vmem:[%s6840_s28] ss:$0 sm:$0xff] }
0x1445   : > { %v4850_v1 = vpop.f32.mrf.mxu0 }
0x1446   : > { %v3316_v1 = vsel %vm3313_vm5, %v3311_v22, %v4994_v35  ;;  %3638 = vmatpush1.bf16.msra.mxu0 %v5095_v8  ;;  %v5293_v35 = vld [vmem:[#allocation2 + $0x8] sm:$0xff] }
0x1447   : > { %v3193_v9 = vpop.f32.mrf.mxu0  ;;  %v3321_v29 = vsel %vm3318_vm6, %v3316_v1, %v5004_v43  ;;  %3639 = vmatprep.subr.bf16.mxu0 %v5100_v33 }
0x1448   : > { %v5041_v34 = vpack.i.bf16 %v3193_v9, %v3190_v6  ;;  %v5024_v6 = vunpack.i.l.bf16 %v5023_v31  ;;  %v3317_v9 = vsel %vm3313_vm5, %v3312_v17, %v4995_v55  ;;  %v3326_v45 = vsel %vm3323_vm7, %v3321_v29, %v5014_v15 }
0x1449   : > { %v4851_v3 = vpop.f32.mrf.mxu0  ;;  %v3322_v19 = vsel %vm3318_vm6, %v3317_v9, %v5005_v42 }
0x144a   : > { %5042 = vrot.lane.b32.xlu1 %v5041_v34, %s5546_s23  ;;  %v5035_v34 = vunpack.i.h.bf16 %v5033_v11  ;;  %v5034_v3 = vunpack.i.l.bf16 %v5033_v11  ;;  %v3327_v60 = vsel %vm3323_vm7, %v3322_v19, %v5015_v14  ;;  %v3331_v56 = vsel %vm3328_vm8, %v3326_v45, %v5024_v6  ;;  %3640 = vmatpush1.bf16.msra.mxu0 %v5098_v41 }
0x144b   : > { %v3332_v12 = vsel %vm3328_vm8, %v3327_v60, %v5025_v25  ;;  %3641 = vmatprep.subr.bf16.mxu0 %v5103_v47 }
0x144c   : > { %v3336_v52 = vsel %vm3333_vm9, %v3331_v56, %v5034_v3  ;;  %v3337_v46 = vsel %vm3333_vm9, %v3332_v12, %v5035_v34 }
0x144e   : > { %3642 = vmatpush1.bf16.msra.mxu0 %v5101_v39 }
0x144f   : > { %3643 = vmatprep.subr.bf16.mxu0 %v5106_v10 }
0x1452   : > { %3644 = vmatpush1.bf16.msra.mxu0 %v5104_v13 }
0x1453   : > { %3645 = vmatprep.subr.bf16.mxu0 %v5109_v2 }
0x1456   : > { %3646 = vmatpush1.bf16.msra.mxu0 %v5107_v4 }
0x14ad   : > { %v5038_v23 = vpop.permute.xlu0 %5037 }
0x14ae   : > { %v5040_v38 = vunpack.i.h.bf16 %v5038_v23  ;;  %v5039_v40 = vunpack.i.l.bf16 %v5038_v23  ;;  %v4467_v23 = vld [vmem:[%s6838_s20] ss:$0 sm:$0xff] }
0x14b0   : > { %v3339_v0 = vsel %vm3338_vm10, %v3334_v59, %v5039_v40  ;;  %v3340_v28 = vsel %vm3338_vm10, %v3335_v63, %v5040_v38  ;;  %v5290_v63 = vld [vmem:[#allocation2 + $0x10] sm:$0xff] }
0x14b1   : > { %v3343_v30 = vpack.c.bf16 %v3340_v28, %v3339_v0 }
0x14b3   : > { %4868 = vmatprep.mubr.bf16.mxu1 %v3343_v30  ;;  %v5291_v30 = vld [vmem:[#allocation2] sm:$0xff] }
0x14bc   : > { %v5043_v58 = vpop.permute.xlu1 %5042 }
0x14bd   : > { %v5045_v20 = vunpack.i.h.bf16 %v5043_v58  ;;  %v5044_v48 = vunpack.i.l.bf16 %v5043_v58 }
0x14bf   : > { %v3342_v27 = vsel %vm3338_vm10, %v3337_v46, %v5045_v20  ;;  %v3341_v32 = vsel %vm3338_vm10, %v3336_v52, %v5044_v48 }
0x14c0   : > { %v3344_v37 = vpack.c.bf16 %v3342_v27, %v3341_v32 }
0x14c2   : > { %4869 = vmatmul.mubr.bf16.vlgmr.msra.gmra.mxu1 %v3344_v37 }
0x1582   : > { %v4870_v5 = vpop.f32.mrf.mxu1 }
0x1583   : > { %v3459_v40 = vadd.f32 %v4870_v5, %v4467_v23 }
0x1584   : > { %v3450_v21 = vpop.f32.mrf.mxu1 }
0x1585   : > { %v3451_v36 = vadd.f32 %v4467_v23, %v3450_v21  ;;  %v3467_v54 = vadd.f32 %v5292_v51, %v3459_v40  ;;  %v5110_v21 = vld [vmem:[%s5924_s5 + $0x78] sm:$0xff]   ;;  %v5116_v40 = vld [vmem:[%s5924_s5 + $0x60] sm:$0xff]   ;;  %v5123_v51 = vld [vmem:[%s5924_s5 + $0x8] sm:$0xff]  }
0x1586   : > { %v4871_v24 = vpop.f32.mrf.mxu1  ;;  %4606 = vmatprep.subr.bf16.mxu1 %v5110_v21 }
0x1587   : > { %v3465_v0 = vadd.f32 %v5290_v63, %v3451_v36  ;;  %v3462_v28 = vadd.f32 %v4871_v24, %v4467_v23  ;;  %v5112_v24 = vld [vmem:[%s5924_s5 + $0x70] sm:$0xff]   ;;  %v5118_v63 = vld [vmem:[%s5924_s5 + $0x58] sm:$0xff]  }
0x1588   : > { %v3453_v38 = vpop.f32.mrf.mxu1  ;;  %v5113_v36 = vld [vmem:[%s5924_s5 + $0x30] sm:$0xff]  }
0x1589   : > { %v3454_v59 = vadd.f32 %v4467_v23, %v3453_v38  ;;  %v3468_v42 = vadd.f32 %v5293_v35, %v3462_v28  ;;  %v5111_v23 = vld [vmem:[%s5924_s5 + $0x38] sm:$0xff]   ;;  %v5115_v38 = vld [vmem:[%s5924_s5 + $0x28] sm:$0xff]   ;;  %v5120_v28 = vld [vmem:[%s5924_s5 + $0x50] sm:$0xff]  }
0x158a   : > { %4607 = vmatpush3.bf16.msra.mxu1 %v5111_v23  ;;  %v3539_v35 = vld [vmem:[%s5906_s13] sm:$0x3] }
0x158b   : > { %v3466_v31 = vadd.f32 %v5291_v30, %v3454_v59  ;;  %4608 = vmatprep.subr.bf16.mxu1 %v5112_v24  ;;  %v5117_v59 = vld [vmem:[%s5924_s5 + $0x20] sm:$0xff]   ;;  %v5121_v30 = vld [vmem:[%s5924_s5 + $0x10] sm:$0xff]  }
0x158d   : > { %v3471_v55 = vadd.f32 %v3466_v31, %v3465_v0 }
0x158e   : > { %4609 = vmatpush3.bf16.msra.mxu1 %v5113_v36 }
0x158f   : > { %v3472_v43 = vadd.f32 %v3471_v55, %v3467_v54  ;;  %v5125_v55 = vld [vmem:[%s5924_s5] sm:$0xff]  }
0x1591   : > { %v3473_v11 = vadd.f32 %v3472_v43, %v3468_v42  ;;  %v3548_v43 = vrot.slane %v3539_v35, %v952_v50 }
0x1593   : > { %v3474_v14 = vrot.slane %v3473_v11, 4 }
0x1595   : > { %v3475_v15 = vadd.f32 %v3474_v14, %v3473_v11 }
0x1597   : > { %v3476_v17 = vrot.slane %v3475_v15, 2 }
0x1599   : > { %v3477_v22 = vadd.f32 %v3476_v17, %v3475_v15 }
0x159b   : > { %v3478_v25 = vrot.slane %v3477_v22, 1 }
0x159d   : > { %v3479_v6 = vadd.f32 %v3478_v25, %v3477_v22 }
0x159f   : > { %v3481_v1 = vmul.f32 0.03125, %v3479_v6 }
0x15a1   : > { %v3482_v9 = vsub.f32 %v3465_v0, %v3481_v1  ;;  %v3483_v34 = vsub.f32 %v3466_v31, %v3481_v1  ;;  %v3484_v3 = vsub.f32 %v3467_v54, %v3481_v1  ;;  %v3485_v29 = vsub.f32 %v3468_v42, %v3481_v1  ;;  %v5119_v0 = vld [vmem:[%s5924_s5 + $0x18] sm:$0xff]   ;;  %v5122_v31 = vld [vmem:[%s5924_s5 + $0x48] sm:$0xff]   ;;  %v5124_v54 = vld [vmem:[%s5924_s5 + $0x40] sm:$0xff]  }
0x15a2   : > { %v3544_v42 = vrot.slane %v3539_v35, %v6012_v57 }
0x15a3   : > { %v3486_v19 = vmul.f32 %v3482_v9, %v3482_v9  ;;  %v3487_v45 = vmul.f32 %v3483_v34, %v3483_v34  ;;  %v3488_v60 = vmul.f32 %v3484_v3, %v3484_v3  ;;  %v3489_v56 = vmul.f32 %v3485_v29, %v3485_v29 }
0x15a5   : > { %v3490_v58 = vadd.f32 %v3487_v45, %v3486_v19 }
0x15a7   : > { %v3491_v12 = vadd.f32 %v3490_v58, %v3488_v60 }
0x15a9   : > { %v3492_v20 = vadd.f32 %v3491_v12, %v3489_v56 }
0x15ab   : > { %v3493_v48 = vrot.slane %v3492_v20, 4 }
0x15ad   : > { %v3494_v52 = vadd.f32 %v3493_v48, %v3492_v20 }
0x15af   : > { %v3495_v46 = vrot.slane %v3494_v52, 2 }
0x15b1   : > { %v3496_v27 = vadd.f32 %v3495_v46, %v3494_v52 }
0x15b3   : > { %v3497_v32 = vrot.slane %v3496_v27, 1 }
0x15b5   : > { %v3498_v37 = vadd.f32 %v3497_v32, %v3496_v27 }
0x15b7   : > { %v3499_v61 = vmul.f32 0.03125, %v3498_v37 }
0x15b9   : > { %v3500_v44 = vadd.f32 1e-05, %v3499_v61 }
0x15bb   : > { %5254 = vrsqrt.f32 %v3500_v44 }
0x15c8   : > { %v5255_v62 = vpop.eup %5254 }
0x15c9   : > { %v3502_v16 = vmul.f32 %v5255_v62, %v3469_v53 }
0x15cb   : > { %v3506_v18 = vrot.slane %v3502_v16, %v6012_v57 }
0x15cd   : > { %v3508_v8 = vmul.f32 %v3506_v18, %v3483_v34  ;;  %v3507_v33 = vmul.f32 %v3506_v18, %v3482_v9  ;;  %v3509_v10 = vmul.f32 %v3506_v18, %v3484_v3  ;;  %v3510_v13 = vmul.f32 %v3506_v18, %v3485_v29 }
0x15cf   : > { %v6560_v41 = vadd.f32 %v4476_v7, %v3508_v8  ;;  %v6562_v47 = vadd.f32 %v4476_v7, %v3507_v33  ;;  %v6567_v2 = vadd.f32 %v4476_v7, %v3509_v10  ;;  %v6569_v4 = vadd.f32 %v4476_v7, %v3510_v13 }
0x15d1   : > { %v3521_v39 = vpack.c.bf16 %v6560_v41, %v6562_v47  ;;  %v3522_v5 = vpack.c.bf16 %v6569_v4, %v6567_v2 }
0x15d3   : > { %3664 = vmatmul.mubr.bf16.vlgmr.msra.gmra.mxu0 %v3521_v39 }
0x15d4   : > { %3673 = vmatprep.mubr.bf16.mxu0 %v5543_v26  ;;  %v5114_v26 = vld [vmem:[%s5924_s5 + $0x68] sm:$0xff]  }
0x15d5   : > { %4610 = vmatprep.subr.bf16.mxu1 %v5114_v26 }
0x15d6   : > { %4611 = vmatpush3.bf16.msra.mxu1 %v5115_v38 }
0x15d7   : > { %4612 = vmatprep.subr.bf16.mxu1 %v5116_v40 }
0x15da   : > { %4613 = vmatpush3.bf16.msra.mxu1 %v5117_v59 }
0x15db   : > { %3674 = vmatmul.mubr.bf16.gmra.mxu0 %v3522_v5  ;;  %4614 = vmatprep.subr.bf16.mxu1 %v5118_v63 }
0x15de   : > { %4615 = vmatpush3.bf16.msra.mxu1 %v5119_v0 }
0x15df   : > { %4616 = vmatprep.subr.bf16.mxu1 %v5120_v28 }
0x15e2   : > { %4617 = vmatpush3.bf16.msra.mxu1 %v5121_v30 }
0x15e3   : > { %4618 = vmatprep.subr.bf16.mxu1 %v5122_v31 }
0x15e6   : > { %4619 = vmatpush3.bf16.msra.mxu1 %v5123_v51 }
0x15e7   : > { %4620 = vmatprep.subr.bf16.mxu1 %v5124_v54 }
0x15ea   : > { %4621 = vmatpush3.bf16.msra.mxu1 %v5125_v55 }
0x1693   : > { %v3665_v11 = vpop.f32.mrf.mxu0 }
0x1694   : > { %v6593_v14 = vadd.f32 %v3665_v11, %v3544_v42 }
0x1695   : > { %v3667_v15 = vpop.f32.mrf.mxu0 }
0x1696   : > { %v6596_v17 = vmul.f32 0.70710677, %v6593_v14  ;;  %v6598_v22 = vadd.f32 %v3667_v15, %v3548_v43 }
0x1697   : > { %v3669_v25 = vpop.f32.mrf.mxu0 }
0x1698   : > { %v3700_v6 = vand.u32 2147483647, %v6596_v17  ;;  %v6602_v1 = vmul.f32 0.70710677, %v6598_v22  ;;  %v6604_v9 = vadd.f32 %v3669_v25, %v3544_v42  ;;  %vm3860_vm11 = vcmp.ge.f32.partialorder %v6596_v17, 0.0 }
0x1699   : > { %v3671_v34 = vpop.f32.mrf.mxu0 }
0x169a   : > { %v3708_v49 = vmul.f32 0.3275911, %v3700_v6  ;;  %v3701_v50 = vand.u32 2147483647, %v6602_v1  ;;  %v6608_v3 = vmul.f32 0.70710677, %v6604_v9  ;;  %v6610_v29 = vadd.f32 %v3671_v34, %v3548_v43 }
0x169b   : > { %v3675_v19 = vpop.f32.mrf.mxu0  ;;  %v3812_v53 = vmul.f32 %v3700_v6, %v3700_v6  ;;  %vm3861_vm12 = vcmp.ge.f32.partialorder %v6602_v1, 0.0 }
0x169c   : > { %v3716_v45 = vadd.f32 1.0, %v3708_v49  ;;  %v3709_v60 = vmul.f32 0.3275911, %v3701_v50  ;;  %v3702_v58 = vand.u32 2147483647, %v6608_v3  ;;  %v6617_v27 = vadd.f32 %v3675_v19, %v3544_v42 }
0x169d   : > { %v6614_v56 = vmul.f32 0.70710677, %v6610_v29  ;;  %v3677_v12 = vpop.f32.mrf.mxu0  ;;  %v3813_v8 = vmul.f32 %v3701_v50, %v3701_v50  ;;  %v3820_v13 = vsub.f32 0.0, %v3812_v53  ;;  %vm3862_vm13 = vcmp.ge.f32.partialorder %v6608_v3, 0.0 }
0x169e   : > { %5256 = vrcp.f32 %v3716_v45  ;;  %v3717_v20 = vadd.f32 1.0, %v3709_v60  ;;  %v3710_v48 = vmul.f32 0.3275911, %v3702_v58  ;;  %v6619_v32 = vadd.f32 %v3677_v12, %v3548_v43 }
0x169f   : > { %v3703_v52 = vand.u32 2147483647, %v6614_v56  ;;  %v3679_v46 = vpop.f32.mrf.mxu0  ;;  %v6622_v44 = vmul.f32 0.70710677, %v6617_v27  ;;  %v3821_v24 = vsub.f32 0.0, %v3813_v8  ;;  %v3814_v36 = vmul.f32 %v3702_v58, %v3702_v58 }
0x16a0   : > { %5258 = vrcp.f32 %v3717_v20  ;;  %v3718_v37 = vadd.f32 1.0, %v3710_v48  ;;  %v6626_v7 = vmul.f32 0.70710677, %v6619_v32  ;;  %v6628_v33 = vadd.f32 %v3679_v46, %v3544_v42 }
0x16a1   : > { %v3711_v61 = vmul.f32 0.3275911, %v3703_v52  ;;  %v3681_v16 = vpop.f32.mrf.mxu0  ;;  %v3704_v18 = vand.u32 2147483647, %v6622_v44  ;;  %v3828_v63 = vmul.f32 1.442695, %v3820_v13  ;;  %v3815_v0 = vmul.f32 %v3703_v52, %v3703_v52 }
0x16a2   : > { %5260 = vrcp.f32 %v3718_v37  ;;  %v6630_v10 = vadd.f32 %v3681_v16, %v3548_v43  ;;  %v3705_v5 = vand.u32 2147483647, %v6626_v7  ;;  %v6634_v21 = vmul.f32 0.70710677, %v6628_v33 }
0x16a3   : > { %v3719_v62 = vadd.f32 1.0, %v3711_v61  ;;  %v3712_v39 = vmul.f32 0.3275911, %v3704_v18  ;;  %v3830_v54 = vmul.f32 1.442695, %v3821_v24  ;;  %v3822_v55 = vsub.f32 0.0, %v3814_v36 }
0x16a4   : > { %v3713_v26 = vmul.f32 0.3275911, %v3705_v5  ;;  %v3706_v38 = vand.u32 2147483647, %v6634_v21  ;;  %v6638_v40 = vmul.f32 0.70710677, %v6630_v10  ;;  %v3816_v11 = vmul.f32 %v3704_v18, %v3704_v18 }
0x16a5   : > { %5262 = vrcp.f32 %v3719_v62  ;;  %v3720_v23 = vadd.f32 1.0, %v3712_v39  ;;  %v3823_v6 = vsub.f32 0.0, %v3815_v0  ;;  %v3817_v50 = vmul.f32 %v3705_v5, %v3705_v5 }
0x16a6   : > { %v3721_v28 = vadd.f32 1.0, %v3713_v26  ;;  %v3714_v30 = vmul.f32 0.3275911, %v3706_v38  ;;  %v3707_v51 = vand.u32 2147483647, %v6638_v40  ;;  %v3824_v20 = vsub.f32 0.0, %v3816_v11 }
0x16a7   : > { %5264 = vrcp.f32 %v3720_v23  ;;  %v3832_v58 = vmul.f32 1.442695, %v3822_v55  ;;  %v3834_v37 = vmul.f32 1.442695, %v3823_v6  ;;  %v3818_v61 = vmul.f32 %v3706_v38, %v3706_v38 }
0x16a8   : > { %5266 = vrcp.f32 %v3721_v28  ;;  %v3722_v35 = vadd.f32 1.0, %v3714_v30  ;;  %v3715_v15 = vmul.f32 0.3275911, %v3707_v51  ;;  %v3825_v16 = vsub.f32 0.0, %v3817_v50 }
0x16a9   : > { %5268 = vpow2.f32 %v3828_v63  ;;  %v3836_v5 = vmul.f32 1.442695, %v3824_v20  ;;  %v3826_v26 = vsub.f32 0.0, %v3818_v61  ;;  %v3686_v3 = vmul.f32 0.5, %v6604_v9 }
0x16aa   : > { %5270 = vrcp.f32 %v3722_v35  ;;  %v3723_v19 = vadd.f32 1.0, %v3715_v15  ;;  %v3838_v28 = vmul.f32 1.442695, %v3825_v16  ;;  %vm3863_vm14 = vcmp.ge.f32.partialorder %v6614_v56, 0.0 }
0x16ab   : > { %v6640_v59 = vpop.eup %5256  ;;  %5272 = vpow2.f32 %v3830_v54  ;;  %v3819_v54 = vmul.f32 %v3707_v51, %v3707_v51  ;;  %vm3865_vm15 = vcmp.ge.f32.partialorder %v6626_v7, 0.0  ;;  %vm3866_vm0 = vcmp.ge.f32.partialorder %v6634_v21, 0.0 }
0x16ac   : > { %v3740_v31 = vmul.f32 1.0614054, %v6640_v59  ;;  %5274 = vrcp.f32 %v3723_v19  ;;  %vm3864_vm1 = vcmp.ge.f32.partialorder %v6622_v44, 0.0  ;;  %vm3867_vm2 = vcmp.ge.f32.partialorder %v6638_v40, 0.0 }
0x16ad   : > { %v6644_v42 = vpop.eup %5258  ;;  %5276 = vpow2.f32 %v3832_v58  ;;  %v3691_v7 = vmul.f32 0.5, %v6630_v10  ;;  %v3688_v44 = vmul.f32 0.5, %v6617_v27  ;;  %v4493_v10 = vld [vmem:[%s773_s6] ss:$0 sm:$0xff] }
0x16ae   : > { %v3748_v43 = vadd.f32 -1.4531521, %v3740_v31  ;;  %v3741_v25 = vmul.f32 1.0614054, %v6644_v42  ;;  %5278 = vpow2.f32 %v3834_v37 }
0x16af   : > { %v6647_v34 = vpop.eup %5260  ;;  %5280 = vpow2.f32 %v3836_v5 }
0x16b0   : > { %v3756_v49 = vmul.f32 %v6640_v59, %v3748_v43  ;;  %v3749_v45 = vadd.f32 -1.4531521, %v3741_v25  ;;  %v3742_v60 = vmul.f32 1.0614054, %v6647_v34  ;;  %5282 = vpow2.f32 %v3838_v28 }
0x16b2   : > { %v3764_v12 = vadd.f32 1.4214138, %v3756_v49  ;;  %v6651_v48 = vpop.eup %5262  ;;  %v3757_v52 = vmul.f32 %v6644_v42, %v3749_v45  ;;  %v3750_v46 = vadd.f32 -1.4531521, %v3742_v60  ;;  %v3840_v49 = vmul.f32 1.442695, %v3826_v26 }
0x16b3   : > { %v3743_v62 = vmul.f32 1.0614054, %v6651_v48 }
0x16b4   : > { %v3772_v53 = vmul.f32 %v6640_v59, %v3764_v12  ;;  %v3765_v18 = vadd.f32 1.4214138, %v3757_v52  ;;  %v3758_v8 = vmul.f32 %v6647_v34, %v3750_v46  ;;  %v6657_v23 = vpop.eup %5264  ;;  %v3827_v52 = vsub.f32 0.0, %v3819_v54 }
0x16b5   : > { %v3751_v13 = vadd.f32 -1.4531521, %v3743_v62  ;;  %v3744_v0 = vmul.f32 1.0614054, %v6657_v23  ;;  %v6664_v55 = vpop.eup %5266  ;;  %5284 = vpow2.f32 %v3840_v49 }
0x16b6   : > { %v3780_v39 = vadd.f32 -0.28449672, %v3772_v53  ;;  %v3773_v24 = vmul.f32 %v6644_v42, %v3765_v18  ;;  %v3766_v36 = vadd.f32 1.4214138, %v3758_v8  ;;  %v3745_v6 = vmul.f32 1.0614054, %v6664_v55  ;;  %v5269_v50 = vpop.eup %5268 }
0x16b7   : > { %v3759_v63 = vmul.f32 %v6651_v48, %v3751_v13  ;;  %v3752_v11 = vadd.f32 -1.4531521, %v3744_v0  ;;  %v6671_v51 = vpop.eup %5270 }
0x16b8   : > { %v3788_v38 = vmul.f32 %v6640_v59, %v3780_v39  ;;  %v3781_v30 = vadd.f32 -0.28449672, %v3773_v24  ;;  %v3774_v31 = vmul.f32 %v6647_v34, %v3766_v36  ;;  %v3753_v20 = vadd.f32 -1.4531521, %v3745_v6  ;;  %v5273_v46 = vpop.eup %5272 }
0x16b9   : > { %v3767_v43 = vadd.f32 1.4214138, %v3759_v63  ;;  %v3760_v60 = vmul.f32 %v6657_v23, %v3752_v11  ;;  %v3746_v62 = vmul.f32 1.0614054, %v6671_v51  ;;  %v6675_v16 = vpop.eup %5274 }
0x16ba   : > { %v3796_v35 = vadd.f32 0.2548296, %v3788_v38  ;;  %v3789_v15 = vmul.f32 %v6644_v42, %v3781_v30  ;;  %v3782_v25 = vadd.f32 -0.28449672, %v3774_v31  ;;  %v3761_v8 = vmul.f32 %v6664_v55, %v3753_v20  ;;  %v5277_v0 = vpop.eup %5276 }
0x16bb   : > { %v3775_v45 = vmul.f32 %v6651_v48, %v3767_v43  ;;  %v3768_v53 = vadd.f32 1.4214138, %v3760_v60  ;;  %v3754_v24 = vadd.f32 -1.4531521, %v3746_v62  ;;  %v3747_v63 = vmul.f32 1.0614054, %v6675_v16 }
0x16bc   : > { %v3804_v19 = vmul.f32 %v6640_v59, %v3796_v35  ;;  %v3797_v58 = vadd.f32 0.2548296, %v3789_v15  ;;  %v3790_v12 = vmul.f32 %v6647_v34, %v3782_v25  ;;  %v3769_v38 = vadd.f32 1.4214138, %v3761_v8  ;;  %v5279_v15 = vpop.eup %5278 }
0x16bd   : > { %v3783_v61 = vadd.f32 -0.28449672, %v3775_v45  ;;  %v3776_v5 = vmul.f32 %v6657_v23, %v3768_v53  ;;  %v3842_v31 = vmul.f32 1.442695, %v3827_v52  ;;  %v3755_v11 = vadd.f32 -1.4531521, %v3747_v63  ;;  %v5281_v52 = vpop.eup %5280 }
0x16be   : > { %v3844_v37 = vmul.f32 %v5269_v50, %v3804_v19  ;;  %v3805_v59 = vmul.f32 %v6644_v42, %v3797_v58  ;;  %v3798_v18 = vadd.f32 0.2548296, %v3790_v12  ;;  %v3762_v42 = vmul.f32 %v6671_v51, %v3754_v24 }
0x16bf   : > { %v3791_v13 = vmul.f32 %v6651_v48, %v3783_v61  ;;  %v3784_v30 = vadd.f32 -0.28449672, %v3776_v5  ;;  %v3777_v43 = vmul.f32 %v6664_v55, %v3769_v38  ;;  %v3763_v20 = vmul.f32 %v6675_v16, %v3755_v11 }
0x16c0   : > { %v3852_v39 = vsub.f32 1.0, %v3844_v37  ;;  %v3845_v36 = vmul.f32 %v5273_v46, %v3805_v59  ;;  %v3806_v26 = vmul.f32 %v6647_v34, %v3798_v18  ;;  %v3770_v49 = vadd.f32 1.4214138, %v3762_v42  ;;  %v5283_v59 = vpop.eup %5282 }
0x16c1   : > { %v3799_v28 = vadd.f32 0.2548296, %v3791_v13  ;;  %v3792_v34 = vmul.f32 %v6657_v23, %v3784_v30  ;;  %v3785_v45 = vadd.f32 -0.28449672, %v3777_v43  ;;  %5286 = vpow2.f32 %v3842_v31 }
0x16c2   : > { %v3853_v54 = vsub.f32 1.0, %v3845_v36  ;;  %v3846_v35 = vmul.f32 %v5277_v0, %v3806_v26  ;;  %v3868_v25 = vsub.f32 0.0, %v3852_v39  ;;  %v3778_v12 = vmul.f32 %v6671_v51, %v3770_v49  ;;  %v5285_v38 = vpop.eup %5284 }
0x16c3   : > { %v3807_v6 = vmul.f32 %v6651_v48, %v3799_v28  ;;  %v3800_v58 = vadd.f32 0.2548296, %v3792_v34  ;;  %v3793_v48 = vmul.f32 %v6664_v55, %v3785_v45  ;;  %v3771_v5 = vadd.f32 1.4214138, %v3763_v20 }
0x16c4   : > { %v3869_v50 = vsub.f32 0.0, %v3853_v54  ;;  %v3854_v19 = vsub.f32 1.0, %v3846_v35  ;;  %v3876_v37 = vsel %vm3860_vm11, %v3852_v39, %v3868_v25  ;;  %v3786_v62 = vadd.f32 -0.28449672, %v3778_v12 }
0x16c5   : > { %v3847_v60 = vmul.f32 %v5279_v15, %v3807_v6  ;;  %v3808_v53 = vmul.f32 %v6657_v23, %v3800_v58  ;;  %v3801_v13 = vadd.f32 0.2548296, %v3793_v48  ;;  %v3687_v36 = vmul.f32 0.5, %v6610_v29 }
0x16c6   : > { %v3870_v46 = vsub.f32 0.0, %v3854_v19  ;;  %v3877_v18 = vsel %vm3861_vm12, %v3853_v54, %v3869_v50  ;;  %v3794_v23 = vmul.f32 %v6671_v51, %v3786_v62  ;;  %v3779_v39 = vmul.f32 %v6675_v16, %v3771_v5 }
0x16c7   : > { %v3855_v61 = vsub.f32 1.0, %v3847_v60  ;;  %v3809_v17 = vmul.f32 %v6664_v55, %v3801_v13  ;;  %v3884_v1 = vadd.f32 1.0, %v3876_v37  ;;  %v3885_v63 = vadd.f32 1.0, %v3877_v18 }
0x16c8   : > { %v3878_v8 = vsel %vm3862_vm13, %v3854_v19, %v3870_v46  ;;  %v3848_v28 = vmul.f32 %v5281_v52, %v3808_v53  ;;  %v3802_v9 = vadd.f32 0.2548296, %v3794_v23  ;;  %v3787_v31 = vadd.f32 -0.28449672, %v3779_v39 }
0x16c9   : > { %v3886_v24 = vadd.f32 1.0, %v3878_v8  ;;  %v3871_v26 = vsub.f32 0.0, %v3855_v61  ;;  %v3849_v42 = vmul.f32 %v5283_v59, %v3809_v17  ;;  %v3684_v29 = vmul.f32 0.5, %v6593_v14 }
0x16ca   : > { %v3685_v54 = vmul.f32 0.5, %v6598_v22  ;;  %v3810_v43 = vmul.f32 %v6671_v51, %v3802_v9  ;;  %v3795_v11 = vmul.f32 %v6675_v16, %v3787_v31  ;;  %v3856_v25 = vsub.f32 1.0, %v3848_v28 }
0x16cb   : > { %v3879_v0 = vsel %vm3863_vm14, %v3855_v61, %v3871_v26  ;;  %v3894_v56 = vmul.f32 %v3886_v24, %v3686_v3  ;;  %v3857_v55 = vsub.f32 1.0, %v3849_v42  ;;  %v3892_v6 = vmul.f32 %v3884_v1, %v3684_v29 }
0x16cc   : > { %v3887_v30 = vadd.f32 1.0, %v3879_v0  ;;  %v3893_v15 = vmul.f32 %v3885_v63, %v3685_v54  ;;  %v3850_v34 = vmul.f32 %v5285_v38, %v3810_v43  ;;  %v3803_v49 = vadd.f32 0.2548296, %v3795_v11 }
0x16cd   : > { %v3900_v19 = vpack.c.bf16 %v3894_v56, %v3892_v6  ;;  %v3873_v45 = vsub.f32 0.0, %v3857_v55  ;;  %v3872_v22 = vsub.f32 0.0, %v3856_v25  ;;  %v3690_v62 = vmul.f32 0.5, %v6628_v33 }
0x16ce   : > { %v3895_v35 = vmul.f32 %v3887_v30, %v3687_v36  ;;  %v3858_v60 = vsub.f32 1.0, %v3850_v34  ;;  %v3811_v14 = vmul.f32 %v6675_v16, %v3803_v49  ;;  %v5287_v58 = vpop.eup %5286  ;;  %v3689_v18 = vmul.f32 0.5, %v6619_v32 }
0x16cf   : > { %v3881_v51 = vsel %vm3865_vm15, %v3857_v55, %v3873_v45  ;;  %v3880_v48 = vsel %vm3864_vm1, %v3856_v25, %v3872_v22 }
0x16d0   : > { %v3901_v50 = vpack.c.bf16 %v3895_v35, %v3893_v15  ;;  %v3874_v12 = vsub.f32 0.0, %v3858_v60  ;;  %v3851_v20 = vmul.f32 %v5287_v58, %v3811_v14  ;;  %v3889_v53 = vadd.f32 1.0, %v3881_v51 }
0x16d1   : > { %v3888_v16 = vadd.f32 1.0, %v3880_v48 }
0x16d2   : > { %4071 = vmatprep.mubr.bf16.mxu1 %v3901_v50  ;;  %v3882_v52 = vsel %vm3866_vm0, %v3858_v60, %v3874_v12  ;;  %v3859_v46 = vsub.f32 1.0, %v3851_v20  ;;  %v3897_v13 = vmul.f32 %v3889_v53, %v3689_v18 }
0x16d3   : > { %4072 = vmatmul.mubr.bf16.vlgmr.msra.gmra.mxu1 %v3900_v19  ;;  %v3890_v37 = vadd.f32 1.0, %v3882_v52  ;;  %v3896_v3 = vmul.f32 %v3888_v16, %v3688_v44  ;;  %v4092_v16 = vld [vmem:[%s776_s15] sm:$0x1] }
0x16d4   : > { %v3875_v61 = vsub.f32 0.0, %v3859_v46 }
0x16d5   : > { %v3898_v8 = vmul.f32 %v3890_v37, %v3690_v62 }
0x16d6   : > { %v3883_v59 = vsel %vm3867_vm2, %v3859_v46, %v3875_v61 }
0x16d7   : > { %v3891_v21 = vadd.f32 1.0, %v3883_v59  ;;  %v3902_v36 = vpack.c.bf16 %v3898_v8, %v3896_v3 }
0x16d9   : > { %v3899_v5 = vmul.f32 %v3891_v21, %v3691_v7  ;;  %v4510_v7 = vld [vmem:[%s779_s1] ss:$0 sm:$0xff] }
0x16db   : > { %v3903_v24 = vpack.c.bf16 %v3899_v5, %v3897_v13 }
0x16dd   : > { %4079 = vmatprep.mubr.bf16.mxu1 %v3903_v24 }
0x16de   : > { %4080 = vmatmul.mubr.bf16.gmra.mxu1 %v3902_v36 }
0x1793   : > { %v4622_v40 = vpop.f32.mrf.mxu1 }
0x1795   : > { %v4623_v26 = vpop.f32.mrf.mxu1 }
0x1796   : > { %v4624_v32 = vadd.f32 %v4623_v26, %v4622_v40 }
0x1797   : > { %v4625_v33 = vpop.f32.mrf.mxu1 }
0x1798   : > { %v4074_v1 = vadd.f32 %v4624_v32, %v4493_v10 }
0x1799   : > { %v4626_v17 = vpop.f32.mrf.mxu1 }
0x179a   : > { %v4627_v23 = vadd.f32 %v4626_v17, %v4625_v33  ;;  %v4088_v9 = vadd.f32 %v4074_v1, %v6562_v47 }
0x179c   : > { %v4077_v39 = vadd.f32 %v4627_v23, %v4493_v10 }
0x179e   : > { %v4628_v27 = vpop.f32.mrf.mxu1  ;;  %v4089_v28 = vadd.f32 %v4077_v39, %v6560_v41 }
0x17a0   : > { %v4629_v38 = vpop.f32.mrf.mxu1  ;;  %v4094_v54 = vadd.f32 %v4089_v28, %v4088_v9 }
0x17a1   : > { %v4630_v63 = vadd.f32 %v4629_v38, %v4628_v27 }
0x17a2   : > { %v4631_v0 = vpop.f32.mrf.mxu1 }
0x17a3   : > { %v4082_v30 = vadd.f32 %v4630_v63, %v4493_v10 }
0x17a4   : > { %v4632_v42 = vpop.f32.mrf.mxu1 }
0x17a5   : > { %v4090_v31 = vadd.f32 %v4082_v30, %v6567_v2  ;;  %v4633_v29 = vadd.f32 %v4632_v42, %v4631_v0 }
0x17a7   : > { %v4085_v56 = vadd.f32 %v4633_v29, %v4493_v10  ;;  %v4095_v35 = vadd.f32 %v4094_v54, %v4090_v31 }
0x17a9   : > { %v4091_v55 = vadd.f32 %v4085_v56, %v6569_v4 }
0x17ab   : > { %v4096_v43 = vadd.f32 %v4095_v35, %v4091_v55 }
0x17ad   : > { %v4097_v11 = vrot.slane %v4096_v43, 4 }
0x17af   : > { %v4098_v15 = vadd.f32 %v4097_v11, %v4096_v43 }
0x17b1   : > { %v4099_v25 = vrot.slane %v4098_v15, 2 }
0x17b3   : > { %v4100_v6 = vadd.f32 %v4099_v25, %v4098_v15 }
0x17b5   : > { %v4101_v34 = vrot.slane %v4100_v6, 1 }
0x17b7   : > { %v4102_v49 = vadd.f32 %v4101_v34, %v4100_v6 }
0x17b9   : > { %v4103_v41 = vmul.f32 0.03125, %v4102_v49 }
0x17bb   : > { %v4104_v50 = vsub.f32 %v4088_v9, %v4103_v41  ;;  %v4105_v19 = vsub.f32 %v4089_v28, %v4103_v41  ;;  %v4106_v45 = vsub.f32 %v4090_v31, %v4103_v41  ;;  %v4107_v47 = vsub.f32 %v4091_v55, %v4103_v41 }
0x17bd   : > { %v4108_v60 = vmul.f32 %v4104_v50, %v4104_v50  ;;  %v4109_v2 = vmul.f32 %v4105_v19, %v4105_v19  ;;  %v4110_v14 = vmul.f32 %v4106_v45, %v4106_v45  ;;  %v4111_v22 = vmul.f32 %v4107_v47, %v4107_v47 }
0x17bf   : > { %v4112_v58 = vadd.f32 %v4109_v2, %v4108_v60 }
0x17c1   : > { %v4113_v4 = vadd.f32 %v4112_v58, %v4110_v14 }
0x17c3   : > { %v4114_v12 = vadd.f32 %v4113_v4, %v4111_v22 }
0x17c5   : > { %v4115_v20 = vrot.slane %v4114_v12, 4 }
0x17c7   : > { %v4116_v51 = vadd.f32 %v4115_v20, %v4114_v12 }
0x17c9   : > { %v4117_v52 = vrot.slane %v4116_v51, 2 }
0x17cb   : > { %v4118_v46 = vadd.f32 %v4117_v52, %v4116_v51 }
0x17cd   : > { %v4119_v48 = vrot.slane %v4118_v46, 1 }
0x17cf   : > { %v4120_v37 = vadd.f32 %v4119_v48, %v4118_v46 }
0x17d1   : > { %v4121_v61 = vmul.f32 0.03125, %v4120_v37 }
0x17d3   : > { %v4122_v53 = vadd.f32 1e-05, %v4121_v61 }
0x17d5   : > { %5288 = vrsqrt.f32 %v4122_v53 }
0x17e2   : > { %v5289_v62 = vpop.eup %5288 }
0x17e3   : > { %v4124_v59 = vmul.f32 %v5289_v62, %v4092_v16 }
0x17e5   : > { %v4128_v18 = vrot.slane %v4124_v59, %v6012_v57 }
0x17e7   : > { %v4129_v21 = vmul.f32 %v4128_v18, %v4104_v50  ;;  %v4130_v44 = vmul.f32 %v4128_v18, %v4105_v19  ;;  %v4131_v8 = vmul.f32 %v4128_v18, %v4106_v45  ;;  %v4132_v13 = vmul.f32 %v4128_v18, %v4107_v47 }
0x17e8   : > { %4150 = sbr.rel (%p4511_p11) target bundleno = 6143 (0x17ff), region = 116 }
0x17e9   : > { %v4139_v5 = vadd.f32 %v4510_v7, %v4129_v21  ;;  %v4140_v3 = vadd.f32 %v4510_v7, %v4130_v44  ;;  %v4141_v24 = vadd.f32 %v4510_v7, %v4131_v8  ;;  %v4142_v36 = vadd.f32 %v4510_v7, %v4132_v13 }
0x17eb   : > { %4143 = vst [vmem:[#allocation2 + $0x10] sm:$0xff] %v4139_v5  ;;  %4144 = vst [vmem:[#allocation2] sm:$0xff] %v4140_v3 }
0x17ec   : > { %4145 = vst [vmem:[#allocation2 + $0x18] sm:$0xff] %v4141_v24  ;;  %4146 = vst [vmem:[#allocation2 + $0x8] sm:$0xff] %v4142_v36 }
0x17ed   : > { %v4151_v57 = vadd.f32 %v4140_v3, %v4139_v5  ;;  %v4160_v40 = vadd.f32 %v4142_v36, %v4141_v24  ;;  %vm4168_vm3 = vcmask 1040384  }
0x17ef   : > { %v4152_v26 = vrot.slane %v4151_v57, 4  ;;  %v4161_v33 = vrot.slane %v4160_v40, 4 }
0x17f1   : > { %v4153_v17 = vadd.f32 %v4152_v26, %v4151_v57  ;;  %v4162_v23 = vadd.f32 %v4161_v33, %v4160_v40 }
0x17f3   : > { %v4154_v32 = vrot.slane %v4153_v17, 2  ;;  %v4163_v10 = vrot.slane %v4162_v23, 2 }
0x17f5   : > { %v4155_v27 = vadd.f32 %v4154_v32, %v4153_v17  ;;  %v4164_v39 = vadd.f32 %v4163_v10, %v4162_v23 }
0x17f7   : > { %v4156_v38 = vrot.slane %v4155_v27, 1  ;;  %v4165_v1 = vrot.slane %v4164_v39, 1 }
0x17f9   : > { %v4157_v63 = vadd.f32 %v4156_v38, %v4155_v27  ;;  %v4166_v0 = vadd.f32 %v4165_v1, %v4164_v39 }
0x17fb   : > { %v4159_v28 = vmul.f32 0.0625, %v4157_v63  ;;  %v4167_v30 = vmul.f32 0.0625, %v4166_v0 }
0x17fd   : > { %v4169_v42 = vsel %vm4168_vm3, %v4159_v28, %v4167_v30 }
0x17fe   : > { %4170 = vst [vmem:[#allocation13] sm:$0x3] %v4169_v42 }
0x17ff PF: > { %p4922_p4 = scmp.eq.s32.totalorder %s5658_s25, 2  ;;  %s5553_s16 = smov [#allocation13]  }
0x1800   : > { %s4178_s15 = sshll.u32 %s5553_s16, 4  ;;  %s4179_s15 = int_to_ptr.vmem [resolvable:$true] %s4178_s15 }
0x1801   : > { %s5458_s1 = scalar_lea.vmem %s4179_s15, 32  ;;  %p5465_p13 = scmp.lt.s32.totalorder %s4179_s15, %s4179_s15 }
0x1802   : > { %p5459_p9 = scmp.ne.s32.totalorder %s4179_s15, %s5458_s1  ;;  %p5466_p5 = scmp.lt.s32.totalorder %s5458_s1, %s5458_s1 }
0x1804   : > { %p5460_p8 = pnand %p5459_p9, %p4922_p4  ;;  %p5467_p1 = por %p5466_p5, %p5465_p13 }
0x1806   : > { %p5461_p10 = pneg %p5460_p8 }
0x1808   : > { %p5468_p12 = pnand %p5467_p1, %p5461_p10 }
0x180a   : > { %5471 = shalt.err (!%p5468_p12)
}
0x180b   : > { %s6844_s24 = sld [smem:[#allocation33_spill]] }
0x1811   : > { %4894 = dma.vmem_to_hbm [thread:$0]  (%p4922_p4), %s4179_s15, 32, %s6844_s24, [#allocation6]  }
0x1812   : > { %5511 = dma.done.wait (%p4922_p4), [#allocation6], 32  }
0x1813   : > { %5513 = vsyncadd (%p4922_p4), [#allocation6], 4294967264 }
0x1814 PF: > { %s6845_s24 = sld [smem:[#allocation19_spill]]  ;;  %s6848_s21 = smov %s5520_s22 }
0x1815   : > { %s6846_s2 = sld [smem:[#allocation18_spill]] }
0x1816   : > { %s6847_s23 = sld [smem:[#allocation20_spill]] }
0x181a   : > { %p26_p3 = scmp.ge.s32.totalorder %s6845_s24, 5  }
0x181b   : > { %s6849_s22 = smov %s6846_s2 }
0x181c   :  { %28 = sbr.rel (!%p26_p3) target bundleno = 18 (0x12), region = 200 }
0x1821   :  { %4191 = vsyncpa [#allocation5], 1 }
0x1822   :  { %4193 = vsyncpa [#allocation5 + $0x1], 1 }
0x1823   :  { %4194 = vsyncpa [#allocation8], 1 }
0x1824   :  { %4195 = vsyncpa [#allocation6], 1 }
0x1825   :  { %4197 = vsyncpa [#allocation6 + $0x1], 1 }

</bundles_post_ra>
